<compile_context>
chip_gen: v6e
topology: v6e:2x2x1
jax: 0.10.0
libtpu: 0.0.40
codegen_flags: <defaults>
</compile_context>

<pallas_src>
import functools

import jax
import jax.numpy as jnp
from jax.experimental import pallas as pl
from jax.experimental.pallas import tpu as pltpu

KSIZE = 7
PAD = 3
NTAPS = KSIZE * KSIZE


def _spatial_attn_kernel(w_ref, x_ref, o_ref, sum_ref, max_ref, maps_ref, *,
                         c_total, c_block):
    # w_ref   : SMEM (2*49 + 1,) f32   [w_avg(49), w_max(49), bias(1)]
    # x_ref   : VMEM (1, c_block, H, W)   un-padded input block
    # o_ref   : VMEM (1, 1, H, W)
    # sum_ref : VMEM (H, W) f32           running channel sum
    # max_ref : VMEM (H, W) f32           running channel max
    # maps_ref: VMEM (2, KSIZE, H+6, W+6) f32
    #           [map, kw] = reflect-padded avg/max map lane-shifted left by kw
    H = o_ref.shape[2]
    W = o_ref.shape[3]

    c = pl.program_id(1)
    n_c = pl.num_programs(1)

    @pl.when(c == 0)
    def _init():
        sum_ref[...] = jnp.zeros(sum_ref.shape, jnp.float32)
        max_ref[...] = jnp.full(max_ref.shape, -jnp.inf, jnp.float32)

    x = x_ref[0].astype(jnp.float32)                       # (c_block, H, W)
    if c_total % c_block != 0:
        # Mask out-of-range channels of the (possibly partial) last block.
        ch = jax.lax.broadcasted_iota(jnp.int32, x.shape, 0) + c * c_block
        valid = ch < c_total
        sum_ref[...] += jnp.sum(jnp.where(valid, x, 0.0), axis=0)
        max_ref[...] = jnp.maximum(
            max_ref[...], jnp.max(jnp.where(valid, x, -jnp.inf), axis=0))
    else:
        sum_ref[...] += jnp.sum(x, axis=0)
        max_ref[...] = jnp.maximum(max_ref[...], jnp.max(x, axis=0))

    @pl.when(c == n_c - 1)
    def _finalize():
        x_avg = sum_ref[...] * (1.0 / c_total)
        x_max = max_ref[...]

        def build_map(m, v):
            # Interior.
            maps_ref[m, 0, PAD:PAD + H, PAD:PAD + W] = v
            # Reflected rows (top / bottom): padded row r <- v[PAD - r], etc.
            for r in range(PAD):
                maps_ref[m, 0, r:r + 1, PAD:PAD + W] = v[PAD - r:PAD - r + 1, :]
                maps_ref[m, 0, PAD + H + r:PAD + H + r + 1, PAD:PAD + W] = (
                    v[H - 2 - r:H - 1 - r, :])
            # Reflected columns (corners come for free: rows already filled).
            for q in range(PAD):
                maps_ref[m, 0, :, q:q + 1] = (
                    maps_ref[m, 0, :, 2 * PAD - q:2 * PAD - q + 1])
                maps_ref[m, 0, :, PAD + W + q:PAD + W + q + 1] = (
                    maps_ref[m, 0, :, PAD + W - 2 - q:PAD + W - 1 - q])
            # Pre-shift along lanes once per kw so the tap loop below only
            # needs cheap sublane-offset loads (7 cross-lane moves per map).
            for kw in range(1, KSIZE):
                maps_ref[m, kw, :, 0:W] = maps_ref[m, 0, :, kw:kw + W]

        build_map(0, x_avg)
        build_map(1, x_max)

        # 7x7, 2->1 conv: 49 fused taps (avg + max per tap), 4 independent
        # accumulators to let the VALU slots fill instead of one serial chain.
        accs = [jnp.zeros((H, W), jnp.float32) for _ in range(4)]
        for kh in range(KSIZE):
            for kw in range(KSIZE):
                idx = kh * KSIZE + kw
                a_tap = maps_ref[0, kw, kh:kh + H, 0:W]
                m_tap = maps_ref[1, kw, kh:kh + H, 0:W]
                accs[idx % 4] = accs[idx % 4] + (
                    w_ref[idx] * a_tap + w_ref[NTAPS + idx] * m_tap)
        res = (accs[0] + accs[1]) + (accs[2] + accs[3]) + w_ref[2 * NTAPS]
        o_ref[0, 0] = res.astype(o_ref.dtype)


def spatial_attention(x, weight, bias, *, tile_c=None):
    """x: (N, C, H, W); weight: (1, 2, 7, 7); bias: (1,) -> (N, 1, H, W)."""
    N, C, H, W = x.shape
    assert H > PAD and W > PAD, "reflect padding needs H, W > 3"
    Hp, Wp = H + 2 * PAD, W + 2 * PAD

    if tile_c is None:
        # ~0.5 MiB of input per block: big enough to amortize the ~0.35 us
        # per-grid-step overhead, small enough that a double-buffered block
        # fits comfortably on every generation (incl. v7x's 64 MiB VMEM).
        per_ch = H * W * x.dtype.itemsize
        tile_c = int(max(1, min(C, (512 * 1024) // max(1, per_ch))))
    n_c = pl.cdiv(C, tile_c)

    # Conv parameters as one scalar-prefetch (SMEM) vector:
    # [weights for avg map (49), weights for max map (49), bias (1)].
    w_flat = jnp.concatenate(
        [weight[0, 0].reshape(-1), weight[0, 1].reshape(-1), bias.reshape(-1)]
    ).astype(jnp.float32)

    kernel = functools.partial(_spatial_attn_kernel, c_total=C, c_block=tile_c)

    grid_spec = pltpu.PrefetchScalarGridSpec(
        num_scalar_prefetch=1,
        grid=(N, n_c),                         # reduction (channel) axis last
        in_specs=[
            pl.BlockSpec((1, tile_c, H, W), lambda n, c, w: (n, c, 0, 0)),
        ],
        out_specs=pl.BlockSpec((1, 1, H, W), lambda n, c, w: (n, 0, 0, 0)),
        scratch_shapes=[
            pltpu.VMEM((H, W), jnp.float32),              # running sum
            pltpu.VMEM((H, W), jnp.float32),              # running max
            pltpu.VMEM((2, KSIZE, Hp, Wp), jnp.float32),  # padded+shifted maps
        ],
    )

    return pl.pallas_call(
        kernel,
        out_shape=jax.ShapeDtypeStruct((N, 1, H, W), x.dtype),
        grid_spec=grid_spec,
        compiler_params=pltpu.CompilerParams(
            dimension_semantics=("parallel", "arbitrary"),
            vmem_limit_bytes=48 * 1024 * 1024,
        ),
    )(w_flat, x)


def _reference(x, weight, bias):
    # Pure-JAX reference identical in structure to the PyTorch module.
    x_avg = jnp.mean(x, axis=1, keepdims=True)
    x_max = jnp.max(x, axis=1, keepdims=True)
    x2 = jnp.concatenate([x_avg, x_max], axis=1)
    x2p = jnp.pad(x2, ((0, 0), (0, 0), (PAD, PAD), (PAD, PAD)), mode="reflect")
    out = jax.lax.conv_general_dilated(
        x2p, weight, window_strides=(1, 1), padding="VALID",
        dimension_numbers=("NCHW", "OIHW", "NCHW"),
    )
    return out + bias[None, :, None, None]


if __name__ == "__main__":
    key = jax.random.PRNGKey(0)
    kx, kw, kb = jax.random.split(key, 3)

    N, C, H, W = 2, 4, 16, 16
    x = jax.random.normal(kx, (N, C, H, W), dtype=jnp.float32)

    # Conv2d(2, 1, k=7) parameters: weight (1,2,7,7), bias (1,).
    fan_in = 2 * KSIZE * KSIZE
    bound = 1.0 / (fan_in ** 0.5)
    weight = jax.random.uniform(kw, (1, 2, KSIZE, KSIZE), jnp.float32, -bound, bound)
    bias = jax.random.uniform(kb, (1,), jnp.float32, -bound, bound)

    out = spatial_attention(x, weight, bias)
    out = jax.block_until_ready(out)

    ref = _reference(x, weight, bias)
    assert out.shape == (N, 1, H, W)
    assert jnp.allclose(out, ref, atol=1e-4, rtol=1e-4), (
        float(jnp.max(jnp.abs(out - ref))))

    print("KERNEL_OK")
</pallas_src>

<mosaic_0001>
module attributes {stable_mosaic.version = 11 : i64} {
  func.func @_spatial_attn_kernel(%arg0: i32, %arg1: i32, %arg2: memref<99xf32, #tpu.memory_space<smem>>, %arg3: memref<1x4x16x16xf32, #tpu.memory_space<vmem>>, %arg4: memref<1x1x16x16xf32, #tpu.memory_space<vmem>>, %arg5: memref<16x16xf32, #tpu.memory_space<vmem>>, %arg6: memref<16x16xf32, #tpu.memory_space<vmem>>, %arg7: memref<2x7x22x22xf32, #tpu.memory_space<vmem>>) attributes {dimension_semantics = [#tpu.dimension_semantics<parallel>, #tpu.dimension_semantics<arbitrary>], iteration_bounds = array<i64: 2, 1>, scalar_prefetch = 1 : i64, scratch_operands = 3 : i64, tpu.core_type = #tpu.core_type<tc>, window_params = [{transform_indices = @transform_0, window_bounds = array<i64: 1, 4, 16, 16>}, {transform_indices = @transform_1, window_bounds = array<i64: 1, 1, 16, 16>}]} {
    %c0_i32 = arith.constant 0 : i32
    %0 = arith.cmpi eq, %arg1, %c0_i32 : i32
    %1 = arith.extui %0 : i1 to i32
    %c0_i32_0 = arith.constant 0 : i32
    %2 = arith.cmpi ne, %1, %c0_i32_0 : i32
    scf.if %2 {
      %cst_15 = arith.constant 0.000000e+00 : f32
      %16 = vector.broadcast %cst_15 : f32 to vector<16x16xf32>
      %c0_16 = arith.constant 0 : index
      %c0_17 = arith.constant 0 : index
      %17 = vector.load %arg5[%c0_16, %c0_17] : memref<16x16xf32, #tpu.memory_space<vmem>>, vector<16x16xf32>
      tpu.vector_store %arg5[%c0_16, %c0_17], %16 {strides = array<i32>} : memref<16x16xf32, #tpu.memory_space<vmem>>, vector<16x16xf32>,
      %cst_18 = arith.constant 0xFF800000 : f32
      %18 = vector.broadcast %cst_18 : f32 to vector<16x16xf32>
      %c0_19 = arith.constant 0 : index
      %c0_20 = arith.constant 0 : index
      %19 = vector.load %arg6[%c0_19, %c0_20] : memref<16x16xf32, #tpu.memory_space<vmem>>, vector<16x16xf32>
      tpu.vector_store %arg6[%c0_19, %c0_20], %18 {strides = array<i32>} : memref<16x16xf32, #tpu.memory_space<vmem>>, vector<16x16xf32>,
    } else {
    }
    %c0 = arith.constant 0 : index
    %c0_1 = arith.constant 0 : index
    %c0_2 = arith.constant 0 : index
    %c0_3 = arith.constant 0 : index
    %3 = vector.load %arg3[%c0, %c0_1, %c0_2, %c0_3] : memref<1x4x16x16xf32, #tpu.memory_space<vmem>>, vector<1x4x16x16xf32>
    %4 = vector.shape_cast %3 : vector<1x4x16x16xf32> to vector<4x16x16xf32>
    %c0_4 = arith.constant 0 : index
    %c0_5 = arith.constant 0 : index
    %5 = vector.load %arg5[%c0_4, %c0_5] : memref<16x16xf32, #tpu.memory_space<vmem>>, vector<16x16xf32>
    %cst = arith.constant dense<0.000000e+00> : vector<16x16xf32>
    %6 = vector.multi_reduction <add>, %4, %cst [0] : vector<4x16x16xf32> to vector<16x16xf32>
    %7 = arith.addf %5, %6 : vector<16x16xf32>
    %c0_6 = arith.constant 0 : index
    %c0_7 = arith.constant 0 : index
    %8 = vector.load %arg5[%c0_6, %c0_7] : memref<16x16xf32, #tpu.memory_space<vmem>>, vector<16x16xf32>
    tpu.vector_store %arg5[%c0_6, %c0_7], %7 {strides = array<i32>} : memref<16x16xf32, #tpu.memory_space<vmem>>, vector<16x16xf32>,
    %c0_8 = arith.constant 0 : index
    %c0_9 = arith.constant 0 : index
    %9 = vector.load %arg6[%c0_8, %c0_9] : memref<16x16xf32, #tpu.memory_space<vmem>>, vector<16x16xf32>
    %cst_10 = arith.constant dense<0xFF800000> : vector<16x16xf32>
    %10 = vector.multi_reduction <maximumf>, %4, %cst_10 [0] : vector<4x16x16xf32> to vector<16x16xf32>
    %11 = arith.maximumf %9, %10 : vector<16x16xf32>
    %c0_11 = arith.constant 0 : index
    %c0_12 = arith.constant 0 : index
    %12 = vector.load %arg6[%c0_11, %c0_12] : memref<16x16xf32, #tpu.memory_space<vmem>>, vector<16x16xf32>
    tpu.vector_store %arg6[%c0_11, %c0_12], %11 {strides = array<i32>} : memref<16x16xf32, #tpu.memory_space<vmem>>, vector<16x16xf32>,
    %c0_i32_13 = arith.constant 0 : i32
    %13 = arith.cmpi eq, %arg1, %c0_i32_13 : i32
    %14 = arith.extui %13 : i1 to i32
    %c0_i32_14 = arith.constant 0 : i32
    %15 = arith.cmpi ne, %14, %c0_i32_14 : i32
    scf.if %15 {
      %c0_15 = arith.constant 0 : index
      %c0_16 = arith.constant 0 : index
      %16 = vector.load %arg5[%c0_15, %c0_16] : memref<16x16xf32, #tpu.memory_space<vmem>>, vector<16x16xf32>
      %cst_17 = arith.constant 2.500000e-01 : f32
      %17 = vector.broadcast %cst_17 : f32 to vector<16x16xf32>
      %18 = arith.mulf %16, %17 : vector<16x16xf32>
      %c0_18 = arith.constant 0 : index
      %c0_19 = arith.constant 0 : index
      %19 = vector.load %arg6[%c0_18, %c0_19] : memref<16x16xf32, #tpu.memory_space<vmem>>, vector<16x16xf32>
      %c0_20 = arith.constant 0 : index
      %c0_21 = arith.constant 0 : index
      %c3 = arith.constant 3 : index
      %c3_22 = arith.constant 3 : index
      %20 = vector.load %arg7[%c0_20, %c0_21, %c3, %c3_22] : memref<2x7x22x22xf32, #tpu.memory_space<vmem>>, vector<1x1x16x16xf32>
      %21 = vector.shape_cast %20 : vector<1x1x16x16xf32> to vector<16x16xf32>
      %22 = vector.shape_cast %18 : vector<16x16xf32> to vector<1x1x16x16xf32>
      tpu.vector_store %arg7[%c0_20, %c0_21, %c3, %c3_22], %22 {strides = array<i32>} : memref<2x7x22x22xf32, #tpu.memory_space<vmem>>, vector<1x1x16x16xf32>,
      %23 = vector.extract_strided_slice %18 {offsets = [3, 0], sizes = [1, 16], strides = [1, 1]} : vector<16x16xf32> to vector<1x16xf32>
      %c0_23 = arith.constant 0 : index
      %c0_24 = arith.constant 0 : index
      %c0_25 = arith.constant 0 : index
      %c3_26 = arith.constant 3 : index
      %24 = vector.load %arg7[%c0_23, %c0_24, %c0_25, %c3_26] : memref<2x7x22x22xf32, #tpu.memory_space<vmem>>, vector<1x1x1x16xf32>
      %25 = vector.shape_cast %24 : vector<1x1x1x16xf32> to vector<1x16xf32>
      %26 = vector.shape_cast %23 : vector<1x16xf32> to vector<1x1x1x16xf32>
      tpu.vector_store %arg7[%c0_23, %c0_24, %c0_25, %c3_26], %26 {strides = array<i32>} : memref<2x7x22x22xf32, #tpu.memory_space<vmem>>, vector<1x1x1x16xf32>,
      %27 = vector.extract_strided_slice %18 {offsets = [14, 0], sizes = [1, 16], strides = [1, 1]} : vector<16x16xf32> to vector<1x16xf32>
      %c0_27 = arith.constant 0 : index
      %c0_28 = arith.constant 0 : index
      %c19 = arith.constant 19 : index
      %c3_29 = arith.constant 3 : index
      %28 = vector.load %arg7[%c0_27, %c0_28, %c19, %c3_29] : memref<2x7x22x22xf32, #tpu.memory_space<vmem>>, vector<1x1x1x16xf32>
      %29 = vector.shape_cast %28 : vector<1x1x1x16xf32> to vector<1x16xf32>
      %30 = vector.shape_cast %27 : vector<1x16xf32> to vector<1x1x1x16xf32>
      tpu.vector_store %arg7[%c0_27, %c0_28, %c19, %c3_29], %30 {strides = array<i32>} : memref<2x7x22x22xf32, #tpu.memory_space<vmem>>, vector<1x1x1x16xf32>,
      %31 = vector.extract_strided_slice %18 {offsets = [2, 0], sizes = [1, 16], strides = [1, 1]} : vector<16x16xf32> to vector<1x16xf32>
      %c0_30 = arith.constant 0 : index
      %c0_31 = arith.constant 0 : index
      %c1 = arith.constant 1 : index
      %c3_32 = arith.constant 3 : index
      %32 = vector.load %arg7[%c0_30, %c0_31, %c1, %c3_32] : memref<2x7x22x22xf32, #tpu.memory_space<vmem>>, vector<1x1x1x16xf32>
      %33 = vector.shape_cast %32 : vector<1x1x1x16xf32> to vector<1x16xf32>
      %34 = vector.shape_cast %31 : vector<1x16xf32> to vector<1x1x1x16xf32>
      tpu.vector_store %arg7[%c0_30, %c0_31, %c1, %c3_32], %34 {strides = array<i32>} : memref<2x7x22x22xf32, #tpu.memory_space<vmem>>, vector<1x1x1x16xf32>,
      %35 = vector.extract_strided_slice %18 {offsets = [13, 0], sizes = [1, 16], strides = [1, 1]} : vector<16x16xf32> to vector<1x16xf32>
      %c0_33 = arith.constant 0 : index
      %c0_34 = arith.constant 0 : index
      %c20 = arith.constant 20 : index
      %c3_35 = arith.constant 3 : index
      %36 = vector.load %arg7[%c0_33, %c0_34, %c20, %c3_35] : memref<2x7x22x22xf32, #tpu.memory_space<vmem>>, vector<1x1x1x16xf32>
      %37 = vector.shape_cast %36 : vector<1x1x1x16xf32> to vector<1x16xf32>
      %38 = vector.shape_cast %35 : vector<1x16xf32> to vector<1x1x1x16xf32>
      tpu.vector_store %arg7[%c0_33, %c0_34, %c20, %c3_35], %38 {strides = array<i32>} : memref<2x7x22x22xf32, #tpu.memory_space<vmem>>, vector<1x1x1x16xf32>,
      %39 = vector.extract_strided_slice %18 {offsets = [1, 0], sizes = [1, 16], strides = [1, 1]} : vector<16x16xf32> to vector<1x16xf32>
      %c0_36 = arith.constant 0 : index
      %c0_37 = arith.constant 0 : index
      %c2 = arith.constant 2 : index
      %c3_38 = arith.constant 3 : index
      %40 = vector.load %arg7[%c0_36, %c0_37, %c2, %c3_38] : memref<2x7x22x22xf32, #tpu.memory_space<vmem>>, vector<1x1x1x16xf32>
      %41 = vector.shape_cast %40 : vector<1x1x1x16xf32> to vector<1x16xf32>
      %42 = vector.shape_cast %39 : vector<1x16xf32> to vector<1x1x1x16xf32>
      tpu.vector_store %arg7[%c0_36, %c0_37, %c2, %c3_38], %42 {strides = array<i32>} : memref<2x7x22x22xf32, #tpu.memory_space<vmem>>, vector<1x1x1x16xf32>,
      %43 = vector.extract_strided_slice %18 {offsets = [12, 0], sizes = [1, 16], strides = [1, 1]} : vector<16x16xf32> to vector<1x16xf32>
      %c0_39 = arith.constant 0 : index
      %c0_40 = arith.constant 0 : index
      %c21 = arith.constant 21 : index
      %c3_41 = arith.constant 3 : index
      %44 = vector.load %arg7[%c0_39, %c0_40, %c21, %c3_41] : memref<2x7x22x22xf32, #tpu.memory_space<vmem>>, vector<1x1x1x16xf32>
      %45 = vector.shape_cast %44 : vector<1x1x1x16xf32> to vector<1x16xf32>
      %46 = vector.shape_cast %43 : vector<1x16xf32> to vector<1x1x1x16xf32>
      tpu.vector_store %arg7[%c0_39, %c0_40, %c21, %c3_41], %46 {strides = array<i32>} : memref<2x7x22x22xf32, #tpu.memory_space<vmem>>, vector<1x1x1x16xf32>,
      %c0_42 = arith.constant 0 : index
      %c0_43 = arith.constant 0 : index
      %c0_44 = arith.constant 0 : index
      %c6 = arith.constant 6 : index
      %47 = vector.load %arg7[%c0_42, %c0_43, %c0_44, %c6] : memref<2x7x22x22xf32, #tpu.memory_space<vmem>>, vector<1x1x22x1xf32>
      %48 = vector.shape_cast %47 : vector<1x1x22x1xf32> to vector<22x1xf32>
      %c0_45 = arith.constant 0 : index
      %c0_46 = arith.constant 0 : index
      %c0_47 = arith.constant 0 : index
      %c0_48 = arith.constant 0 : index
      %49 = vector.load %arg7[%c0_45, %c0_46, %c0_47, %c0_48] : memref<2x7x22x22xf32, #tpu.memory_space<vmem>>, vector<1x1x22x1xf32>
      %50 = vector.shape_cast %49 : vector<1x1x22x1xf32> to vector<22x1xf32>
      %51 = vector.shape_cast %48 : vector<22x1xf32> to vector<1x1x22x1xf32>
      tpu.vector_store %arg7[%c0_45, %c0_46, %c0_47, %c0_48], %51 {strides = array<i32>} : memref<2x7x22x22xf32, #tpu.memory_space<vmem>>, vector<1x1x22x1xf32>,
      %c0_49 = arith.constant 0 : index
      %c0_50 = arith.constant 0 : index
      %c0_51 = arith.constant 0 : index
      %c17 = arith.constant 17 : index
      %52 = vector.load %arg7[%c0_49, %c0_50, %c0_51, %c17] : memref<2x7x22x22xf32, #tpu.memory_space<vmem>>, vector<1x1x22x1xf32>
      %53 = vector.shape_cast %52 : vector<1x1x22x1xf32> to vector<22x1xf32>
      %c0_52 = arith.constant 0 : index
      %c0_53 = arith.constant 0 : index
      %c0_54 = arith.constant 0 : index
      %c19_55 = arith.constant 19 : index
      %54 = vector.load %arg7[%c0_52, %c0_53, %c0_54, %c19_55] : memref<2x7x22x22xf32, #tpu.memory_space<vmem>>, vector<1x1x22x1xf32>
      %55 = vector.shape_cast %54 : vector<1x1x22x1xf32> to vector<22x1xf32>
      %56 = vector.shape_cast %53 : vector<22x1xf32> to vector<1x1x22x1xf32>
      tpu.vector_store %arg7[%c0_52, %c0_53, %c0_54, %c19_55], %56 {strides = array<i32>} : memref<2x7x22x22xf32, #tpu.memory_space<vmem>>, vector<1x1x22x1xf32>,
      %c0_56 = arith.constant 0 : index
      %c0_57 = arith.constant 0 : index
      %c0_58 = arith.constant 0 : index
      %c5 = arith.constant 5 : index
      %57 = vector.load %arg7[%c0_56, %c0_57, %c0_58, %c5] : memref<2x7x22x22xf32, #tpu.memory_space<vmem>>, vector<1x1x22x1xf32>
      %58 = vector.shape_cast %57 : vector<1x1x22x1xf32> to vector<22x1xf32>
      %c0_59 = arith.constant 0 : index
      %c0_60 = arith.constant 0 : index
      %c0_61 = arith.constant 0 : index
      %c1_62 = arith.constant 1 : index
      %59 = vector.load %arg7[%c0_59, %c0_60, %c0_61, %c1_62] : memref<2x7x22x22xf32, #tpu.memory_space<vmem>>, vector<1x1x22x1xf32>
      %60 = vector.shape_cast %59 : vector<1x1x22x1xf32> to vector<22x1xf32>
      %61 = vector.shape_cast %58 : vector<22x1xf32> to vector<1x1x22x1xf32>
      tpu.vector_store %arg7[%c0_59, %c0_60, %c0_61, %c1_62], %61 {strides = array<i32>} : memref<2x7x22x22xf32, #tpu.memory_space<vmem>>, vector<1x1x22x1xf32>,
      %c0_63 = arith.constant 0 : index
      %c0_64 = arith.constant 0 : index
      %c0_65 = arith.constant 0 : index
      %c16 = arith.constant 16 : index
      %62 = vector.load %arg7[%c0_63, %c0_64, %c0_65, %c16] : memref<2x7x22x22xf32, #tpu.memory_space<vmem>>, vector<1x1x22x1xf32>
      %63 = vector.shape_cast %62 : vector<1x1x22x1xf32> to vector<22x1xf32>
      %c0_66 = arith.constant 0 : index
      %c0_67 = arith.constant 0 : index
      %c0_68 = arith.constant 0 : index
      %c20_69 = arith.constant 20 : index
      %64 = vector.load %arg7[%c0_66, %c0_67, %c0_68, %c20_69] : memref<2x7x22x22xf32, #tpu.memory_space<vmem>>, vector<1x1x22x1xf32>
      %65 = vector.shape_cast %64 : vector<1x1x22x1xf32> to vector<22x1xf32>
      %66 = vector.shape_cast %63 : vector<22x1xf32> to vector<1x1x22x1xf32>
      tpu.vector_store %arg7[%c0_66, %c0_67, %c0_68, %c20_69], %66 {strides = array<i32>} : memref<2x7x22x22xf32, #tpu.memory_space<vmem>>, vector<1x1x22x1xf32>,
      %c0_70 = arith.constant 0 : index
      %c0_71 = arith.constant 0 : index
      %c0_72 = arith.constant 0 : index
      %c4 = arith.constant 4 : index
      %67 = vector.load %arg7[%c0_70, %c0_71, %c0_72, %c4] : memref<2x7x22x22xf32, #tpu.memory_space<vmem>>, vector<1x1x22x1xf32>
      %68 = vector.shape_cast %67 : vector<1x1x22x1xf32> to vector<22x1xf32>
      %c0_73 = arith.constant 0 : index
      %c0_74 = arith.constant 0 : index
      %c0_75 = arith.constant 0 : index
      %c2_76 = arith.constant 2 : index
      %69 = vector.load %arg7[%c0_73, %c0_74, %c0_75, %c2_76] : memref<2x7x22x22xf32, #tpu.memory_space<vmem>>, vector<1x1x22x1xf32>
      %70 = vector.shape_cast %69 : vector<1x1x22x1xf32> to vector<22x1xf32>
      %71 = vector.shape_cast %68 : vector<22x1xf32> to vector<1x1x22x1xf32>
      tpu.vector_store %arg7[%c0_73, %c0_74, %c0_75, %c2_76], %71 {strides = array<i32>} : memref<2x7x22x22xf32, #tpu.memory_space<vmem>>, vector<1x1x22x1xf32>,
      %c0_77 = arith.constant 0 : index
      %c0_78 = arith.constant 0 : index
      %c0_79 = arith.constant 0 : index
      %c15 = arith.constant 15 : index
      %72 = vector.load %arg7[%c0_77, %c0_78, %c0_79, %c15] : memref<2x7x22x22xf32, #tpu.memory_space<vmem>>, vector<1x1x22x1xf32>
      %73 = vector.shape_cast %72 : vector<1x1x22x1xf32> to vector<22x1xf32>
      %c0_80 = arith.constant 0 : index
      %c0_81 = arith.constant 0 : index
      %c0_82 = arith.constant 0 : index
      %c21_83 = arith.constant 21 : index
      %74 = vector.load %arg7[%c0_80, %c0_81, %c0_82, %c21_83] : memref<2x7x22x22xf32, #tpu.memory_space<vmem>>, vector<1x1x22x1xf32>
      %75 = vector.shape_cast %74 : vector<1x1x22x1xf32> to vector<22x1xf32>
      %76 = vector.shape_cast %73 : vector<22x1xf32> to vector<1x1x22x1xf32>
      tpu.vector_store %arg7[%c0_80, %c0_81, %c0_82, %c21_83], %76 {strides = array<i32>} : memref<2x7x22x22xf32, #tpu.memory_space<vmem>>, vector<1x1x22x1xf32>,
      %c0_84 = arith.constant 0 : index
      %c0_85 = arith.constant 0 : index
      %c0_86 = arith.constant 0 : index
      %c1_87 = arith.constant 1 : index
      %77 = vector.load %arg7[%c0_84, %c0_85, %c0_86, %c1_87] : memref<2x7x22x22xf32, #tpu.memory_space<vmem>>, vector<1x1x22x16xf32>
      %78 = vector.shape_cast %77 : vector<1x1x22x16xf32> to vector<22x16xf32>
      %c0_88 = arith.constant 0 : index
      %c1_89 = arith.constant 1 : index
      %c0_90 = arith.constant 0 : index
      %c0_91 = arith.constant 0 : index
      %79 = vector.load %arg7[%c0_88, %c1_89, %c0_90, %c0_91] : memref<2x7x22x22xf32, #tpu.memory_space<vmem>>, vector<1x1x22x16xf32>
      %80 = vector.shape_cast %79 : vector<1x1x22x16xf32> to vector<22x16xf32>
      %81 = vector.shape_cast %78 : vector<22x16xf32> to vector<1x1x22x16xf32>
      tpu.vector_store %arg7[%c0_88, %c1_89, %c0_90, %c0_91], %81 {strides = array<i32>} : memref<2x7x22x22xf32, #tpu.memory_space<vmem>>, vector<1x1x22x16xf32>,
      %c0_92 = arith.constant 0 : index
      %c0_93 = arith.constant 0 : index
      %c0_94 = arith.constant 0 : index
      %c2_95 = arith.constant 2 : index
      %82 = vector.load %arg7[%c0_92, %c0_93, %c0_94, %c2_95] : memref<2x7x22x22xf32, #tpu.memory_space<vmem>>, vector<1x1x22x16xf32>
      %83 = vector.shape_cast %82 : vector<1x1x22x16xf32> to vector<22x16xf32>
      %c0_96 = arith.constant 0 : index
      %c2_97 = arith.constant 2 : index
      %c0_98 = arith.constant 0 : index
      %c0_99 = arith.constant 0 : index
      %84 = vector.load %arg7[%c0_96, %c2_97, %c0_98, %c0_99] : memref<2x7x22x22xf32, #tpu.memory_space<vmem>>, vector<1x1x22x16xf32>
      %85 = vector.shape_cast %84 : vector<1x1x22x16xf32> to vector<22x16xf32>
      %86 = vector.shape_cast %83 : vector<22x16xf32> to vector<1x1x22x16xf32>
      tpu.vector_store %arg7[%c0_96, %c2_97, %c0_98, %c0_99], %86 {strides = array<i32>} : memref<2x7x22x22xf32, #tpu.memory_space<vmem>>, vector<1x1x22x16xf32>,
      %c0_100 = arith.constant 0 : index
      %c0_101 = arith.constant 0 : index
      %c0_102 = arith.constant 0 : index
      %c3_103 = arith.constant 3 : index
      %87 = vector.load %arg7[%c0_100, %c0_101, %c0_102, %c3_103] : memref<2x7x22x22xf32, #tpu.memory_space<vmem>>, vector<1x1x22x16xf32>
      %88 = vector.shape_cast %87 : vector<1x1x22x16xf32> to vector<22x16xf32>
      %c0_104 = arith.constant 0 : index
      %c3_105 = arith.constant 3 : index
      %c0_106 = arith.constant 0 : index
      %c0_107 = arith.constant 0 : index
      %89 = vector.load %arg7[%c0_104, %c3_105, %c0_106, %c0_107] : memref<2x7x22x22xf32, #tpu.memory_space<vmem>>, vector<1x1x22x16xf32>
      %90 = vector.shape_cast %89 : vector<1x1x22x16xf32> to vector<22x16xf32>
      %91 = vector.shape_cast %88 : vector<22x16xf32> to vector<1x1x22x16xf32>
      tpu.vector_store %arg7[%c0_104, %c3_105, %c0_106, %c0_107], %91 {strides = array<i32>} : memref<2x7x22x22xf32, #tpu.memory_space<vmem>>, vector<1x1x22x16xf32>,
      %c0_108 = arith.constant 0 : index
      %c0_109 = arith.constant 0 : index
      %c0_110 = arith.constant 0 : index
      %c4_111 = arith.constant 4 : index
      %92 = vector.load %arg7[%c0_108, %c0_109, %c0_110, %c4_111] : memref<2x7x22x22xf32, #tpu.memory_space<vmem>>, vector<1x1x22x16xf32>
      %93 = vector.shape_cast %92 : vector<1x1x22x16xf32> to vector<22x16xf32>
      %c0_112 = arith.constant 0 : index
      %c4_113 = arith.constant 4 : index
      %c0_114 = arith.constant 0 : index
      %c0_115 = arith.constant 0 : index
      %94 = vector.load %arg7[%c0_112, %c4_113, %c0_114, %c0_115] : memref<2x7x22x22xf32, #tpu.memory_space<vmem>>, vector<1x1x22x16xf32>
      %95 = vector.shape_cast %94 : vector<1x1x22x16xf32> to vector<22x16xf32>
      %96 = vector.shape_cast %93 : vector<22x16xf32> to vector<1x1x22x16xf32>
      tpu.vector_store %arg7[%c0_112, %c4_113, %c0_114, %c0_115], %96 {strides = array<i32>} : memref<2x7x22x22xf32, #tpu.memory_space<vmem>>, vector<1x1x22x16xf32>,
      %c0_116 = arith.constant 0 : index
      %c0_117 = arith.constant 0 : index
      %c0_118 = arith.constant 0 : index
      %c5_119 = arith.constant 5 : index
      %97 = vector.load %arg7[%c0_116, %c0_117, %c0_118, %c5_119] : memref<2x7x22x22xf32, #tpu.memory_space<vmem>>, vector<1x1x22x16xf32>
      %98 = vector.shape_cast %97 : vector<1x1x22x16xf32> to vector<22x16xf32>
      %c0_120 = arith.constant 0 : index
      %c5_121 = arith.constant 5 : index
      %c0_122 = arith.constant 0 : index
      %c0_123 = arith.constant 0 : index
      %99 = vector.load %arg7[%c0_120, %c5_121, %c0_122, %c0_123] : memref<2x7x22x22xf32, #tpu.memory_space<vmem>>, vector<1x1x22x16xf32>
      %100 = vector.shape_cast %99 : vector<1x1x22x16xf32> to vector<22x16xf32>
      %101 = vector.shape_cast %98 : vector<22x16xf32> to vector<1x1x22x16xf32>
      tpu.vector_store %arg7[%c0_120, %c5_121, %c0_122, %c0_123], %101 {strides = array<i32>} : memref<2x7x22x22xf32, #tpu.memory_space<vmem>>, vector<1x1x22x16xf32>,
      %c0_124 = arith.constant 0 : index
      %c0_125 = arith.constant 0 : index
      %c0_126 = arith.constant 0 : index
      %c6_127 = arith.constant 6 : index
      %102 = vector.load %arg7[%c0_124, %c0_125, %c0_126, %c6_127] : memref<2x7x22x22xf32, #tpu.memory_space<vmem>>, vector<1x1x22x16xf32>
      %103 = vector.shape_cast %102 : vector<1x1x22x16xf32> to vector<22x16xf32>
      %c0_128 = arith.constant 0 : index
      %c6_129 = arith.constant 6 : index
      %c0_130 = arith.constant 0 : index
      %c0_131 = arith.constant 0 : index
      %104 = vector.load %arg7[%c0_128, %c6_129, %c0_130, %c0_131] : memref<2x7x22x22xf32, #tpu.memory_space<vmem>>, vector<1x1x22x16xf32>
      %105 = vector.shape_cast %104 : vector<1x1x22x16xf32> to vector<22x16xf32>
      %106 = vector.shape_cast %103 : vector<22x16xf32> to vector<1x1x22x16xf32>
      tpu.vector_store %arg7[%c0_128, %c6_129, %c0_130, %c0_131], %106 {strides = array<i32>} : memref<2x7x22x22xf32, #tpu.memory_space<vmem>>, vector<1x1x22x16xf32>,
      %c1_132 = arith.constant 1 : index
      %c0_133 = arith.constant 0 : index
      %c3_134 = arith.constant 3 : index
      %c3_135 = arith.constant 3 : index
      %107 = vector.load %arg7[%c1_132, %c0_133, %c3_134, %c3_135] : memref<2x7x22x22xf32, #tpu.memory_space<vmem>>, vector<1x1x16x16xf32>
      %108 = vector.shape_cast %107 : vector<1x1x16x16xf32> to vector<16x16xf32>
      %109 = vector.shape_cast %19 : vector<16x16xf32> to vector<1x1x16x16xf32>
      tpu.vector_store %arg7[%c1_132, %c0_133, %c3_134, %c3_135], %109 {strides = array<i32>} : memref<2x7x22x22xf32, #tpu.memory_space<vmem>>, vector<1x1x16x16xf32>,
      %110 = vector.extract_strided_slice %19 {offsets = [3, 0], sizes = [1, 16], strides = [1, 1]} : vector<16x16xf32> to vector<1x16xf32>
      %c1_136 = arith.constant 1 : index
      %c0_137 = arith.constant 0 : index
      %c0_138 = arith.constant 0 : index
      %c3_139 = arith.constant 3 : index
      %111 = vector.load %arg7[%c1_136, %c0_137, %c0_138, %c3_139] : memref<2x7x22x22xf32, #tpu.memory_space<vmem>>, vector<1x1x1x16xf32>
      %112 = vector.shape_cast %111 : vector<1x1x1x16xf32> to vector<1x16xf32>
      %113 = vector.shape_cast %110 : vector<1x16xf32> to vector<1x1x1x16xf32>
      tpu.vector_store %arg7[%c1_136, %c0_137, %c0_138, %c3_139], %113 {strides = array<i32>} : memref<2x7x22x22xf32, #tpu.memory_space<vmem>>, vector<1x1x1x16xf32>,
      %114 = vector.extract_strided_slice %19 {offsets = [14, 0], sizes = [1, 16], strides = [1, 1]} : vector<16x16xf32> to vector<1x16xf32>
      %c1_140 = arith.constant 1 : index
      %c0_141 = arith.constant 0 : index
      %c19_142 = arith.constant 19 : index
      %c3_143 = arith.constant 3 : index
      %115 = vector.load %arg7[%c1_140, %c0_141, %c19_142, %c3_143] : memref<2x7x22x22xf32, #tpu.memory_space<vmem>>, vector<1x1x1x16xf32>
      %116 = vector.shape_cast %115 : vector<1x1x1x16xf32> to vector<1x16xf32>
      %117 = vector.shape_cast %114 : vector<1x16xf32> to vector<1x1x1x16xf32>
      tpu.vector_store %arg7[%c1_140, %c0_141, %c19_142, %c3_143], %117 {strides = array<i32>} : memref<2x7x22x22xf32, #tpu.memory_space<vmem>>, vector<1x1x1x16xf32>,
      %118 = vector.extract_strided_slice %19 {offsets = [2, 0], sizes = [1, 16], strides = [1, 1]} : vector<16x16xf32> to vector<1x16xf32>
      %c1_144 = arith.constant 1 : index
      %c0_145 = arith.constant 0 : index
      %c1_146 = arith.constant 1 : index
      %c3_147 = arith.constant 3 : index
      %119 = vector.load %arg7[%c1_144, %c0_145, %c1_146, %c3_147] : memref<2x7x22x22xf32, #tpu.memory_space<vmem>>, vector<1x1x1x16xf32>
      %120 = vector.shape_cast %119 : vector<1x1x1x16xf32> to vector<1x16xf32>
      %121 = vector.shape_cast %118 : vector<1x16xf32> to vector<1x1x1x16xf32>
      tpu.vector_store %arg7[%c1_144, %c0_145, %c1_146, %c3_147], %121 {strides = array<i32>} : memref<2x7x22x22xf32, #tpu.memory_space<vmem>>, vector<1x1x1x16xf32>,
      %122 = vector.extract_strided_slice %19 {offsets = [13, 0], sizes = [1, 16], strides = [1, 1]} : vector<16x16xf32> to vector<1x16xf32>
      %c1_148 = arith.constant 1 : index
      %c0_149 = arith.constant 0 : index
      %c20_150 = arith.constant 20 : index
      %c3_151 = arith.constant 3 : index
      %123 = vector.load %arg7[%c1_148, %c0_149, %c20_150, %c3_151] : memref<2x7x22x22xf32, #tpu.memory_space<vmem>>, vector<1x1x1x16xf32>
      %124 = vector.shape_cast %123 : vector<1x1x1x16xf32> to vector<1x16xf32>
      %125 = vector.shape_cast %122 : vector<1x16xf32> to vector<1x1x1x16xf32>
      tpu.vector_store %arg7[%c1_148, %c0_149, %c20_150, %c3_151], %125 {strides = array<i32>} : memref<2x7x22x22xf32, #tpu.memory_space<vmem>>, vector<1x1x1x16xf32>,
      %126 = vector.extract_strided_slice %19 {offsets = [1, 0], sizes = [1, 16], strides = [1, 1]} : vector<16x16xf32> to vector<1x16xf32>
      %c1_152 = arith.constant 1 : index
      %c0_153 = arith.constant 0 : index
      %c2_154 = arith.constant 2 : index
      %c3_155 = arith.constant 3 : index
      %127 = vector.load %arg7[%c1_152, %c0_153, %c2_154, %c3_155] : memref<2x7x22x22xf32, #tpu.memory_space<vmem>>, vector<1x1x1x16xf32>
      %128 = vector.shape_cast %127 : vector<1x1x1x16xf32> to vector<1x16xf32>
      %129 = vector.shape_cast %126 : vector<1x16xf32> to vector<1x1x1x16xf32>
      tpu.vector_store %arg7[%c1_152, %c0_153, %c2_154, %c3_155], %129 {strides = array<i32>} : memref<2x7x22x22xf32, #tpu.memory_space<vmem>>, vector<1x1x1x16xf32>,
      %130 = vector.extract_strided_slice %19 {offsets = [12, 0], sizes = [1, 16], strides = [1, 1]} : vector<16x16xf32> to vector<1x16xf32>
      %c1_156 = arith.constant 1 : index
      %c0_157 = arith.constant 0 : index
      %c21_158 = arith.constant 21 : index
      %c3_159 = arith.constant 3 : index
      %131 = vector.load %arg7[%c1_156, %c0_157, %c21_158, %c3_159] : memref<2x7x22x22xf32, #tpu.memory_space<vmem>>, vector<1x1x1x16xf32>
      %132 = vector.shape_cast %131 : vector<1x1x1x16xf32> to vector<1x16xf32>
      %133 = vector.shape_cast %130 : vector<1x16xf32> to vector<1x1x1x16xf32>
      tpu.vector_store %arg7[%c1_156, %c0_157, %c21_158, %c3_159], %133 {strides = array<i32>} : memref<2x7x22x22xf32, #tpu.memory_space<vmem>>, vector<1x1x1x16xf32>,
      %c1_160 = arith.constant 1 : index
      %c0_161 = arith.constant 0 : index
      %c0_162 = arith.constant 0 : index
      %c6_163 = arith.constant 6 : index
      %134 = vector.load %arg7[%c1_160, %c0_161, %c0_162, %c6_163] : memref<2x7x22x22xf32, #tpu.memory_space<vmem>>, vector<1x1x22x1xf32>
      %135 = vector.shape_cast %134 : vector<1x1x22x1xf32> to vector<22x1xf32>
      %c1_164 = arith.constant 1 : index
      %c0_165 = arith.constant 0 : index
      %c0_166 = arith.constant 0 : index
      %c0_167 = arith.constant 0 : index
      %136 = vector.load %arg7[%c1_164, %c0_165, %c0_166, %c0_167] : memref<2x7x22x22xf32, #tpu.memory_space<vmem>>, vector<1x1x22x1xf32>
      %137 = vector.shape_cast %136 : vector<1x1x22x1xf32> to vector<22x1xf32>
      %138 = vector.shape_cast %135 : vector<22x1xf32> to vector<1x1x22x1xf32>
      tpu.vector_store %arg7[%c1_164, %c0_165, %c0_166, %c0_167], %138 {strides = array<i32>} : memref<2x7x22x22xf32, #tpu.memory_space<vmem>>, vector<1x1x22x1xf32>,
      %c1_168 = arith.constant 1 : index
      %c0_169 = arith.constant 0 : index
      %c0_170 = arith.constant 0 : index
      %c17_171 = arith.constant 17 : index
      %139 = vector.load %arg7[%c1_168, %c0_169, %c0_170, %c17_171] : memref<2x7x22x22xf32, #tpu.memory_space<vmem>>, vector<1x1x22x1xf32>
      %140 = vector.shape_cast %139 : vector<1x1x22x1xf32> to vector<22x1xf32>
      %c1_172 = arith.constant 1 : index
      %c0_173 = arith.constant 0 : index
      %c0_174 = arith.constant 0 : index
      %c19_175 = arith.constant 19 : index
      %141 = vector.load %arg7[%c1_172, %c0_173, %c0_174, %c19_175] : memref<2x7x22x22xf32, #tpu.memory_space<vmem>>, vector<1x1x22x1xf32>
      %142 = vector.shape_cast %141 : vector<1x1x22x1xf32> to vector<22x1xf32>
      %143 = vector.shape_cast %140 : vector<22x1xf32> to vector<1x1x22x1xf32>
      tpu.vector_store %arg7[%c1_172, %c0_173, %c0_174, %c19_175], %143 {strides = array<i32>} : memref<2x7x22x22xf32, #tpu.memory_space<vmem>>, vector<1x1x22x1xf32>,
      %c1_176 = arith.constant 1 : index
      %c0_177 = arith.constant 0 : index
      %c0_178 = arith.constant 0 : index
      %c5_179 = arith.constant 5 : index
      %144 = vector.load %arg7[%c1_176, %c0_177, %c0_178, %c5_179] : memref<2x7x22x22xf32, #tpu.memory_space<vmem>>, vector<1x1x22x1xf32>
      %145 = vector.shape_cast %144 : vector<1x1x22x1xf32> to vector<22x1xf32>
      %c1_180 = arith.constant 1 : index
      %c0_181 = arith.constant 0 : index
      %c0_182 = arith.constant 0 : index
      %c1_183 = arith.constant 1 : index
      %146 = vector.load %arg7[%c1_180, %c0_181, %c0_182, %c1_183] : memref<2x7x22x22xf32, #tpu.memory_space<vmem>>, vector<1x1x22x1xf32>
      %147 = vector.shape_cast %146 : vector<1x1x22x1xf32> to vector<22x1xf32>
      %148 = vector.shape_cast %145 : vector<22x1xf32> to vector<1x1x22x1xf32>
      tpu.vector_store %arg7[%c1_180, %c0_181, %c0_182, %c1_183], %148 {strides = array<i32>} : memref<2x7x22x22xf32, #tpu.memory_space<vmem>>, vector<1x1x22x1xf32>,
      %c1_184 = arith.constant 1 : index
      %c0_185 = arith.constant 0 : index
      %c0_186 = arith.constant 0 : index
      %c16_187 = arith.constant 16 : index
      %149 = vector.load %arg7[%c1_184, %c0_185, %c0_186, %c16_187] : memref<2x7x22x22xf32, #tpu.memory_space<vmem>>, vector<1x1x22x1xf32>
      %150 = vector.shape_cast %149 : vector<1x1x22x1xf32> to vector<22x1xf32>
      %c1_188 = arith.constant 1 : index
      %c0_189 = arith.constant 0 : index
      %c0_190 = arith.constant 0 : index
      %c20_191 = arith.constant 20 : index
      %151 = vector.load %arg7[%c1_188, %c0_189, %c0_190, %c20_191] : memref<2x7x22x22xf32, #tpu.memory_space<vmem>>, vector<1x1x22x1xf32>
      %152 = vector.shape_cast %151 : vector<1x1x22x1xf32> to vector<22x1xf32>
      %153 = vector.shape_cast %150 : vector<22x1xf32> to vector<1x1x22x1xf32>
      tpu.vector_store %arg7[%c1_188, %c0_189, %c0_190, %c20_191], %153 {strides = array<i32>} : memref<2x7x22x22xf32, #tpu.memory_space<vmem>>, vector<1x1x22x1xf32>,
      %c1_192 = arith.constant 1 : index
      %c0_193 = arith.constant 0 : index
      %c0_194 = arith.constant 0 : index
      %c4_195 = arith.constant 4 : index
      %154 = vector.load %arg7[%c1_192, %c0_193, %c0_194, %c4_195] : memref<2x7x22x22xf32, #tpu.memory_space<vmem>>, vector<1x1x22x1xf32>
      %155 = vector.shape_cast %154 : vector<1x1x22x1xf32> to vector<22x1xf32>
      %c1_196 = arith.constant 1 : index
      %c0_197 = arith.constant 0 : index
      %c0_198 = arith.constant 0 : index
      %c2_199 = arith.constant 2 : index
      %156 = vector.load %arg7[%c1_196, %c0_197, %c0_198, %c2_199] : memref<2x7x22x22xf32, #tpu.memory_space<vmem>>, vector<1x1x22x1xf32>
      %157 = vector.shape_cast %156 : vector<1x1x22x1xf32> to vector<22x1xf32>
      %158 = vector.shape_cast %155 : vector<22x1xf32> to vector<1x1x22x1xf32>
      tpu.vector_store %arg7[%c1_196, %c0_197, %c0_198, %c2_199], %158 {strides = array<i32>} : memref<2x7x22x22xf32, #tpu.memory_space<vmem>>, vector<1x1x22x1xf32>,
      %c1_200 = arith.constant 1 : index
      %c0_201 = arith.constant 0 : index
      %c0_202 = arith.constant 0 : index
      %c15_203 = arith.constant 15 : index
      %159 = vector.load %arg7[%c1_200, %c0_201, %c0_202, %c15_203] : memref<2x7x22x22xf32, #tpu.memory_space<vmem>>, vector<1x1x22x1xf32>
      %160 = vector.shape_cast %159 : vector<1x1x22x1xf32> to vector<22x1xf32>
      %c1_204 = arith.constant 1 : index
      %c0_205 = arith.constant 0 : index
      %c0_206 = arith.constant 0 : index
      %c21_207 = arith.constant 21 : index
      %161 = vector.load %arg7[%c1_204, %c0_205, %c0_206, %c21_207] : memref<2x7x22x22xf32, #tpu.memory_space<vmem>>, vector<1x1x22x1xf32>
      %162 = vector.shape_cast %161 : vector<1x1x22x1xf32> to vector<22x1xf32>
      %163 = vector.shape_cast %160 : vector<22x1xf32> to vector<1x1x22x1xf32>
      tpu.vector_store %arg7[%c1_204, %c0_205, %c0_206, %c21_207], %163 {strides = array<i32>} : memref<2x7x22x22xf32, #tpu.memory_space<vmem>>, vector<1x1x22x1xf32>,
      %c1_208 = arith.constant 1 : index
      %c0_209 = arith.constant 0 : index
      %c0_210 = arith.constant 0 : index
      %c1_211 = arith.constant 1 : index
      %164 = vector.load %arg7[%c1_208, %c0_209, %c0_210, %c1_211] : memref<2x7x22x22xf32, #tpu.memory_space<vmem>>, vector<1x1x22x16xf32>
      %165 = vector.shape_cast %164 : vector<1x1x22x16xf32> to vector<22x16xf32>
      %c1_212 = arith.constant 1 : index
      %c1_213 = arith.constant 1 : index
      %c0_214 = arith.constant 0 : index
      %c0_215 = arith.constant 0 : index
      %166 = vector.load %arg7[%c1_212, %c1_213, %c0_214, %c0_215] : memref<2x7x22x22xf32, #tpu.memory_space<vmem>>, vector<1x1x22x16xf32>
      %167 = vector.shape_cast %166 : vector<1x1x22x16xf32> to vector<22x16xf32>
      %168 = vector.shape_cast %165 : vector<22x16xf32> to vector<1x1x22x16xf32>
      tpu.vector_store %arg7[%c1_212, %c1_213, %c0_214, %c0_215], %168 {strides = array<i32>} : memref<2x7x22x22xf32, #tpu.memory_space<vmem>>, vector<1x1x22x16xf32>,
      %c1_216 = arith.constant 1 : index
      %c0_217 = arith.constant 0 : index
      %c0_218 = arith.constant 0 : index
      %c2_219 = arith.constant 2 : index
      %169 = vector.load %arg7[%c1_216, %c0_217, %c0_218, %c2_219] : memref<2x7x22x22xf32, #tpu.memory_space<vmem>>, vector<1x1x22x16xf32>
      %170 = vector.shape_cast %169 : vector<1x1x22x16xf32> to vector<22x16xf32>
      %c1_220 = arith.constant 1 : index
      %c2_221 = arith.constant 2 : index
      %c0_222 = arith.constant 0 : index
      %c0_223 = arith.constant 0 : index
      %171 = vector.load %arg7[%c1_220, %c2_221, %c0_222, %c0_223] : memref<2x7x22x22xf32, #tpu.memory_space<vmem>>, vector<1x1x22x16xf32>
      %172 = vector.shape_cast %171 : vector<1x1x22x16xf32> to vector<22x16xf32>
      %173 = vector.shape_cast %170 : vector<22x16xf32> to vector<1x1x22x16xf32>
      tpu.vector_store %arg7[%c1_220, %c2_221, %c0_222, %c0_223], %173 {strides = array<i32>} : memref<2x7x22x22xf32, #tpu.memory_space<vmem>>, vector<1x1x22x16xf32>,
      %c1_224 = arith.constant 1 : index
      %c0_225 = arith.constant 0 : index
      %c0_226 = arith.constant 0 : index
      %c3_227 = arith.constant 3 : index
      %174 = vector.load %arg7[%c1_224, %c0_225, %c0_226, %c3_227] : memref<2x7x22x22xf32, #tpu.memory_space<vmem>>, vector<1x1x22x16xf32>
      %175 = vector.shape_cast %174 : vector<1x1x22x16xf32> to vector<22x16xf32>
      %c1_228 = arith.constant 1 : index
      %c3_229 = arith.constant 3 : index
      %c0_230 = arith.constant 0 : index
      %c0_231 = arith.constant 0 : index
      %176 = vector.load %arg7[%c1_228, %c3_229, %c0_230, %c0_231] : memref<2x7x22x22xf32, #tpu.memory_space<vmem>>, vector<1x1x22x16xf32>
      %177 = vector.shape_cast %176 : vector<1x1x22x16xf32> to vector<22x16xf32>
      %178 = vector.shape_cast %175 : vector<22x16xf32> to vector<1x1x22x16xf32>
      tpu.vector_store %arg7[%c1_228, %c3_229, %c0_230, %c0_231], %178 {strides = array<i32>} : memref<2x7x22x22xf32, #tpu.memory_space<vmem>>, vector<1x1x22x16xf32>,
      %c1_232 = arith.constant 1 : index
      %c0_233 = arith.constant 0 : index
      %c0_234 = arith.constant 0 : index
      %c4_235 = arith.constant 4 : index
      %179 = vector.load %arg7[%c1_232, %c0_233, %c0_234, %c4_235] : memref<2x7x22x22xf32, #tpu.memory_space<vmem>>, vector<1x1x22x16xf32>
      %180 = vector.shape_cast %179 : vector<1x1x22x16xf32> to vector<22x16xf32>
      %c1_236 = arith.constant 1 : index
      %c4_237 = arith.constant 4 : index
      %c0_238 = arith.constant 0 : index
      %c0_239 = arith.constant 0 : index
      %181 = vector.load %arg7[%c1_236, %c4_237, %c0_238, %c0_239] : memref<2x7x22x22xf32, #tpu.memory_space<vmem>>, vector<1x1x22x16xf32>
      %182 = vector.shape_cast %181 : vector<1x1x22x16xf32> to vector<22x16xf32>
      %183 = vector.shape_cast %180 : vector<22x16xf32> to vector<1x1x22x16xf32>
      tpu.vector_store %arg7[%c1_236, %c4_237, %c0_238, %c0_239], %183 {strides = array<i32>} : memref<2x7x22x22xf32, #tpu.memory_space<vmem>>, vector<1x1x22x16xf32>,
      %c1_240 = arith.constant 1 : index
      %c0_241 = arith.constant 0 : index
      %c0_242 = arith.constant 0 : index
      %c5_243 = arith.constant 5 : index
      %184 = vector.load %arg7[%c1_240, %c0_241, %c0_242, %c5_243] : memref<2x7x22x22xf32, #tpu.memory_space<vmem>>, vector<1x1x22x16xf32>
      %185 = vector.shape_cast %184 : vector<1x1x22x16xf32> to vector<22x16xf32>
      %c1_244 = arith.constant 1 : index
      %c5_245 = arith.constant 5 : index
      %c0_246 = arith.constant 0 : index
      %c0_247 = arith.constant 0 : index
      %186 = vector.load %arg7[%c1_244, %c5_245, %c0_246, %c0_247] : memref<2x7x22x22xf32, #tpu.memory_space<vmem>>, vector<1x1x22x16xf32>
      %187 = vector.shape_cast %186 : vector<1x1x22x16xf32> to vector<22x16xf32>
      %188 = vector.shape_cast %185 : vector<22x16xf32> to vector<1x1x22x16xf32>
      tpu.vector_store %arg7[%c1_244, %c5_245, %c0_246, %c0_247], %188 {strides = array<i32>} : memref<2x7x22x22xf32, #tpu.memory_space<vmem>>, vector<1x1x22x16xf32>,
      %c1_248 = arith.constant 1 : index
      %c0_249 = arith.constant 0 : index
      %c0_250 = arith.constant 0 : index
      %c6_251 = arith.constant 6 : index
      %189 = vector.load %arg7[%c1_248, %c0_249, %c0_250, %c6_251] : memref<2x7x22x22xf32, #tpu.memory_space<vmem>>, vector<1x1x22x16xf32>
      %190 = vector.shape_cast %189 : vector<1x1x22x16xf32> to vector<22x16xf32>
      %c1_252 = arith.constant 1 : index
      %c6_253 = arith.constant 6 : index
      %c0_254 = arith.constant 0 : index
      %c0_255 = arith.constant 0 : index
      %191 = vector.load %arg7[%c1_252, %c6_253, %c0_254, %c0_255] : memref<2x7x22x22xf32, #tpu.memory_space<vmem>>, vector<1x1x22x16xf32>
      %192 = vector.shape_cast %191 : vector<1x1x22x16xf32> to vector<22x16xf32>
      %193 = vector.shape_cast %190 : vector<22x16xf32> to vector<1x1x22x16xf32>
      tpu.vector_store %arg7[%c1_252, %c6_253, %c0_254, %c0_255], %193 {strides = array<i32>} : memref<2x7x22x22xf32, #tpu.memory_space<vmem>>, vector<1x1x22x16xf32>,
      %cst_256 = arith.constant 0.000000e+00 : f32
      %194 = vector.broadcast %cst_256 : f32 to vector<16x16xf32>
      %cst_257 = arith.constant 0.000000e+00 : f32
      %195 = vector.broadcast %cst_257 : f32 to vector<16x16xf32>
      %cst_258 = arith.constant 0.000000e+00 : f32
      %196 = vector.broadcast %cst_258 : f32 to vector<16x16xf32>
      %cst_259 = arith.constant 0.000000e+00 : f32
      %197 = vector.broadcast %cst_259 : f32 to vector<16x16xf32>
      %c0_260 = arith.constant 0 : index
      %c0_261 = arith.constant 0 : index
      %c0_262 = arith.constant 0 : index
      %c0_263 = arith.constant 0 : index
      %198 = vector.load %arg7[%c0_260, %c0_261, %c0_262, %c0_263] : memref<2x7x22x22xf32, #tpu.memory_space<vmem>>, vector<1x1x16x16xf32>
      %199 = vector.shape_cast %198 : vector<1x1x16x16xf32> to vector<16x16xf32>
      %c1_264 = arith.constant 1 : index
      %c0_265 = arith.constant 0 : index
      %c0_266 = arith.constant 0 : index
      %c0_267 = arith.constant 0 : index
      %200 = vector.load %arg7[%c1_264, %c0_265, %c0_266, %c0_267] : memref<2x7x22x22xf32, #tpu.memory_space<vmem>>, vector<1x1x16x16xf32>
      %201 = vector.shape_cast %200 : vector<1x1x16x16xf32> to vector<16x16xf32>
      %c0_268 = arith.constant 0 : index
      %202 = memref.load %arg2[%c0_268] : memref<99xf32, #tpu.memory_space<smem>>
      %203 = vector.broadcast %202 : f32 to vector<16x16xf32>
      %204 = arith.mulf %203, %199 : vector<16x16xf32>
      %c49 = arith.constant 49 : index
      %205 = memref.load %arg2[%c49] : memref<99xf32, #tpu.memory_space<smem>>
      %206 = vector.broadcast %205 : f32 to vector<16x16xf32>
      %207 = arith.mulf %206, %201 : vector<16x16xf32>
      %208 = arith.addf %204, %207 : vector<16x16xf32>
      %209 = arith.addf %194, %208 : vector<16x16xf32>
      %c0_269 = arith.constant 0 : index
      %c1_270 = arith.constant 1 : index
      %c0_271 = arith.constant 0 : index
      %c0_272 = arith.constant 0 : index
      %210 = vector.load %arg7[%c0_269, %c1_270, %c0_271, %c0_272] : memref<2x7x22x22xf32, #tpu.memory_space<vmem>>, vector<1x1x16x16xf32>
      %211 = vector.shape_cast %210 : vector<1x1x16x16xf32> to vector<16x16xf32>
      %c1_273 = arith.constant 1 : index
      %c1_274 = arith.constant 1 : index
      %c0_275 = arith.constant 0 : index
      %c0_276 = arith.constant 0 : index
      %212 = vector.load %arg7[%c1_273, %c1_274, %c0_275, %c0_276] : memref<2x7x22x22xf32, #tpu.memory_space<vmem>>, vector<1x1x16x16xf32>
      %213 = vector.shape_cast %212 : vector<1x1x16x16xf32> to vector<16x16xf32>
      %c1_277 = arith.constant 1 : index
      %214 = memref.load %arg2[%c1_277] : memref<99xf32, #tpu.memory_space<smem>>
      %215 = vector.broadcast %214 : f32 to vector<16x16xf32>
      %216 = arith.mulf %215, %211 : vector<16x16xf32>
      %c50 = arith.constant 50 : index
      %217 = memref.load %arg2[%c50] : memref<99xf32, #tpu.memory_space<smem>>
      %218 = vector.broadcast %217 : f32 to vector<16x16xf32>
      %219 = arith.mulf %218, %213 : vector<16x16xf32>
      %220 = arith.addf %216, %219 : vector<16x16xf32>
      %221 = arith.addf %195, %220 : vector<16x16xf32>
      %c0_278 = arith.constant 0 : index
      %c2_279 = arith.constant 2 : index
      %c0_280 = arith.constant 0 : index
      %c0_281 = arith.constant 0 : index
      %222 = vector.load %arg7[%c0_278, %c2_279, %c0_280, %c0_281] : memref<2x7x22x22xf32, #tpu.memory_space<vmem>>, vector<1x1x16x16xf32>
      %223 = vector.shape_cast %222 : vector<1x1x16x16xf32> to vector<16x16xf32>
      %c1_282 = arith.constant 1 : index
      %c2_283 = arith.constant 2 : index
      %c0_284 = arith.constant 0 : index
      %c0_285 = arith.constant 0 : index
      %224 = vector.load %arg7[%c1_282, %c2_283, %c0_284, %c0_285] : memref<2x7x22x22xf32, #tpu.memory_space<vmem>>, vector<1x1x16x16xf32>
      %225 = vector.shape_cast %224 : vector<1x1x16x16xf32> to vector<16x16xf32>
      %c2_286 = arith.constant 2 : index
      %226 = memref.load %arg2[%c2_286] : memref<99xf32, #tpu.memory_space<smem>>
      %227 = vector.broadcast %226 : f32 to vector<16x16xf32>
      %228 = arith.mulf %227, %223 : vector<16x16xf32>
      %c51 = arith.constant 51 : index
      %229 = memref.load %arg2[%c51] : memref<99xf32, #tpu.memory_space<smem>>
      %230 = vector.broadcast %229 : f32 to vector<16x16xf32>
      %231 = arith.mulf %230, %225 : vector<16x16xf32>
      %232 = arith.addf %228, %231 : vector<16x16xf32>
      %233 = arith.addf %196, %232 : vector<16x16xf32>
      %c0_287 = arith.constant 0 : index
      %c3_288 = arith.constant 3 : index
      %c0_289 = arith.constant 0 : index
      %c0_290 = arith.constant 0 : index
      %234 = vector.load %arg7[%c0_287, %c3_288, %c0_289, %c0_290] : memref<2x7x22x22xf32, #tpu.memory_space<vmem>>, vector<1x1x16x16xf32>
      %235 = vector.shape_cast %234 : vector<1x1x16x16xf32> to vector<16x16xf32>
      %c1_291 = arith.constant 1 : index
      %c3_292 = arith.constant 3 : index
      %c0_293 = arith.constant 0 : index
      %c0_294 = arith.constant 0 : index
      %236 = vector.load %arg7[%c1_291, %c3_292, %c0_293, %c0_294] : memref<2x7x22x22xf32, #tpu.memory_space<vmem>>, vector<1x1x16x16xf32>
      %237 = vector.shape_cast %236 : vector<1x1x16x16xf32> to vector<16x16xf32>
      %c3_295 = arith.constant 3 : index
      %238 = memref.load %arg2[%c3_295] : memref<99xf32, #tpu.memory_space<smem>>
      %239 = vector.broadcast %238 : f32 to vector<16x16xf32>
      %240 = arith.mulf %239, %235 : vector<16x16xf32>
      %c52 = arith.constant 52 : index
      %241 = memref.load %arg2[%c52] : memref<99xf32, #tpu.memory_space<smem>>
      %242 = vector.broadcast %241 : f32 to vector<16x16xf32>
      %243 = arith.mulf %242, %237 : vector<16x16xf32>
      %244 = arith.addf %240, %243 : vector<16x16xf32>
      %245 = arith.addf %197, %244 : vector<16x16xf32>
      %c0_296 = arith.constant 0 : index
      %c4_297 = arith.constant 4 : index
      %c0_298 = arith.constant 0 : index
      %c0_299 = arith.constant 0 : index
      %246 = vector.load %arg7[%c0_296, %c4_297, %c0_298, %c0_299] : memref<2x7x22x22xf32, #tpu.memory_space<vmem>>, vector<1x1x16x16xf32>
      %247 = vector.shape_cast %246 : vector<1x1x16x16xf32> to vector<16x16xf32>
      %c1_300 = arith.constant 1 : index
      %c4_301 = arith.constant 4 : index
      %c0_302 = arith.constant 0 : index
      %c0_303 = arith.constant 0 : index
      %248 = vector.load %arg7[%c1_300, %c4_301, %c0_302, %c0_303] : memref<2x7x22x22xf32, #tpu.memory_space<vmem>>, vector<1x1x16x16xf32>
      %249 = vector.shape_cast %248 : vector<1x1x16x16xf32> to vector<16x16xf32>
      %c4_304 = arith.constant 4 : index
      %250 = memref.load %arg2[%c4_304] : memref<99xf32, #tpu.memory_space<smem>>
      %251 = vector.broadcast %250 : f32 to vector<16x16xf32>
      %252 = arith.mulf %251, %247 : vector<16x16xf32>
      %c53 = arith.constant 53 : index
      %253 = memref.load %arg2[%c53] : memref<99xf32, #tpu.memory_space<smem>>
      %254 = vector.broadcast %253 : f32 to vector<16x16xf32>
      %255 = arith.mulf %254, %249 : vector<16x16xf32>
      %256 = arith.addf %252, %255 : vector<16x16xf32>
      %257 = arith.addf %209, %256 : vector<16x16xf32>
      %c0_305 = arith.constant 0 : index
      %c5_306 = arith.constant 5 : index
      %c0_307 = arith.constant 0 : index
      %c0_308 = arith.constant 0 : index
      %258 = vector.load %arg7[%c0_305, %c5_306, %c0_307, %c0_308] : memref<2x7x22x22xf32, #tpu.memory_space<vmem>>, vector<1x1x16x16xf32>
      %259 = vector.shape_cast %258 : vector<1x1x16x16xf32> to vector<16x16xf32>
      %c1_309 = arith.constant 1 : index
      %c5_310 = arith.constant 5 : index
      %c0_311 = arith.constant 0 : index
      %c0_312 = arith.constant 0 : index
      %260 = vector.load %arg7[%c1_309, %c5_310, %c0_311, %c0_312] : memref<2x7x22x22xf32, #tpu.memory_space<vmem>>, vector<1x1x16x16xf32>
      %261 = vector.shape_cast %260 : vector<1x1x16x16xf32> to vector<16x16xf32>
      %c5_313 = arith.constant 5 : index
      %262 = memref.load %arg2[%c5_313] : memref<99xf32, #tpu.memory_space<smem>>
      %263 = vector.broadcast %262 : f32 to vector<16x16xf32>
      %264 = arith.mulf %263, %259 : vector<16x16xf32>
      %c54 = arith.constant 54 : index
      %265 = memref.load %arg2[%c54] : memref<99xf32, #tpu.memory_space<smem>>
      %266 = vector.broadcast %265 : f32 to vector<16x16xf32>
      %267 = arith.mulf %266, %261 : vector<16x16xf32>
      %268 = arith.addf %264, %267 : vector<16x16xf32>
      %269 = arith.addf %221, %268 : vector<16x16xf32>
      %c0_314 = arith.constant 0 : index
      %c6_315 = arith.constant 6 : index
      %c0_316 = arith.constant 0 : index
      %c0_317 = arith.constant 0 : index
      %270 = vector.load %arg7[%c0_314, %c6_315, %c0_316, %c0_317] : memref<2x7x22x22xf32, #tpu.memory_space<vmem>>, vector<1x1x16x16xf32>
      %271 = vector.shape_cast %270 : vector<1x1x16x16xf32> to vector<16x16xf32>
      %c1_318 = arith.constant 1 : index
      %c6_319 = arith.constant 6 : index
      %c0_320 = arith.constant 0 : index
      %c0_321 = arith.constant 0 : index
      %272 = vector.load %arg7[%c1_318, %c6_319, %c0_320, %c0_321] : memref<2x7x22x22xf32, #tpu.memory_space<vmem>>, vector<1x1x16x16xf32>
      %273 = vector.shape_cast %272 : vector<1x1x16x16xf32> to vector<16x16xf32>
      %c6_322 = arith.constant 6 : index
      %274 = memref.load %arg2[%c6_322] : memref<99xf32, #tpu.memory_space<smem>>
      %275 = vector.broadcast %274 : f32 to vector<16x16xf32>
      %276 = arith.mulf %275, %271 : vector<16x16xf32>
      %c55 = arith.constant 55 : index
      %277 = memref.load %arg2[%c55] : memref<99xf32, #tpu.memory_space<smem>>
      %278 = vector.broadcast %277 : f32 to vector<16x16xf32>
      %279 = arith.mulf %278, %273 : vector<16x16xf32>
      %280 = arith.addf %276, %279 : vector<16x16xf32>
      %281 = arith.addf %233, %280 : vector<16x16xf32>
      %c0_323 = arith.constant 0 : index
      %c0_324 = arith.constant 0 : index
      %c1_325 = arith.constant 1 : index
      %c0_326 = arith.constant 0 : index
      %282 = vector.load %arg7[%c0_323, %c0_324, %c1_325, %c0_326] : memref<2x7x22x22xf32, #tpu.memory_space<vmem>>, vector<1x1x16x16xf32>
      %283 = vector.shape_cast %282 : vector<1x1x16x16xf32> to vector<16x16xf32>
      %c1_327 = arith.constant 1 : index
      %c0_328 = arith.constant 0 : index
      %c1_329 = arith.constant 1 : index
      %c0_330 = arith.constant 0 : index
      %284 = vector.load %arg7[%c1_327, %c0_328, %c1_329, %c0_330] : memref<2x7x22x22xf32, #tpu.memory_space<vmem>>, vector<1x1x16x16xf32>
      %285 = vector.shape_cast %284 : vector<1x1x16x16xf32> to vector<16x16xf32>
      %c7 = arith.constant 7 : index
      %286 = memref.load %arg2[%c7] : memref<99xf32, #tpu.memory_space<smem>>
      %287 = vector.broadcast %286 : f32 to vector<16x16xf32>
      %288 = arith.mulf %287, %283 : vector<16x16xf32>
      %c56 = arith.constant 56 : index
      %289 = memref.load %arg2[%c56] : memref<99xf32, #tpu.memory_space<smem>>
      %290 = vector.broadcast %289 : f32 to vector<16x16xf32>
      %291 = arith.mulf %290, %285 : vector<16x16xf32>
      %292 = arith.addf %288, %291 : vector<16x16xf32>
      %293 = arith.addf %245, %292 : vector<16x16xf32>
      %c0_331 = arith.constant 0 : index
      %c1_332 = arith.constant 1 : index
      %c1_333 = arith.constant 1 : index
      %c0_334 = arith.constant 0 : index
      %294 = vector.load %arg7[%c0_331, %c1_332, %c1_333, %c0_334] : memref<2x7x22x22xf32, #tpu.memory_space<vmem>>, vector<1x1x16x16xf32>
      %295 = vector.shape_cast %294 : vector<1x1x16x16xf32> to vector<16x16xf32>
      %c1_335 = arith.constant 1 : index
      %c1_336 = arith.constant 1 : index
      %c1_337 = arith.constant 1 : index
      %c0_338 = arith.constant 0 : index
      %296 = vector.load %arg7[%c1_335, %c1_336, %c1_337, %c0_338] : memref<2x7x22x22xf32, #tpu.memory_space<vmem>>, vector<1x1x16x16xf32>
      %297 = vector.shape_cast %296 : vector<1x1x16x16xf32> to vector<16x16xf32>
      %c8 = arith.constant 8 : index
      %298 = memref.load %arg2[%c8] : memref<99xf32, #tpu.memory_space<smem>>
      %299 = vector.broadcast %298 : f32 to vector<16x16xf32>
      %300 = arith.mulf %299, %295 : vector<16x16xf32>
      %c57 = arith.constant 57 : index
      %301 = memref.load %arg2[%c57] : memref<99xf32, #tpu.memory_space<smem>>
      %302 = vector.broadcast %301 : f32 to vector<16x16xf32>
      %303 = arith.mulf %302, %297 : vector<16x16xf32>
      %304 = arith.addf %300, %303 : vector<16x16xf32>
      %305 = arith.addf %257, %304 : vector<16x16xf32>
      %c0_339 = arith.constant 0 : index
      %c2_340 = arith.constant 2 : index
      %c1_341 = arith.constant 1 : index
      %c0_342 = arith.constant 0 : index
      %306 = vector.load %arg7[%c0_339, %c2_340, %c1_341, %c0_342] : memref<2x7x22x22xf32, #tpu.memory_space<vmem>>, vector<1x1x16x16xf32>
      %307 = vector.shape_cast %306 : vector<1x1x16x16xf32> to vector<16x16xf32>
      %c1_343 = arith.constant 1 : index
      %c2_344 = arith.constant 2 : index
      %c1_345 = arith.constant 1 : index
      %c0_346 = arith.constant 0 : index
      %308 = vector.load %arg7[%c1_343, %c2_344, %c1_345, %c0_346] : memref<2x7x22x22xf32, #tpu.memory_space<vmem>>, vector<1x1x16x16xf32>
      %309 = vector.shape_cast %308 : vector<1x1x16x16xf32> to vector<16x16xf32>
      %c9 = arith.constant 9 : index
      %310 = memref.load %arg2[%c9] : memref<99xf32, #tpu.memory_space<smem>>
      %311 = vector.broadcast %310 : f32 to vector<16x16xf32>
      %312 = arith.mulf %311, %307 : vector<16x16xf32>
      %c58 = arith.constant 58 : index
      %313 = memref.load %arg2[%c58] : memref<99xf32, #tpu.memory_space<smem>>
      %314 = vector.broadcast %313 : f32 to vector<16x16xf32>
      %315 = arith.mulf %314, %309 : vector<16x16xf32>
      %316 = arith.addf %312, %315 : vector<16x16xf32>
      %317 = arith.addf %269, %316 : vector<16x16xf32>
      %c0_347 = arith.constant 0 : index
      %c3_348 = arith.constant 3 : index
      %c1_349 = arith.constant 1 : index
      %c0_350 = arith.constant 0 : index
      %318 = vector.load %arg7[%c0_347, %c3_348, %c1_349, %c0_350] : memref<2x7x22x22xf32, #tpu.memory_space<vmem>>, vector<1x1x16x16xf32>
      %319 = vector.shape_cast %318 : vector<1x1x16x16xf32> to vector<16x16xf32>
      %c1_351 = arith.constant 1 : index
      %c3_352 = arith.constant 3 : index
      %c1_353 = arith.constant 1 : index
      %c0_354 = arith.constant 0 : index
      %320 = vector.load %arg7[%c1_351, %c3_352, %c1_353, %c0_354] : memref<2x7x22x22xf32, #tpu.memory_space<vmem>>, vector<1x1x16x16xf32>
      %321 = vector.shape_cast %320 : vector<1x1x16x16xf32> to vector<16x16xf32>
      %c10 = arith.constant 10 : index
      %322 = memref.load %arg2[%c10] : memref<99xf32, #tpu.memory_space<smem>>
      %323 = vector.broadcast %322 : f32 to vector<16x16xf32>
      %324 = arith.mulf %323, %319 : vector<16x16xf32>
      %c59 = arith.constant 59 : index
      %325 = memref.load %arg2[%c59] : memref<99xf32, #tpu.memory_space<smem>>
      %326 = vector.broadcast %325 : f32 to vector<16x16xf32>
      %327 = arith.mulf %326, %321 : vector<16x16xf32>
      %328 = arith.addf %324, %327 : vector<16x16xf32>
      %329 = arith.addf %281, %328 : vector<16x16xf32>
      %c0_355 = arith.constant 0 : index
      %c4_356 = arith.constant 4 : index
      %c1_357 = arith.constant 1 : index
      %c0_358 = arith.constant 0 : index
      %330 = vector.load %arg7[%c0_355, %c4_356, %c1_357, %c0_358] : memref<2x7x22x22xf32, #tpu.memory_space<vmem>>, vector<1x1x16x16xf32>
      %331 = vector.shape_cast %330 : vector<1x1x16x16xf32> to vector<16x16xf32>
      %c1_359 = arith.constant 1 : index
      %c4_360 = arith.constant 4 : index
      %c1_361 = arith.constant 1 : index
      %c0_362 = arith.constant 0 : index
      %332 = vector.load %arg7[%c1_359, %c4_360, %c1_361, %c0_362] : memref<2x7x22x22xf32, #tpu.memory_space<vmem>>, vector<1x1x16x16xf32>
      %333 = vector.shape_cast %332 : vector<1x1x16x16xf32> to vector<16x16xf32>
      %c11 = arith.constant 11 : index
      %334 = memref.load %arg2[%c11] : memref<99xf32, #tpu.memory_space<smem>>
      %335 = vector.broadcast %334 : f32 to vector<16x16xf32>
      %336 = arith.mulf %335, %331 : vector<16x16xf32>
      %c60 = arith.constant 60 : index
      %337 = memref.load %arg2[%c60] : memref<99xf32, #tpu.memory_space<smem>>
      %338 = vector.broadcast %337 : f32 to vector<16x16xf32>
      %339 = arith.mulf %338, %333 : vector<16x16xf32>
      %340 = arith.addf %336, %339 : vector<16x16xf32>
      %341 = arith.addf %293, %340 : vector<16x16xf32>
      %c0_363 = arith.constant 0 : index
      %c5_364 = arith.constant 5 : index
      %c1_365 = arith.constant 1 : index
      %c0_366 = arith.constant 0 : index
      %342 = vector.load %arg7[%c0_363, %c5_364, %c1_365, %c0_366] : memref<2x7x22x22xf32, #tpu.memory_space<vmem>>, vector<1x1x16x16xf32>
      %343 = vector.shape_cast %342 : vector<1x1x16x16xf32> to vector<16x16xf32>
      %c1_367 = arith.constant 1 : index
      %c5_368 = arith.constant 5 : index
      %c1_369 = arith.constant 1 : index
      %c0_370 = arith.constant 0 : index
      %344 = vector.load %arg7[%c1_367, %c5_368, %c1_369, %c0_370] : memref<2x7x22x22xf32, #tpu.memory_space<vmem>>, vector<1x1x16x16xf32>
      %345 = vector.shape_cast %344 : vector<1x1x16x16xf32> to vector<16x16xf32>
      %c12 = arith.constant 12 : index
      %346 = memref.load %arg2[%c12] : memref<99xf32, #tpu.memory_space<smem>>
      %347 = vector.broadcast %346 : f32 to vector<16x16xf32>
      %348 = arith.mulf %347, %343 : vector<16x16xf32>
      %c61 = arith.constant 61 : index
      %349 = memref.load %arg2[%c61] : memref<99xf32, #tpu.memory_space<smem>>
      %350 = vector.broadcast %349 : f32 to vector<16x16xf32>
      %351 = arith.mulf %350, %345 : vector<16x16xf32>
      %352 = arith.addf %348, %351 : vector<16x16xf32>
      %353 = arith.addf %305, %352 : vector<16x16xf32>
      %c0_371 = arith.constant 0 : index
      %c6_372 = arith.constant 6 : index
      %c1_373 = arith.constant 1 : index
      %c0_374 = arith.constant 0 : index
      %354 = vector.load %arg7[%c0_371, %c6_372, %c1_373, %c0_374] : memref<2x7x22x22xf32, #tpu.memory_space<vmem>>, vector<1x1x16x16xf32>
      %355 = vector.shape_cast %354 : vector<1x1x16x16xf32> to vector<16x16xf32>
      %c1_375 = arith.constant 1 : index
      %c6_376 = arith.constant 6 : index
      %c1_377 = arith.constant 1 : index
      %c0_378 = arith.constant 0 : index
      %356 = vector.load %arg7[%c1_375, %c6_376, %c1_377, %c0_378] : memref<2x7x22x22xf32, #tpu.memory_space<vmem>>, vector<1x1x16x16xf32>
      %357 = vector.shape_cast %356 : vector<1x1x16x16xf32> to vector<16x16xf32>
      %c13 = arith.constant 13 : index
      %358 = memref.load %arg2[%c13] : memref<99xf32, #tpu.memory_space<smem>>
      %359 = vector.broadcast %358 : f32 to vector<16x16xf32>
      %360 = arith.mulf %359, %355 : vector<16x16xf32>
      %c62 = arith.constant 62 : index
      %361 = memref.load %arg2[%c62] : memref<99xf32, #tpu.memory_space<smem>>
      %362 = vector.broadcast %361 : f32 to vector<16x16xf32>
      %363 = arith.mulf %362, %357 : vector<16x16xf32>
      %364 = arith.addf %360, %363 : vector<16x16xf32>
      %365 = arith.addf %317, %364 : vector<16x16xf32>
      %c0_379 = arith.constant 0 : index
      %c0_380 = arith.constant 0 : index
      %c2_381 = arith.constant 2 : index
      %c0_382 = arith.constant 0 : index
      %366 = vector.load %arg7[%c0_379, %c0_380, %c2_381, %c0_382] : memref<2x7x22x22xf32, #tpu.memory_space<vmem>>, vector<1x1x16x16xf32>
      %367 = vector.shape_cast %366 : vector<1x1x16x16xf32> to vector<16x16xf32>
      %c1_383 = arith.constant 1 : index
      %c0_384 = arith.constant 0 : index
      %c2_385 = arith.constant 2 : index
      %c0_386 = arith.constant 0 : index
      %368 = vector.load %arg7[%c1_383, %c0_384, %c2_385, %c0_386] : memref<2x7x22x22xf32, #tpu.memory_space<vmem>>, vector<1x1x16x16xf32>
      %369 = vector.shape_cast %368 : vector<1x1x16x16xf32> to vector<16x16xf32>
      %c14 = arith.constant 14 : index
      %370 = memref.load %arg2[%c14] : memref<99xf32, #tpu.memory_space<smem>>
      %371 = vector.broadcast %370 : f32 to vector<16x16xf32>
      %372 = arith.mulf %371, %367 : vector<16x16xf32>
      %c63 = arith.constant 63 : index
      %373 = memref.load %arg2[%c63] : memref<99xf32, #tpu.memory_space<smem>>
      %374 = vector.broadcast %373 : f32 to vector<16x16xf32>
      %375 = arith.mulf %374, %369 : vector<16x16xf32>
      %376 = arith.addf %372, %375 : vector<16x16xf32>
      %377 = arith.addf %329, %376 : vector<16x16xf32>
      %c0_387 = arith.constant 0 : index
      %c1_388 = arith.constant 1 : index
      %c2_389 = arith.constant 2 : index
      %c0_390 = arith.constant 0 : index
      %378 = vector.load %arg7[%c0_387, %c1_388, %c2_389, %c0_390] : memref<2x7x22x22xf32, #tpu.memory_space<vmem>>, vector<1x1x16x16xf32>
      %379 = vector.shape_cast %378 : vector<1x1x16x16xf32> to vector<16x16xf32>
      %c1_391 = arith.constant 1 : index
      %c1_392 = arith.constant 1 : index
      %c2_393 = arith.constant 2 : index
      %c0_394 = arith.constant 0 : index
      %380 = vector.load %arg7[%c1_391, %c1_392, %c2_393, %c0_394] : memref<2x7x22x22xf32, #tpu.memory_space<vmem>>, vector<1x1x16x16xf32>
      %381 = vector.shape_cast %380 : vector<1x1x16x16xf32> to vector<16x16xf32>
      %c15_395 = arith.constant 15 : index
      %382 = memref.load %arg2[%c15_395] : memref<99xf32, #tpu.memory_space<smem>>
      %383 = vector.broadcast %382 : f32 to vector<16x16xf32>
      %384 = arith.mulf %383, %379 : vector<16x16xf32>
      %c64 = arith.constant 64 : index
      %385 = memref.load %arg2[%c64] : memref<99xf32, #tpu.memory_space<smem>>
      %386 = vector.broadcast %385 : f32 to vector<16x16xf32>
      %387 = arith.mulf %386, %381 : vector<16x16xf32>
      %388 = arith.addf %384, %387 : vector<16x16xf32>
      %389 = arith.addf %341, %388 : vector<16x16xf32>
      %c0_396 = arith.constant 0 : index
      %c2_397 = arith.constant 2 : index
      %c2_398 = arith.constant 2 : index
      %c0_399 = arith.constant 0 : index
      %390 = vector.load %arg7[%c0_396, %c2_397, %c2_398, %c0_399] : memref<2x7x22x22xf32, #tpu.memory_space<vmem>>, vector<1x1x16x16xf32>
      %391 = vector.shape_cast %390 : vector<1x1x16x16xf32> to vector<16x16xf32>
      %c1_400 = arith.constant 1 : index
      %c2_401 = arith.constant 2 : index
      %c2_402 = arith.constant 2 : index
      %c0_403 = arith.constant 0 : index
      %392 = vector.load %arg7[%c1_400, %c2_401, %c2_402, %c0_403] : memref<2x7x22x22xf32, #tpu.memory_space<vmem>>, vector<1x1x16x16xf32>
      %393 = vector.shape_cast %392 : vector<1x1x16x16xf32> to vector<16x16xf32>
      %c16_404 = arith.constant 16 : index
      %394 = memref.load %arg2[%c16_404] : memref<99xf32, #tpu.memory_space<smem>>
      %395 = vector.broadcast %394 : f32 to vector<16x16xf32>
      %396 = arith.mulf %395, %391 : vector<16x16xf32>
      %c65 = arith.constant 65 : index
      %397 = memref.load %arg2[%c65] : memref<99xf32, #tpu.memory_space<smem>>
      %398 = vector.broadcast %397 : f32 to vector<16x16xf32>
      %399 = arith.mulf %398, %393 : vector<16x16xf32>
      %400 = arith.addf %396, %399 : vector<16x16xf32>
      %401 = arith.addf %353, %400 : vector<16x16xf32>
      %c0_405 = arith.constant 0 : index
      %c3_406 = arith.constant 3 : index
      %c2_407 = arith.constant 2 : index
      %c0_408 = arith.constant 0 : index
      %402 = vector.load %arg7[%c0_405, %c3_406, %c2_407, %c0_408] : memref<2x7x22x22xf32, #tpu.memory_space<vmem>>, vector<1x1x16x16xf32>
      %403 = vector.shape_cast %402 : vector<1x1x16x16xf32> to vector<16x16xf32>
      %c1_409 = arith.constant 1 : index
      %c3_410 = arith.constant 3 : index
      %c2_411 = arith.constant 2 : index
      %c0_412 = arith.constant 0 : index
      %404 = vector.load %arg7[%c1_409, %c3_410, %c2_411, %c0_412] : memref<2x7x22x22xf32, #tpu.memory_space<vmem>>, vector<1x1x16x16xf32>
      %405 = vector.shape_cast %404 : vector<1x1x16x16xf32> to vector<16x16xf32>
      %c17_413 = arith.constant 17 : index
      %406 = memref.load %arg2[%c17_413] : memref<99xf32, #tpu.memory_space<smem>>
      %407 = vector.broadcast %406 : f32 to vector<16x16xf32>
      %408 = arith.mulf %407, %403 : vector<16x16xf32>
      %c66 = arith.constant 66 : index
      %409 = memref.load %arg2[%c66] : memref<99xf32, #tpu.memory_space<smem>>
      %410 = vector.broadcast %409 : f32 to vector<16x16xf32>
      %411 = arith.mulf %410, %405 : vector<16x16xf32>
      %412 = arith.addf %408, %411 : vector<16x16xf32>
      %413 = arith.addf %365, %412 : vector<16x16xf32>
      %c0_414 = arith.constant 0 : index
      %c4_415 = arith.constant 4 : index
      %c2_416 = arith.constant 2 : index
      %c0_417 = arith.constant 0 : index
      %414 = vector.load %arg7[%c0_414, %c4_415, %c2_416, %c0_417] : memref<2x7x22x22xf32, #tpu.memory_space<vmem>>, vector<1x1x16x16xf32>
      %415 = vector.shape_cast %414 : vector<1x1x16x16xf32> to vector<16x16xf32>
      %c1_418 = arith.constant 1 : index
      %c4_419 = arith.constant 4 : index
      %c2_420 = arith.constant 2 : index
      %c0_421 = arith.constant 0 : index
      %416 = vector.load %arg7[%c1_418, %c4_419, %c2_420, %c0_421] : memref<2x7x22x22xf32, #tpu.memory_space<vmem>>, vector<1x1x16x16xf32>
      %417 = vector.shape_cast %416 : vector<1x1x16x16xf32> to vector<16x16xf32>
      %c18 = arith.constant 18 : index
      %418 = memref.load %arg2[%c18] : memref<99xf32, #tpu.memory_space<smem>>
      %419 = vector.broadcast %418 : f32 to vector<16x16xf32>
      %420 = arith.mulf %419, %415 : vector<16x16xf32>
      %c67 = arith.constant 67 : index
      %421 = memref.load %arg2[%c67] : memref<99xf32, #tpu.memory_space<smem>>
      %422 = vector.broadcast %421 : f32 to vector<16x16xf32>
      %423 = arith.mulf %422, %417 : vector<16x16xf32>
      %424 = arith.addf %420, %423 : vector<16x16xf32>
      %425 = arith.addf %377, %424 : vector<16x16xf32>
      %c0_422 = arith.constant 0 : index
      %c5_423 = arith.constant 5 : index
      %c2_424 = arith.constant 2 : index
      %c0_425 = arith.constant 0 : index
      %426 = vector.load %arg7[%c0_422, %c5_423, %c2_424, %c0_425] : memref<2x7x22x22xf32, #tpu.memory_space<vmem>>, vector<1x1x16x16xf32>
      %427 = vector.shape_cast %426 : vector<1x1x16x16xf32> to vector<16x16xf32>
      %c1_426 = arith.constant 1 : index
      %c5_427 = arith.constant 5 : index
      %c2_428 = arith.constant 2 : index
      %c0_429 = arith.constant 0 : index
      %428 = vector.load %arg7[%c1_426, %c5_427, %c2_428, %c0_429] : memref<2x7x22x22xf32, #tpu.memory_space<vmem>>, vector<1x1x16x16xf32>
      %429 = vector.shape_cast %428 : vector<1x1x16x16xf32> to vector<16x16xf32>
      %c19_430 = arith.constant 19 : index
      %430 = memref.load %arg2[%c19_430] : memref<99xf32, #tpu.memory_space<smem>>
      %431 = vector.broadcast %430 : f32 to vector<16x16xf32>
      %432 = arith.mulf %431, %427 : vector<16x16xf32>
      %c68 = arith.constant 68 : index
      %433 = memref.load %arg2[%c68] : memref<99xf32, #tpu.memory_space<smem>>
      %434 = vector.broadcast %433 : f32 to vector<16x16xf32>
      %435 = arith.mulf %434, %429 : vector<16x16xf32>
      %436 = arith.addf %432, %435 : vector<16x16xf32>
      %437 = arith.addf %389, %436 : vector<16x16xf32>
      %c0_431 = arith.constant 0 : index
      %c6_432 = arith.constant 6 : index
      %c2_433 = arith.constant 2 : index
      %c0_434 = arith.constant 0 : index
      %438 = vector.load %arg7[%c0_431, %c6_432, %c2_433, %c0_434] : memref<2x7x22x22xf32, #tpu.memory_space<vmem>>, vector<1x1x16x16xf32>
      %439 = vector.shape_cast %438 : vector<1x1x16x16xf32> to vector<16x16xf32>
      %c1_435 = arith.constant 1 : index
      %c6_436 = arith.constant 6 : index
      %c2_437 = arith.constant 2 : index
      %c0_438 = arith.constant 0 : index
      %440 = vector.load %arg7[%c1_435, %c6_436, %c2_437, %c0_438] : memref<2x7x22x22xf32, #tpu.memory_space<vmem>>, vector<1x1x16x16xf32>
      %441 = vector.shape_cast %440 : vector<1x1x16x16xf32> to vector<16x16xf32>
      %c20_439 = arith.constant 20 : index
      %442 = memref.load %arg2[%c20_439] : memref<99xf32, #tpu.memory_space<smem>>
      %443 = vector.broadcast %442 : f32 to vector<16x16xf32>
      %444 = arith.mulf %443, %439 : vector<16x16xf32>
      %c69 = arith.constant 69 : index
      %445 = memref.load %arg2[%c69] : memref<99xf32, #tpu.memory_space<smem>>
      %446 = vector.broadcast %445 : f32 to vector<16x16xf32>
      %447 = arith.mulf %446, %441 : vector<16x16xf32>
      %448 = arith.addf %444, %447 : vector<16x16xf32>
      %449 = arith.addf %401, %448 : vector<16x16xf32>
      %c0_440 = arith.constant 0 : index
      %c0_441 = arith.constant 0 : index
      %c3_442 = arith.constant 3 : index
      %c0_443 = arith.constant 0 : index
      %450 = vector.load %arg7[%c0_440, %c0_441, %c3_442, %c0_443] : memref<2x7x22x22xf32, #tpu.memory_space<vmem>>, vector<1x1x16x16xf32>
      %451 = vector.shape_cast %450 : vector<1x1x16x16xf32> to vector<16x16xf32>
      %c1_444 = arith.constant 1 : index
      %c0_445 = arith.constant 0 : index
      %c3_446 = arith.constant 3 : index
      %c0_447 = arith.constant 0 : index
      %452 = vector.load %arg7[%c1_444, %c0_445, %c3_446, %c0_447] : memref<2x7x22x22xf32, #tpu.memory_space<vmem>>, vector<1x1x16x16xf32>
      %453 = vector.shape_cast %452 : vector<1x1x16x16xf32> to vector<16x16xf32>
      %c21_448 = arith.constant 21 : index
      %454 = memref.load %arg2[%c21_448] : memref<99xf32, #tpu.memory_space<smem>>
      %455 = vector.broadcast %454 : f32 to vector<16x16xf32>
      %456 = arith.mulf %455, %451 : vector<16x16xf32>
      %c70 = arith.constant 70 : index
      %457 = memref.load %arg2[%c70] : memref<99xf32, #tpu.memory_space<smem>>
      %458 = vector.broadcast %457 : f32 to vector<16x16xf32>
      %459 = arith.mulf %458, %453 : vector<16x16xf32>
      %460 = arith.addf %456, %459 : vector<16x16xf32>
      %461 = arith.addf %413, %460 : vector<16x16xf32>
      %c0_449 = arith.constant 0 : index
      %c1_450 = arith.constant 1 : index
      %c3_451 = arith.constant 3 : index
      %c0_452 = arith.constant 0 : index
      %462 = vector.load %arg7[%c0_449, %c1_450, %c3_451, %c0_452] : memref<2x7x22x22xf32, #tpu.memory_space<vmem>>, vector<1x1x16x16xf32>
      %463 = vector.shape_cast %462 : vector<1x1x16x16xf32> to vector<16x16xf32>
      %c1_453 = arith.constant 1 : index
      %c1_454 = arith.constant 1 : index
      %c3_455 = arith.constant 3 : index
      %c0_456 = arith.constant 0 : index
      %464 = vector.load %arg7[%c1_453, %c1_454, %c3_455, %c0_456] : memref<2x7x22x22xf32, #tpu.memory_space<vmem>>, vector<1x1x16x16xf32>
      %465 = vector.shape_cast %464 : vector<1x1x16x16xf32> to vector<16x16xf32>
      %c22 = arith.constant 22 : index
      %466 = memref.load %arg2[%c22] : memref<99xf32, #tpu.memory_space<smem>>
      %467 = vector.broadcast %466 : f32 to vector<16x16xf32>
      %468 = arith.mulf %467, %463 : vector<16x16xf32>
      %c71 = arith.constant 71 : index
      %469 = memref.load %arg2[%c71] : memref<99xf32, #tpu.memory_space<smem>>
      %470 = vector.broadcast %469 : f32 to vector<16x16xf32>
      %471 = arith.mulf %470, %465 : vector<16x16xf32>
      %472 = arith.addf %468, %471 : vector<16x16xf32>
      %473 = arith.addf %425, %472 : vector<16x16xf32>
      %c0_457 = arith.constant 0 : index
      %c2_458 = arith.constant 2 : index
      %c3_459 = arith.constant 3 : index
      %c0_460 = arith.constant 0 : index
      %474 = vector.load %arg7[%c0_457, %c2_458, %c3_459, %c0_460] : memref<2x7x22x22xf32, #tpu.memory_space<vmem>>, vector<1x1x16x16xf32>
      %475 = vector.shape_cast %474 : vector<1x1x16x16xf32> to vector<16x16xf32>
      %c1_461 = arith.constant 1 : index
      %c2_462 = arith.constant 2 : index
      %c3_463 = arith.constant 3 : index
      %c0_464 = arith.constant 0 : index
      %476 = vector.load %arg7[%c1_461, %c2_462, %c3_463, %c0_464] : memref<2x7x22x22xf32, #tpu.memory_space<vmem>>, vector<1x1x16x16xf32>
      %477 = vector.shape_cast %476 : vector<1x1x16x16xf32> to vector<16x16xf32>
      %c23 = arith.constant 23 : index
      %478 = memref.load %arg2[%c23] : memref<99xf32, #tpu.memory_space<smem>>
      %479 = vector.broadcast %478 : f32 to vector<16x16xf32>
      %480 = arith.mulf %479, %475 : vector<16x16xf32>
      %c72 = arith.constant 72 : index
      %481 = memref.load %arg2[%c72] : memref<99xf32, #tpu.memory_space<smem>>
      %482 = vector.broadcast %481 : f32 to vector<16x16xf32>
      %483 = arith.mulf %482, %477 : vector<16x16xf32>
      %484 = arith.addf %480, %483 : vector<16x16xf32>
      %485 = arith.addf %437, %484 : vector<16x16xf32>
      %c0_465 = arith.constant 0 : index
      %c3_466 = arith.constant 3 : index
      %c3_467 = arith.constant 3 : index
      %c0_468 = arith.constant 0 : index
      %486 = vector.load %arg7[%c0_465, %c3_466, %c3_467, %c0_468] : memref<2x7x22x22xf32, #tpu.memory_space<vmem>>, vector<1x1x16x16xf32>
      %487 = vector.shape_cast %486 : vector<1x1x16x16xf32> to vector<16x16xf32>
      %c1_469 = arith.constant 1 : index
      %c3_470 = arith.constant 3 : index
      %c3_471 = arith.constant 3 : index
      %c0_472 = arith.constant 0 : index
      %488 = vector.load %arg7[%c1_469, %c3_470, %c3_471, %c0_472] : memref<2x7x22x22xf32, #tpu.memory_space<vmem>>, vector<1x1x16x16xf32>
      %489 = vector.shape_cast %488 : vector<1x1x16x16xf32> to vector<16x16xf32>
      %c24 = arith.constant 24 : index
      %490 = memref.load %arg2[%c24] : memref<99xf32, #tpu.memory_space<smem>>
      %491 = vector.broadcast %490 : f32 to vector<16x16xf32>
      %492 = arith.mulf %491, %487 : vector<16x16xf32>
      %c73 = arith.constant 73 : index
      %493 = memref.load %arg2[%c73] : memref<99xf32, #tpu.memory_space<smem>>
      %494 = vector.broadcast %493 : f32 to vector<16x16xf32>
      %495 = arith.mulf %494, %489 : vector<16x16xf32>
      %496 = arith.addf %492, %495 : vector<16x16xf32>
      %497 = arith.addf %449, %496 : vector<16x16xf32>
      %c0_473 = arith.constant 0 : index
      %c4_474 = arith.constant 4 : index
      %c3_475 = arith.constant 3 : index
      %c0_476 = arith.constant 0 : index
      %498 = vector.load %arg7[%c0_473, %c4_474, %c3_475, %c0_476] : memref<2x7x22x22xf32, #tpu.memory_space<vmem>>, vector<1x1x16x16xf32>
      %499 = vector.shape_cast %498 : vector<1x1x16x16xf32> to vector<16x16xf32>
      %c1_477 = arith.constant 1 : index
      %c4_478 = arith.constant 4 : index
      %c3_479 = arith.constant 3 : index
      %c0_480 = arith.constant 0 : index
      %500 = vector.load %arg7[%c1_477, %c4_478, %c3_479, %c0_480] : memref<2x7x22x22xf32, #tpu.memory_space<vmem>>, vector<1x1x16x16xf32>
      %501 = vector.shape_cast %500 : vector<1x1x16x16xf32> to vector<16x16xf32>
      %c25 = arith.constant 25 : index
      %502 = memref.load %arg2[%c25] : memref<99xf32, #tpu.memory_space<smem>>
      %503 = vector.broadcast %502 : f32 to vector<16x16xf32>
      %504 = arith.mulf %503, %499 : vector<16x16xf32>
      %c74 = arith.constant 74 : index
      %505 = memref.load %arg2[%c74] : memref<99xf32, #tpu.memory_space<smem>>
      %506 = vector.broadcast %505 : f32 to vector<16x16xf32>
      %507 = arith.mulf %506, %501 : vector<16x16xf32>
      %508 = arith.addf %504, %507 : vector<16x16xf32>
      %509 = arith.addf %461, %508 : vector<16x16xf32>
      %c0_481 = arith.constant 0 : index
      %c5_482 = arith.constant 5 : index
      %c3_483 = arith.constant 3 : index
      %c0_484 = arith.constant 0 : index
      %510 = vector.load %arg7[%c0_481, %c5_482, %c3_483, %c0_484] : memref<2x7x22x22xf32, #tpu.memory_space<vmem>>, vector<1x1x16x16xf32>
      %511 = vector.shape_cast %510 : vector<1x1x16x16xf32> to vector<16x16xf32>
      %c1_485 = arith.constant 1 : index
      %c5_486 = arith.constant 5 : index
      %c3_487 = arith.constant 3 : index
      %c0_488 = arith.constant 0 : index
      %512 = vector.load %arg7[%c1_485, %c5_486, %c3_487, %c0_488] : memref<2x7x22x22xf32, #tpu.memory_space<vmem>>, vector<1x1x16x16xf32>
      %513 = vector.shape_cast %512 : vector<1x1x16x16xf32> to vector<16x16xf32>
      %c26 = arith.constant 26 : index
      %514 = memref.load %arg2[%c26] : memref<99xf32, #tpu.memory_space<smem>>
      %515 = vector.broadcast %514 : f32 to vector<16x16xf32>
      %516 = arith.mulf %515, %511 : vector<16x16xf32>
      %c75 = arith.constant 75 : index
      %517 = memref.load %arg2[%c75] : memref<99xf32, #tpu.memory_space<smem>>
      %518 = vector.broadcast %517 : f32 to vector<16x16xf32>
      %519 = arith.mulf %518, %513 : vector<16x16xf32>
      %520 = arith.addf %516, %519 : vector<16x16xf32>
      %521 = arith.addf %473, %520 : vector<16x16xf32>
      %c0_489 = arith.constant 0 : index
      %c6_490 = arith.constant 6 : index
      %c3_491 = arith.constant 3 : index
      %c0_492 = arith.constant 0 : index
      %522 = vector.load %arg7[%c0_489, %c6_490, %c3_491, %c0_492] : memref<2x7x22x22xf32, #tpu.memory_space<vmem>>, vector<1x1x16x16xf32>
      %523 = vector.shape_cast %522 : vector<1x1x16x16xf32> to vector<16x16xf32>
      %c1_493 = arith.constant 1 : index
      %c6_494 = arith.constant 6 : index
      %c3_495 = arith.constant 3 : index
      %c0_496 = arith.constant 0 : index
      %524 = vector.load %arg7[%c1_493, %c6_494, %c3_495, %c0_496] : memref<2x7x22x22xf32, #tpu.memory_space<vmem>>, vector<1x1x16x16xf32>
      %525 = vector.shape_cast %524 : vector<1x1x16x16xf32> to vector<16x16xf32>
      %c27 = arith.constant 27 : index
      %526 = memref.load %arg2[%c27] : memref<99xf32, #tpu.memory_space<smem>>
      %527 = vector.broadcast %526 : f32 to vector<16x16xf32>
      %528 = arith.mulf %527, %523 : vector<16x16xf32>
      %c76 = arith.constant 76 : index
      %529 = memref.load %arg2[%c76] : memref<99xf32, #tpu.memory_space<smem>>
      %530 = vector.broadcast %529 : f32 to vector<16x16xf32>
      %531 = arith.mulf %530, %525 : vector<16x16xf32>
      %532 = arith.addf %528, %531 : vector<16x16xf32>
      %533 = arith.addf %485, %532 : vector<16x16xf32>
      %c0_497 = arith.constant 0 : index
      %c0_498 = arith.constant 0 : index
      %c4_499 = arith.constant 4 : index
      %c0_500 = arith.constant 0 : index
      %534 = vector.load %arg7[%c0_497, %c0_498, %c4_499, %c0_500] : memref<2x7x22x22xf32, #tpu.memory_space<vmem>>, vector<1x1x16x16xf32>
      %535 = vector.shape_cast %534 : vector<1x1x16x16xf32> to vector<16x16xf32>
      %c1_501 = arith.constant 1 : index
      %c0_502 = arith.constant 0 : index
      %c4_503 = arith.constant 4 : index
      %c0_504 = arith.constant 0 : index
      %536 = vector.load %arg7[%c1_501, %c0_502, %c4_503, %c0_504] : memref<2x7x22x22xf32, #tpu.memory_space<vmem>>, vector<1x1x16x16xf32>
      %537 = vector.shape_cast %536 : vector<1x1x16x16xf32> to vector<16x16xf32>
      %c28 = arith.constant 28 : index
      %538 = memref.load %arg2[%c28] : memref<99xf32, #tpu.memory_space<smem>>
      %539 = vector.broadcast %538 : f32 to vector<16x16xf32>
      %540 = arith.mulf %539, %535 : vector<16x16xf32>
      %c77 = arith.constant 77 : index
      %541 = memref.load %arg2[%c77] : memref<99xf32, #tpu.memory_space<smem>>
      %542 = vector.broadcast %541 : f32 to vector<16x16xf32>
      %543 = arith.mulf %542, %537 : vector<16x16xf32>
      %544 = arith.addf %540, %543 : vector<16x16xf32>
      %545 = arith.addf %497, %544 : vector<16x16xf32>
      %c0_505 = arith.constant 0 : index
      %c1_506 = arith.constant 1 : index
      %c4_507 = arith.constant 4 : index
      %c0_508 = arith.constant 0 : index
      %546 = vector.load %arg7[%c0_505, %c1_506, %c4_507, %c0_508] : memref<2x7x22x22xf32, #tpu.memory_space<vmem>>, vector<1x1x16x16xf32>
      %547 = vector.shape_cast %546 : vector<1x1x16x16xf32> to vector<16x16xf32>
      %c1_509 = arith.constant 1 : index
      %c1_510 = arith.constant 1 : index
      %c4_511 = arith.constant 4 : index
      %c0_512 = arith.constant 0 : index
      %548 = vector.load %arg7[%c1_509, %c1_510, %c4_511, %c0_512] : memref<2x7x22x22xf32, #tpu.memory_space<vmem>>, vector<1x1x16x16xf32>
      %549 = vector.shape_cast %548 : vector<1x1x16x16xf32> to vector<16x16xf32>
      %c29 = arith.constant 29 : index
      %550 = memref.load %arg2[%c29] : memref<99xf32, #tpu.memory_space<smem>>
      %551 = vector.broadcast %550 : f32 to vector<16x16xf32>
      %552 = arith.mulf %551, %547 : vector<16x16xf32>
      %c78 = arith.constant 78 : index
      %553 = memref.load %arg2[%c78] : memref<99xf32, #tpu.memory_space<smem>>
      %554 = vector.broadcast %553 : f32 to vector<16x16xf32>
      %555 = arith.mulf %554, %549 : vector<16x16xf32>
      %556 = arith.addf %552, %555 : vector<16x16xf32>
      %557 = arith.addf %509, %556 : vector<16x16xf32>
      %c0_513 = arith.constant 0 : index
      %c2_514 = arith.constant 2 : index
      %c4_515 = arith.constant 4 : index
      %c0_516 = arith.constant 0 : index
      %558 = vector.load %arg7[%c0_513, %c2_514, %c4_515, %c0_516] : memref<2x7x22x22xf32, #tpu.memory_space<vmem>>, vector<1x1x16x16xf32>
      %559 = vector.shape_cast %558 : vector<1x1x16x16xf32> to vector<16x16xf32>
      %c1_517 = arith.constant 1 : index
      %c2_518 = arith.constant 2 : index
      %c4_519 = arith.constant 4 : index
      %c0_520 = arith.constant 0 : index
      %560 = vector.load %arg7[%c1_517, %c2_518, %c4_519, %c0_520] : memref<2x7x22x22xf32, #tpu.memory_space<vmem>>, vector<1x1x16x16xf32>
      %561 = vector.shape_cast %560 : vector<1x1x16x16xf32> to vector<16x16xf32>
      %c30 = arith.constant 30 : index
      %562 = memref.load %arg2[%c30] : memref<99xf32, #tpu.memory_space<smem>>
      %563 = vector.broadcast %562 : f32 to vector<16x16xf32>
      %564 = arith.mulf %563, %559 : vector<16x16xf32>
      %c79 = arith.constant 79 : index
      %565 = memref.load %arg2[%c79] : memref<99xf32, #tpu.memory_space<smem>>
      %566 = vector.broadcast %565 : f32 to vector<16x16xf32>
      %567 = arith.mulf %566, %561 : vector<16x16xf32>
      %568 = arith.addf %564, %567 : vector<16x16xf32>
      %569 = arith.addf %521, %568 : vector<16x16xf32>
      %c0_521 = arith.constant 0 : index
      %c3_522 = arith.constant 3 : index
      %c4_523 = arith.constant 4 : index
      %c0_524 = arith.constant 0 : index
      %570 = vector.load %arg7[%c0_521, %c3_522, %c4_523, %c0_524] : memref<2x7x22x22xf32, #tpu.memory_space<vmem>>, vector<1x1x16x16xf32>
      %571 = vector.shape_cast %570 : vector<1x1x16x16xf32> to vector<16x16xf32>
      %c1_525 = arith.constant 1 : index
      %c3_526 = arith.constant 3 : index
      %c4_527 = arith.constant 4 : index
      %c0_528 = arith.constant 0 : index
      %572 = vector.load %arg7[%c1_525, %c3_526, %c4_527, %c0_528] : memref<2x7x22x22xf32, #tpu.memory_space<vmem>>, vector<1x1x16x16xf32>
      %573 = vector.shape_cast %572 : vector<1x1x16x16xf32> to vector<16x16xf32>
      %c31 = arith.constant 31 : index
      %574 = memref.load %arg2[%c31] : memref<99xf32, #tpu.memory_space<smem>>
      %575 = vector.broadcast %574 : f32 to vector<16x16xf32>
      %576 = arith.mulf %575, %571 : vector<16x16xf32>
      %c80 = arith.constant 80 : index
      %577 = memref.load %arg2[%c80] : memref<99xf32, #tpu.memory_space<smem>>
      %578 = vector.broadcast %577 : f32 to vector<16x16xf32>
      %579 = arith.mulf %578, %573 : vector<16x16xf32>
      %580 = arith.addf %576, %579 : vector<16x16xf32>
      %581 = arith.addf %533, %580 : vector<16x16xf32>
      %c0_529 = arith.constant 0 : index
      %c4_530 = arith.constant 4 : index
      %c4_531 = arith.constant 4 : index
      %c0_532 = arith.constant 0 : index
      %582 = vector.load %arg7[%c0_529, %c4_530, %c4_531, %c0_532] : memref<2x7x22x22xf32, #tpu.memory_space<vmem>>, vector<1x1x16x16xf32>
      %583 = vector.shape_cast %582 : vector<1x1x16x16xf32> to vector<16x16xf32>
      %c1_533 = arith.constant 1 : index
      %c4_534 = arith.constant 4 : index
      %c4_535 = arith.constant 4 : index
      %c0_536 = arith.constant 0 : index
      %584 = vector.load %arg7[%c1_533, %c4_534, %c4_535, %c0_536] : memref<2x7x22x22xf32, #tpu.memory_space<vmem>>, vector<1x1x16x16xf32>
      %585 = vector.shape_cast %584 : vector<1x1x16x16xf32> to vector<16x16xf32>
      %c32 = arith.constant 32 : index
      %586 = memref.load %arg2[%c32] : memref<99xf32, #tpu.memory_space<smem>>
      %587 = vector.broadcast %586 : f32 to vector<16x16xf32>
      %588 = arith.mulf %587, %583 : vector<16x16xf32>
      %c81 = arith.constant 81 : index
      %589 = memref.load %arg2[%c81] : memref<99xf32, #tpu.memory_space<smem>>
      %590 = vector.broadcast %589 : f32 to vector<16x16xf32>
      %591 = arith.mulf %590, %585 : vector<16x16xf32>
      %592 = arith.addf %588, %591 : vector<16x16xf32>
      %593 = arith.addf %545, %592 : vector<16x16xf32>
      %c0_537 = arith.constant 0 : index
      %c5_538 = arith.constant 5 : index
      %c4_539 = arith.constant 4 : index
      %c0_540 = arith.constant 0 : index
      %594 = vector.load %arg7[%c0_537, %c5_538, %c4_539, %c0_540] : memref<2x7x22x22xf32, #tpu.memory_space<vmem>>, vector<1x1x16x16xf32>
      %595 = vector.shape_cast %594 : vector<1x1x16x16xf32> to vector<16x16xf32>
      %c1_541 = arith.constant 1 : index
      %c5_542 = arith.constant 5 : index
      %c4_543 = arith.constant 4 : index
      %c0_544 = arith.constant 0 : index
      %596 = vector.load %arg7[%c1_541, %c5_542, %c4_543, %c0_544] : memref<2x7x22x22xf32, #tpu.memory_space<vmem>>, vector<1x1x16x16xf32>
      %597 = vector.shape_cast %596 : vector<1x1x16x16xf32> to vector<16x16xf32>
      %c33 = arith.constant 33 : index
      %598 = memref.load %arg2[%c33] : memref<99xf32, #tpu.memory_space<smem>>
      %599 = vector.broadcast %598 : f32 to vector<16x16xf32>
      %600 = arith.mulf %599, %595 : vector<16x16xf32>
      %c82 = arith.constant 82 : index
      %601 = memref.load %arg2[%c82] : memref<99xf32, #tpu.memory_space<smem>>
      %602 = vector.broadcast %601 : f32 to vector<16x16xf32>
      %603 = arith.mulf %602, %597 : vector<16x16xf32>
      %604 = arith.addf %600, %603 : vector<16x16xf32>
      %605 = arith.addf %557, %604 : vector<16x16xf32>
      %c0_545 = arith.constant 0 : index
      %c6_546 = arith.constant 6 : index
      %c4_547 = arith.constant 4 : index
      %c0_548 = arith.constant 0 : index
      %606 = vector.load %arg7[%c0_545, %c6_546, %c4_547, %c0_548] : memref<2x7x22x22xf32, #tpu.memory_space<vmem>>, vector<1x1x16x16xf32>
      %607 = vector.shape_cast %606 : vector<1x1x16x16xf32> to vector<16x16xf32>
      %c1_549 = arith.constant 1 : index
      %c6_550 = arith.constant 6 : index
      %c4_551 = arith.constant 4 : index
      %c0_552 = arith.constant 0 : index
      %608 = vector.load %arg7[%c1_549, %c6_550, %c4_551, %c0_552] : memref<2x7x22x22xf32, #tpu.memory_space<vmem>>, vector<1x1x16x16xf32>
      %609 = vector.shape_cast %608 : vector<1x1x16x16xf32> to vector<16x16xf32>
      %c34 = arith.constant 34 : index
      %610 = memref.load %arg2[%c34] : memref<99xf32, #tpu.memory_space<smem>>
      %611 = vector.broadcast %610 : f32 to vector<16x16xf32>
      %612 = arith.mulf %611, %607 : vector<16x16xf32>
      %c83 = arith.constant 83 : index
      %613 = memref.load %arg2[%c83] : memref<99xf32, #tpu.memory_space<smem>>
      %614 = vector.broadcast %613 : f32 to vector<16x16xf32>
      %615 = arith.mulf %614, %609 : vector<16x16xf32>
      %616 = arith.addf %612, %615 : vector<16x16xf32>
      %617 = arith.addf %569, %616 : vector<16x16xf32>
      %c0_553 = arith.constant 0 : index
      %c0_554 = arith.constant 0 : index
      %c5_555 = arith.constant 5 : index
      %c0_556 = arith.constant 0 : index
      %618 = vector.load %arg7[%c0_553, %c0_554, %c5_555, %c0_556] : memref<2x7x22x22xf32, #tpu.memory_space<vmem>>, vector<1x1x16x16xf32>
      %619 = vector.shape_cast %618 : vector<1x1x16x16xf32> to vector<16x16xf32>
      %c1_557 = arith.constant 1 : index
      %c0_558 = arith.constant 0 : index
      %c5_559 = arith.constant 5 : index
      %c0_560 = arith.constant 0 : index
      %620 = vector.load %arg7[%c1_557, %c0_558, %c5_559, %c0_560] : memref<2x7x22x22xf32, #tpu.memory_space<vmem>>, vector<1x1x16x16xf32>
      %621 = vector.shape_cast %620 : vector<1x1x16x16xf32> to vector<16x16xf32>
      %c35 = arith.constant 35 : index
      %622 = memref.load %arg2[%c35] : memref<99xf32, #tpu.memory_space<smem>>
      %623 = vector.broadcast %622 : f32 to vector<16x16xf32>
      %624 = arith.mulf %623, %619 : vector<16x16xf32>
      %c84 = arith.constant 84 : index
      %625 = memref.load %arg2[%c84] : memref<99xf32, #tpu.memory_space<smem>>
      %626 = vector.broadcast %625 : f32 to vector<16x16xf32>
      %627 = arith.mulf %626, %621 : vector<16x16xf32>
      %628 = arith.addf %624, %627 : vector<16x16xf32>
      %629 = arith.addf %581, %628 : vector<16x16xf32>
      %c0_561 = arith.constant 0 : index
      %c1_562 = arith.constant 1 : index
      %c5_563 = arith.constant 5 : index
      %c0_564 = arith.constant 0 : index
      %630 = vector.load %arg7[%c0_561, %c1_562, %c5_563, %c0_564] : memref<2x7x22x22xf32, #tpu.memory_space<vmem>>, vector<1x1x16x16xf32>
      %631 = vector.shape_cast %630 : vector<1x1x16x16xf32> to vector<16x16xf32>
      %c1_565 = arith.constant 1 : index
      %c1_566 = arith.constant 1 : index
      %c5_567 = arith.constant 5 : index
      %c0_568 = arith.constant 0 : index
      %632 = vector.load %arg7[%c1_565, %c1_566, %c5_567, %c0_568] : memref<2x7x22x22xf32, #tpu.memory_space<vmem>>, vector<1x1x16x16xf32>
      %633 = vector.shape_cast %632 : vector<1x1x16x16xf32> to vector<16x16xf32>
      %c36 = arith.constant 36 : index
      %634 = memref.load %arg2[%c36] : memref<99xf32, #tpu.memory_space<smem>>
      %635 = vector.broadcast %634 : f32 to vector<16x16xf32>
      %636 = arith.mulf %635, %631 : vector<16x16xf32>
      %c85 = arith.constant 85 : index
      %637 = memref.load %arg2[%c85] : memref<99xf32, #tpu.memory_space<smem>>
      %638 = vector.broadcast %637 : f32 to vector<16x16xf32>
      %639 = arith.mulf %638, %633 : vector<16x16xf32>
      %640 = arith.addf %636, %639 : vector<16x16xf32>
      %641 = arith.addf %593, %640 : vector<16x16xf32>
      %c0_569 = arith.constant 0 : index
      %c2_570 = arith.constant 2 : index
      %c5_571 = arith.constant 5 : index
      %c0_572 = arith.constant 0 : index
      %642 = vector.load %arg7[%c0_569, %c2_570, %c5_571, %c0_572] : memref<2x7x22x22xf32, #tpu.memory_space<vmem>>, vector<1x1x16x16xf32>
      %643 = vector.shape_cast %642 : vector<1x1x16x16xf32> to vector<16x16xf32>
      %c1_573 = arith.constant 1 : index
      %c2_574 = arith.constant 2 : index
      %c5_575 = arith.constant 5 : index
      %c0_576 = arith.constant 0 : index
      %644 = vector.load %arg7[%c1_573, %c2_574, %c5_575, %c0_576] : memref<2x7x22x22xf32, #tpu.memory_space<vmem>>, vector<1x1x16x16xf32>
      %645 = vector.shape_cast %644 : vector<1x1x16x16xf32> to vector<16x16xf32>
      %c37 = arith.constant 37 : index
      %646 = memref.load %arg2[%c37] : memref<99xf32, #tpu.memory_space<smem>>
      %647 = vector.broadcast %646 : f32 to vector<16x16xf32>
      %648 = arith.mulf %647, %643 : vector<16x16xf32>
      %c86 = arith.constant 86 : index
      %649 = memref.load %arg2[%c86] : memref<99xf32, #tpu.memory_space<smem>>
      %650 = vector.broadcast %649 : f32 to vector<16x16xf32>
      %651 = arith.mulf %650, %645 : vector<16x16xf32>
      %652 = arith.addf %648, %651 : vector<16x16xf32>
      %653 = arith.addf %605, %652 : vector<16x16xf32>
      %c0_577 = arith.constant 0 : index
      %c3_578 = arith.constant 3 : index
      %c5_579 = arith.constant 5 : index
      %c0_580 = arith.constant 0 : index
      %654 = vector.load %arg7[%c0_577, %c3_578, %c5_579, %c0_580] : memref<2x7x22x22xf32, #tpu.memory_space<vmem>>, vector<1x1x16x16xf32>
      %655 = vector.shape_cast %654 : vector<1x1x16x16xf32> to vector<16x16xf32>
      %c1_581 = arith.constant 1 : index
      %c3_582 = arith.constant 3 : index
      %c5_583 = arith.constant 5 : index
      %c0_584 = arith.constant 0 : index
      %656 = vector.load %arg7[%c1_581, %c3_582, %c5_583, %c0_584] : memref<2x7x22x22xf32, #tpu.memory_space<vmem>>, vector<1x1x16x16xf32>
      %657 = vector.shape_cast %656 : vector<1x1x16x16xf32> to vector<16x16xf32>
      %c38 = arith.constant 38 : index
      %658 = memref.load %arg2[%c38] : memref<99xf32, #tpu.memory_space<smem>>
      %659 = vector.broadcast %658 : f32 to vector<16x16xf32>
      %660 = arith.mulf %659, %655 : vector<16x16xf32>
      %c87 = arith.constant 87 : index
      %661 = memref.load %arg2[%c87] : memref<99xf32, #tpu.memory_space<smem>>
      %662 = vector.broadcast %661 : f32 to vector<16x16xf32>
      %663 = arith.mulf %662, %657 : vector<16x16xf32>
      %664 = arith.addf %660, %663 : vector<16x16xf32>
      %665 = arith.addf %617, %664 : vector<16x16xf32>
      %c0_585 = arith.constant 0 : index
      %c4_586 = arith.constant 4 : index
      %c5_587 = arith.constant 5 : index
      %c0_588 = arith.constant 0 : index
      %666 = vector.load %arg7[%c0_585, %c4_586, %c5_587, %c0_588] : memref<2x7x22x22xf32, #tpu.memory_space<vmem>>, vector<1x1x16x16xf32>
      %667 = vector.shape_cast %666 : vector<1x1x16x16xf32> to vector<16x16xf32>
      %c1_589 = arith.constant 1 : index
      %c4_590 = arith.constant 4 : index
      %c5_591 = arith.constant 5 : index
      %c0_592 = arith.constant 0 : index
      %668 = vector.load %arg7[%c1_589, %c4_590, %c5_591, %c0_592] : memref<2x7x22x22xf32, #tpu.memory_space<vmem>>, vector<1x1x16x16xf32>
      %669 = vector.shape_cast %668 : vector<1x1x16x16xf32> to vector<16x16xf32>
      %c39 = arith.constant 39 : index
      %670 = memref.load %arg2[%c39] : memref<99xf32, #tpu.memory_space<smem>>
      %671 = vector.broadcast %670 : f32 to vector<16x16xf32>
      %672 = arith.mulf %671, %667 : vector<16x16xf32>
      %c88 = arith.constant 88 : index
      %673 = memref.load %arg2[%c88] : memref<99xf32, #tpu.memory_space<smem>>
      %674 = vector.broadcast %673 : f32 to vector<16x16xf32>
      %675 = arith.mulf %674, %669 : vector<16x16xf32>
      %676 = arith.addf %672, %675 : vector<16x16xf32>
      %677 = arith.addf %629, %676 : vector<16x16xf32>
      %c0_593 = arith.constant 0 : index
      %c5_594 = arith.constant 5 : index
      %c5_595 = arith.constant 5 : index
      %c0_596 = arith.constant 0 : index
      %678 = vector.load %arg7[%c0_593, %c5_594, %c5_595, %c0_596] : memref<2x7x22x22xf32, #tpu.memory_space<vmem>>, vector<1x1x16x16xf32>
      %679 = vector.shape_cast %678 : vector<1x1x16x16xf32> to vector<16x16xf32>
      %c1_597 = arith.constant 1 : index
      %c5_598 = arith.constant 5 : index
      %c5_599 = arith.constant 5 : index
      %c0_600 = arith.constant 0 : index
      %680 = vector.load %arg7[%c1_597, %c5_598, %c5_599, %c0_600] : memref<2x7x22x22xf32, #tpu.memory_space<vmem>>, vector<1x1x16x16xf32>
      %681 = vector.shape_cast %680 : vector<1x1x16x16xf32> to vector<16x16xf32>
      %c40 = arith.constant 40 : index
      %682 = memref.load %arg2[%c40] : memref<99xf32, #tpu.memory_space<smem>>
      %683 = vector.broadcast %682 : f32 to vector<16x16xf32>
      %684 = arith.mulf %683, %679 : vector<16x16xf32>
      %c89 = arith.constant 89 : index
      %685 = memref.load %arg2[%c89] : memref<99xf32, #tpu.memory_space<smem>>
      %686 = vector.broadcast %685 : f32 to vector<16x16xf32>
      %687 = arith.mulf %686, %681 : vector<16x16xf32>
      %688 = arith.addf %684, %687 : vector<16x16xf32>
      %689 = arith.addf %641, %688 : vector<16x16xf32>
      %c0_601 = arith.constant 0 : index
      %c6_602 = arith.constant 6 : index
      %c5_603 = arith.constant 5 : index
      %c0_604 = arith.constant 0 : index
      %690 = vector.load %arg7[%c0_601, %c6_602, %c5_603, %c0_604] : memref<2x7x22x22xf32, #tpu.memory_space<vmem>>, vector<1x1x16x16xf32>
      %691 = vector.shape_cast %690 : vector<1x1x16x16xf32> to vector<16x16xf32>
      %c1_605 = arith.constant 1 : index
      %c6_606 = arith.constant 6 : index
      %c5_607 = arith.constant 5 : index
      %c0_608 = arith.constant 0 : index
      %692 = vector.load %arg7[%c1_605, %c6_606, %c5_607, %c0_608] : memref<2x7x22x22xf32, #tpu.memory_space<vmem>>, vector<1x1x16x16xf32>
      %693 = vector.shape_cast %692 : vector<1x1x16x16xf32> to vector<16x16xf32>
      %c41 = arith.constant 41 : index
      %694 = memref.load %arg2[%c41] : memref<99xf32, #tpu.memory_space<smem>>
      %695 = vector.broadcast %694 : f32 to vector<16x16xf32>
      %696 = arith.mulf %695, %691 : vector<16x16xf32>
      %c90 = arith.constant 90 : index
      %697 = memref.load %arg2[%c90] : memref<99xf32, #tpu.memory_space<smem>>
      %698 = vector.broadcast %697 : f32 to vector<16x16xf32>
      %699 = arith.mulf %698, %693 : vector<16x16xf32>
      %700 = arith.addf %696, %699 : vector<16x16xf32>
      %701 = arith.addf %653, %700 : vector<16x16xf32>
      %c0_609 = arith.constant 0 : index
      %c0_610 = arith.constant 0 : index
      %c6_611 = arith.constant 6 : index
      %c0_612 = arith.constant 0 : index
      %702 = vector.load %arg7[%c0_609, %c0_610, %c6_611, %c0_612] : memref<2x7x22x22xf32, #tpu.memory_space<vmem>>, vector<1x1x16x16xf32>
      %703 = vector.shape_cast %702 : vector<1x1x16x16xf32> to vector<16x16xf32>
      %c1_613 = arith.constant 1 : index
      %c0_614 = arith.constant 0 : index
      %c6_615 = arith.constant 6 : index
      %c0_616 = arith.constant 0 : index
      %704 = vector.load %arg7[%c1_613, %c0_614, %c6_615, %c0_616] : memref<2x7x22x22xf32, #tpu.memory_space<vmem>>, vector<1x1x16x16xf32>
      %705 = vector.shape_cast %704 : vector<1x1x16x16xf32> to vector<16x16xf32>
      %c42 = arith.constant 42 : index
      %706 = memref.load %arg2[%c42] : memref<99xf32, #tpu.memory_space<smem>>
      %707 = vector.broadcast %706 : f32 to vector<16x16xf32>
      %708 = arith.mulf %707, %703 : vector<16x16xf32>
      %c91 = arith.constant 91 : index
      %709 = memref.load %arg2[%c91] : memref<99xf32, #tpu.memory_space<smem>>
      %710 = vector.broadcast %709 : f32 to vector<16x16xf32>
      %711 = arith.mulf %710, %705 : vector<16x16xf32>
      %712 = arith.addf %708, %711 : vector<16x16xf32>
      %713 = arith.addf %665, %712 : vector<16x16xf32>
      %c0_617 = arith.constant 0 : index
      %c1_618 = arith.constant 1 : index
      %c6_619 = arith.constant 6 : index
      %c0_620 = arith.constant 0 : index
      %714 = vector.load %arg7[%c0_617, %c1_618, %c6_619, %c0_620] : memref<2x7x22x22xf32, #tpu.memory_space<vmem>>, vector<1x1x16x16xf32>
      %715 = vector.shape_cast %714 : vector<1x1x16x16xf32> to vector<16x16xf32>
      %c1_621 = arith.constant 1 : index
      %c1_622 = arith.constant 1 : index
      %c6_623 = arith.constant 6 : index
      %c0_624 = arith.constant 0 : index
      %716 = vector.load %arg7[%c1_621, %c1_622, %c6_623, %c0_624] : memref<2x7x22x22xf32, #tpu.memory_space<vmem>>, vector<1x1x16x16xf32>
      %717 = vector.shape_cast %716 : vector<1x1x16x16xf32> to vector<16x16xf32>
      %c43 = arith.constant 43 : index
      %718 = memref.load %arg2[%c43] : memref<99xf32, #tpu.memory_space<smem>>
      %719 = vector.broadcast %718 : f32 to vector<16x16xf32>
      %720 = arith.mulf %719, %715 : vector<16x16xf32>
      %c92 = arith.constant 92 : index
      %721 = memref.load %arg2[%c92] : memref<99xf32, #tpu.memory_space<smem>>
      %722 = vector.broadcast %721 : f32 to vector<16x16xf32>
      %723 = arith.mulf %722, %717 : vector<16x16xf32>
      %724 = arith.addf %720, %723 : vector<16x16xf32>
      %725 = arith.addf %677, %724 : vector<16x16xf32>
      %c0_625 = arith.constant 0 : index
      %c2_626 = arith.constant 2 : index
      %c6_627 = arith.constant 6 : index
      %c0_628 = arith.constant 0 : index
      %726 = vector.load %arg7[%c0_625, %c2_626, %c6_627, %c0_628] : memref<2x7x22x22xf32, #tpu.memory_space<vmem>>, vector<1x1x16x16xf32>
      %727 = vector.shape_cast %726 : vector<1x1x16x16xf32> to vector<16x16xf32>
      %c1_629 = arith.constant 1 : index
      %c2_630 = arith.constant 2 : index
      %c6_631 = arith.constant 6 : index
      %c0_632 = arith.constant 0 : index
      %728 = vector.load %arg7[%c1_629, %c2_630, %c6_631, %c0_632] : memref<2x7x22x22xf32, #tpu.memory_space<vmem>>, vector<1x1x16x16xf32>
      %729 = vector.shape_cast %728 : vector<1x1x16x16xf32> to vector<16x16xf32>
      %c44 = arith.constant 44 : index
      %730 = memref.load %arg2[%c44] : memref<99xf32, #tpu.memory_space<smem>>
      %731 = vector.broadcast %730 : f32 to vector<16x16xf32>
      %732 = arith.mulf %731, %727 : vector<16x16xf32>
      %c93 = arith.constant 93 : index
      %733 = memref.load %arg2[%c93] : memref<99xf32, #tpu.memory_space<smem>>
      %734 = vector.broadcast %733 : f32 to vector<16x16xf32>
      %735 = arith.mulf %734, %729 : vector<16x16xf32>
      %736 = arith.addf %732, %735 : vector<16x16xf32>
      %737 = arith.addf %689, %736 : vector<16x16xf32>
      %c0_633 = arith.constant 0 : index
      %c3_634 = arith.constant 3 : index
      %c6_635 = arith.constant 6 : index
      %c0_636 = arith.constant 0 : index
      %738 = vector.load %arg7[%c0_633, %c3_634, %c6_635, %c0_636] : memref<2x7x22x22xf32, #tpu.memory_space<vmem>>, vector<1x1x16x16xf32>
      %739 = vector.shape_cast %738 : vector<1x1x16x16xf32> to vector<16x16xf32>
      %c1_637 = arith.constant 1 : index
      %c3_638 = arith.constant 3 : index
      %c6_639 = arith.constant 6 : index
      %c0_640 = arith.constant 0 : index
      %740 = vector.load %arg7[%c1_637, %c3_638, %c6_639, %c0_640] : memref<2x7x22x22xf32, #tpu.memory_space<vmem>>, vector<1x1x16x16xf32>
      %741 = vector.shape_cast %740 : vector<1x1x16x16xf32> to vector<16x16xf32>
      %c45 = arith.constant 45 : index
      %742 = memref.load %arg2[%c45] : memref<99xf32, #tpu.memory_space<smem>>
      %743 = vector.broadcast %742 : f32 to vector<16x16xf32>
      %744 = arith.mulf %743, %739 : vector<16x16xf32>
      %c94 = arith.constant 94 : index
      %745 = memref.load %arg2[%c94] : memref<99xf32, #tpu.memory_space<smem>>
      %746 = vector.broadcast %745 : f32 to vector<16x16xf32>
      %747 = arith.mulf %746, %741 : vector<16x16xf32>
      %748 = arith.addf %744, %747 : vector<16x16xf32>
      %749 = arith.addf %701, %748 : vector<16x16xf32>
      %c0_641 = arith.constant 0 : index
      %c4_642 = arith.constant 4 : index
      %c6_643 = arith.constant 6 : index
      %c0_644 = arith.constant 0 : index
      %750 = vector.load %arg7[%c0_641, %c4_642, %c6_643, %c0_644] : memref<2x7x22x22xf32, #tpu.memory_space<vmem>>, vector<1x1x16x16xf32>
      %751 = vector.shape_cast %750 : vector<1x1x16x16xf32> to vector<16x16xf32>
      %c1_645 = arith.constant 1 : index
      %c4_646 = arith.constant 4 : index
      %c6_647 = arith.constant 6 : index
      %c0_648 = arith.constant 0 : index
      %752 = vector.load %arg7[%c1_645, %c4_646, %c6_647, %c0_648] : memref<2x7x22x22xf32, #tpu.memory_space<vmem>>, vector<1x1x16x16xf32>
      %753 = vector.shape_cast %752 : vector<1x1x16x16xf32> to vector<16x16xf32>
      %c46 = arith.constant 46 : index
      %754 = memref.load %arg2[%c46] : memref<99xf32, #tpu.memory_space<smem>>
      %755 = vector.broadcast %754 : f32 to vector<16x16xf32>
      %756 = arith.mulf %755, %751 : vector<16x16xf32>
      %c95 = arith.constant 95 : index
      %757 = memref.load %arg2[%c95] : memref<99xf32, #tpu.memory_space<smem>>
      %758 = vector.broadcast %757 : f32 to vector<16x16xf32>
      %759 = arith.mulf %758, %753 : vector<16x16xf32>
      %760 = arith.addf %756, %759 : vector<16x16xf32>
      %761 = arith.addf %713, %760 : vector<16x16xf32>
      %c0_649 = arith.constant 0 : index
      %c5_650 = arith.constant 5 : index
      %c6_651 = arith.constant 6 : index
      %c0_652 = arith.constant 0 : index
      %762 = vector.load %arg7[%c0_649, %c5_650, %c6_651, %c0_652] : memref<2x7x22x22xf32, #tpu.memory_space<vmem>>, vector<1x1x16x16xf32>
      %763 = vector.shape_cast %762 : vector<1x1x16x16xf32> to vector<16x16xf32>
      %c1_653 = arith.constant 1 : index
      %c5_654 = arith.constant 5 : index
      %c6_655 = arith.constant 6 : index
      %c0_656 = arith.constant 0 : index
      %764 = vector.load %arg7[%c1_653, %c5_654, %c6_655, %c0_656] : memref<2x7x22x22xf32, #tpu.memory_space<vmem>>, vector<1x1x16x16xf32>
      %765 = vector.shape_cast %764 : vector<1x1x16x16xf32> to vector<16x16xf32>
      %c47 = arith.constant 47 : index
      %766 = memref.load %arg2[%c47] : memref<99xf32, #tpu.memory_space<smem>>
      %767 = vector.broadcast %766 : f32 to vector<16x16xf32>
      %768 = arith.mulf %767, %763 : vector<16x16xf32>
      %c96 = arith.constant 96 : index
      %769 = memref.load %arg2[%c96] : memref<99xf32, #tpu.memory_space<smem>>
      %770 = vector.broadcast %769 : f32 to vector<16x16xf32>
      %771 = arith.mulf %770, %765 : vector<16x16xf32>
      %772 = arith.addf %768, %771 : vector<16x16xf32>
      %773 = arith.addf %725, %772 : vector<16x16xf32>
      %c0_657 = arith.constant 0 : index
      %c6_658 = arith.constant 6 : index
      %c6_659 = arith.constant 6 : index
      %c0_660 = arith.constant 0 : index
      %774 = vector.load %arg7[%c0_657, %c6_658, %c6_659, %c0_660] : memref<2x7x22x22xf32, #tpu.memory_space<vmem>>, vector<1x1x16x16xf32>
      %775 = vector.shape_cast %774 : vector<1x1x16x16xf32> to vector<16x16xf32>
      %c1_661 = arith.constant 1 : index
      %c6_662 = arith.constant 6 : index
      %c6_663 = arith.constant 6 : index
      %c0_664 = arith.constant 0 : index
      %776 = vector.load %arg7[%c1_661, %c6_662, %c6_663, %c0_664] : memref<2x7x22x22xf32, #tpu.memory_space<vmem>>, vector<1x1x16x16xf32>
      %777 = vector.shape_cast %776 : vector<1x1x16x16xf32> to vector<16x16xf32>
      %c48 = arith.constant 48 : index
      %778 = memref.load %arg2[%c48] : memref<99xf32, #tpu.memory_space<smem>>
      %779 = vector.broadcast %778 : f32 to vector<16x16xf32>
      %780 = arith.mulf %779, %775 : vector<16x16xf32>
      %c97 = arith.constant 97 : index
      %781 = memref.load %arg2[%c97] : memref<99xf32, #tpu.memory_space<smem>>
      %782 = vector.broadcast %781 : f32 to vector<16x16xf32>
      %783 = arith.mulf %782, %777 : vector<16x16xf32>
      %784 = arith.addf %780, %783 : vector<16x16xf32>
      %785 = arith.addf %737, %784 : vector<16x16xf32>
      %786 = arith.addf %785, %749 : vector<16x16xf32>
      %787 = arith.addf %761, %773 : vector<16x16xf32>
      %788 = arith.addf %786, %787 : vector<16x16xf32>
      %c98 = arith.constant 98 : index
      %789 = memref.load %arg2[%c98] : memref<99xf32, #tpu.memory_space<smem>>
      %790 = vector.broadcast %789 : f32 to vector<16x16xf32>
      %791 = arith.addf %788, %790 : vector<16x16xf32>
      %c0_665 = arith.constant 0 : index
      %c0_666 = arith.constant 0 : index
      %c0_667 = arith.constant 0 : index
      %c0_668 = arith.constant 0 : index
      %792 = vector.load %arg4[%c0_665, %c0_666, %c0_667, %c0_668] : memref<1x1x16x16xf32, #tpu.memory_space<vmem>>, vector<1x1x16x16xf32>
      %793 = vector.shape_cast %792 : vector<1x1x16x16xf32> to vector<16x16xf32>
      %794 = vector.shape_cast %791 : vector<16x16xf32> to vector<1x1x16x16xf32>
      tpu.vector_store %arg4[%c0_665, %c0_666, %c0_667, %c0_668], %794 {strides = array<i32>} : memref<1x1x16x16xf32, #tpu.memory_space<vmem>>, vector<1x1x16x16xf32>,
    } else {
    }
    return
  }
  func.func @transform_0(%arg0: i32, %arg1: i32, %arg2: memref<99xf32, #tpu.memory_space<smem>>) -> (i32, i32, i32, i32) {
    %c0_i32 = arith.constant 0 : i32
    %c0_i32_0 = arith.constant 0 : i32
    %c0_i32_1 = arith.constant 0 : i32
    return %arg0, %arg1, %c0_i32, %c0_i32_0 : i32, i32, i32, i32
  }
  func.func @transform_1(%arg0: i32, %arg1: i32, %arg2: memref<99xf32, #tpu.memory_space<smem>>) -> (i32, i32, i32, i32) {
    %c0_i32 = arith.constant 0 : i32
    %c0_i32_0 = arith.constant 0 : i32
    %c0_i32_1 = arith.constant 0 : i32
    %c0_i32_2 = arith.constant 0 : i32
    return %arg0, %c0_i32, %c0_i32_0, %c0_i32_1 : i32, i32, i32, i32
  }
}

</mosaic_0001>

<bundles_post_ra>
// kernel: tpu_custom_call.1
= control target key start
LH: loop header
LB: loop body
LE: loop exit
PB: predicated region body
PF: predicated region fallthrough
CT: control target
= control target key end

     0   :  { %s1930_s9 = smov [#allocation6]   ;;  %s3392_s0 = inlined_call_operand.hbm [shape: f32[99], index: 0, kind: input, shape index: {}]   ;;  %s3393_s1 = inlined_call_operand.hbm [shape: f32[2,4,16,16], index: 1, kind: input, shape index: {}]   ;;  %s3394_s2 = inlined_call_operand.hbm [shape: f32[2,1,16,16], index: 2, kind: output, shape index: {}]  }
   0x1   :  { %3529 = sst [smem:[#allocation158_spill]] %s3393_s1 }
   0x2   :  { %3530 = sst [smem:[#allocation159_spill]] %s3394_s2 }
   0x3   :  { %8 = dma.hbm_to_smem %s3392_s0, 16, %s1930_s9, [#allocation5] }
   0x4   :  { %1896 = dma.done.wait [#allocation5], 16 }
   0x5   :  { %1897 = vsyncadd [#allocation5], 4294967280 }
   0x6   :  { %10 = sfence }
   0x7   :  { %11 = vsyncpa [#allocation8], 0 }
   0x8   :  { %13 = vsyncpa [#allocation8 + $0x1], 0 }
   0x9   :  { %14 = vsyncpa [#allocation9], 0 }
   0xa   :  { %16 = vsyncpa [#allocation9 + $0x1], 0  ;;  %s1967_s12 = smov 0   ;;  %s1969_s13 = smov 0  }
   0xb   :  { %s1971_s14 = smov 0   ;;  %s1973_s15 = smov 0  }
   0xc   :  { %s1975_s16 = smov 0   ;;  %s1977_s17 = smov 0  }
   0xd LB: > { %3531 = sst [smem:[#allocation14_spill]] %s1908_s12  ;;  %s1616_s0 = sadd.s32 4294967295, %s1928_s17   ;;  %s1928_s17 = sphi %s1977_s17, %s22_s17   ;;  %s1924_s16 = sphi %s1975_s16, %s4042_s16   ;;  %s1920_s15 = sphi %s1973_s15, %s4041_s15   ;;  %s1916_s14 = sphi %s1971_s14, %s4040_s14   ;;  %s1912_s13 = sphi %s1969_s13, %s4039_s13   ;;  %s1908_s12 = sphi %s1967_s12, %s4038_s12  }
   0xe   : > { %3532 = sst [smem:[#allocation15_spill]] %s1912_s13  ;;  %s1617_s18 = sadd.s32 4294967294, %s1928_s17  }
   0xf   : > { %3533 = sst [smem:[#allocation16_spill]] %s1916_s14  ;;  %s34_s19 = sadd.s32 1, %s1924_s16 }
  0x10   : > { %3534 = sst [smem:[#allocation17_spill]] %s1920_s15  ;;  %s43_s20 = sadd.s32 1, %s1916_s14 }
  0x11   : > { %3535 = sst [smem:[#allocation18_spill]] %s1924_s16  ;;  %p36_p0 = scmp.ge.s32.totalorder %s34_s19, 2 }
  0x12   : > { %3536 = sst [smem:[#allocation19_spill]] %s1928_s17  ;;  %p50_p1 = scmp.ne.s32.totalorder %s1916_s14, %s1912_s13 }
  0x13   : > { %p51_p2 = scmp.eq.s32.totalorder %s1928_s17, 0  ;;  %p56_p3 = scmp.ne.s32.totalorder %s1912_s13, %s1908_s12 }
  0x14   : > { %s4044_s19 = smov (%p36_p0, %s34_s19), 0  ;;  %p57_p5 = scmp.eq.s32.totalorder %s1616_s0, 0 }
  0x15   : > { %3537 = sst [smem:[#allocation20_spill]] %s4044_s19  ;;  %p2008_p4 = por %p51_p2, %p50_p1 }
  0x16   : > { %s38_s22 = ssub.s32 %s1924_s16, %s4044_s19  ;;  %p80_p6 = scmp.eq.s32.totalorder %s1616_s0, 1 }
  0x17   : > { %p41_p7 = scmp.eq.s32.totalorder %s38_s22, 0  ;;  %p2014_p8 = por %p57_p5, %p56_p3 }
  0x18   : > { %p2018_p9 = por %p80_p6, %p50_p1  ;;  %p86_p10 = scmp.eq.s32.totalorder %s1617_s18, 1 }
  0x19   : > { %s2023_s25 = scalar_select %p41_p7, %s1916_s14, %s43_s20  }
  0x1a   : > { %s3540_s24 = scalar_select %p2018_p9, 1, 0 }
  0x1b   : > { %3542 = sst [smem:[#allocation22_spill]] %s2023_s25  ;;  %p2025_p11 = por %p86_p10, %p56_p3 }
  0x1c   : > { %3541 = sst [smem:[#allocation21_spill]] %s3540_s24  ;;  %p1743_p13 = scmp.lt.s32.totalorder %s1928_s17, 2 }
  0x1d   : > { %s3543_s26 = scalar_select %p2025_p11, 1, 0 }
  0x1e   : > { %s106_s27 = sand.u32 1, %s1916_s14   ;;  %s1729_s29 = sshll.u32 %s1924_s16, 10 }
  0x1f   : > { %3544 = sst [smem:[#allocation23_spill]] %s3543_s26  ;;  %s1620_s28 = sshll.u32 %s106_s27, 6 }
  0x20   : > { %s3545_s1 = sld [smem:[#allocation158_spill]]  ;;  %s110_s5 = scalar_lea.vmem [#allocation7], %s1620_s28 }
  0x21   : > { %s120_s6 = sshll.u32 %s110_s5, 4  ;;  %p2038_p0 = pnand %p1743_p13, %p2008_p4  ;;  %s121_s6 = int_to_ptr.vmem [resolvable:$true] %s120_s6 }
  0x22   : > { %p1623_p1 = scmp.ge.s32.totalorder %s1928_s17, 1  ;;  %s107_s8 = scalar_lea.sflag [#allocation8], %s106_s27 }
  0x23   : > { %p1820_p2 = pneg %p2038_p0  ;;  %s1831_s9 = scalar_lea.vmem %s121_s6, 1024 }
  0x24   : > { %p1832_p3 = scmp.ne.s32.totalorder %s121_s6, %s1831_s9  ;;  %s1931_s10 = smov [#allocation7]  }
  0x25   : > { %s1836_s11 = sshll.u32 %s1931_s10, 4  ;;  %s1837_s11 = int_to_ptr.vmem [resolvable:$false] %s1836_s11 }
  0x26   : > { %s119_s4 = scalar_lea.hbm %s3545_s1, %s1729_s29  ;;  %p1834_p5 = pnand %p1832_p3, %p1820_p2 }
  0x27   : > { %s1838_s0 = scalar_lea.vmem %s1837_s11, 2048  ;;  %p1839_p7 = scmp.lt.s32.totalorder %s121_s6, %s1837_s11 }
  0x28   : > { %p1835_p6 = pneg %p1834_p5  ;;  %p1840_p10 = scmp.lt.s32.totalorder %s1838_s0, %s1831_s9 }
  0x2a   : > { %p1841_p12 = por %p1840_p10, %p1839_p7 }
  0x2c   : > { %p1842_p4 = pnand %p1841_p12, %p1835_p6 }
  0x2e   : > { %1845 = shalt.err (!%p1842_p4)
}
  0x2f   : > { %s1932_s18 = smov 128   ;;  %s1933_s20 = smov 8  }
  0x30   : > { %1738 = dma.hbm_to_vmem [thread:$0]  (!%p2038_p0), %s119_s4, 1024, %s121_s6, %s107_s8, %s1932_s18, %s1932_s18, %s1933_s20  }
  0x31   : > { %p128_p13 = scmp.lt.s32.totalorder %s1928_s17, 3 }
  0x33   : > { %p129_p2 = pnand %p1623_p1, %p128_p13 }
  0x35   : > { %132 = sbr.rel (%p129_p2) target bundleno = 1227 (0x4cb), region = 24 }
  0x3a   : > { %s2051_s21 = sand.u32 1, %s1912_s13  }
  0x3b   : > { %3547 = sst [smem:[#allocation24_spill]] %s2051_s21  ;;  %s1624_s22 = sshll.u32 %s2051_s21, 6 }
  0x3c   : > { %s135_s27 = scalar_lea.sflag [#allocation8], %s2051_s21  ;;  %s138_s28 = scalar_lea.vmem [#allocation7], %s1624_s22 }
  0x3d   : > { %1899 = dma.done.wait (%p2014_p8), %s135_s27, 1024  }
  0x3e   : > { %1901 = vsyncadd (%p2014_p8), %s135_s27, 4294966272  ;;  %vm162_vm0 = vcmask 130048   ;;  %v1934_v0 = vmov -inf   ;;  %v1935_v1 = vmov 0.0   ;;  %v167_v2 = vld [vmem:[%s138_s28] sm:$0xff]  ;;  %v169_v3 = vld [vmem:[%s138_s28 + $0x10] sm:$0xff] }
  0x3f   : > { %165 = vst.msk [vmem:[#allocation3] sm:$0xff] %vm162_vm0, %v1934_v0  ;;  %166 = vst.msk [vmem:[#allocation3 + $0x8] sm:$0xff] %vm162_vm0, %v1934_v0  ;;  %v171_v4 = vld [vmem:[%s138_s28 + $0x20] sm:$0xff]  ;;  %v173_v5 = vld [vmem:[%s138_s28 + $0x30] sm:$0xff]  ;;  %v178_v6 = vsel %vm162_vm0, %v167_v2, 0.0  ;;  %v179_v7 = vsel %vm162_vm0, %v169_v3, 0.0 }
  0x40   : > { %163 = vst.msk [vmem:[#allocation2] sm:$0xff] %vm162_vm0, %v1935_v1  ;;  %164 = vst.msk [vmem:[#allocation2 + $0x8] sm:$0xff] %vm162_vm0, %v1935_v1  ;;  %v198_v8 = vsel %vm162_vm0, %v167_v2, -inf  ;;  %v199_v9 = vsel %vm162_vm0, %v169_v3, -inf  ;;  %v200_v10 = vsel %vm162_vm0, %v171_v4, -inf  ;;  %v202_v11 = vsel %vm162_vm0, %v173_v5, -inf }
  0x41   : > { %v168_v12 = vld [vmem:[%s138_s28 + $0x8] sm:$0xff]  ;;  %v170_v13 = vld [vmem:[%s138_s28 + $0x18] sm:$0xff]  ;;  %v180_v15 = vadd.f32 %v179_v7, %v178_v6  ;;  %v181_v16 = vsel %vm162_vm0, %v171_v4, 0.0  ;;  %v201_v17 = vmax.f32 %v198_v8, %v200_v10  ;;  %v203_v18 = vmax.f32 %v199_v9, %v202_v11  ;;  %s1936_s23 = smov 3   ;;  %s3396_s29 = smov 122  }
  0x42   : > { %v172_v14 = vld [vmem:[%s138_s28 + $0x28] sm:$0xff]  ;;  %v174_v19 = vld [vmem:[%s138_s28 + $0x38] sm:$0xff]  ;;  %v185_v20 = vsel %vm162_vm0, %v168_v12, 0.0  ;;  %v186_v21 = vsel %vm162_vm0, %v170_v13, 0.0  ;;  %v205_v25 = vsel %vm162_vm0, %v168_v12, -inf  ;;  %v206_v26 = vsel %vm162_vm0, %v170_v13, -inf }
  0x43   : > { %v187_v23 = vadd.f32 %v186_v21, %v185_v20  ;;  %v188_v24 = vsel %vm162_vm0, %v172_v14, 0.0  ;;  %v204_v27 = vmax.f32 %v201_v17, %v203_v18  ;;  %v207_v28 = vsel %vm162_vm0, %v172_v14, -inf  ;;  %s1938_s30 = smov 2   ;;  %s3395_s3 = smov 124  }
  0x44   : > { %v209_v29 = vsel %vm162_vm0, %v174_v19, -inf  ;;  %v182_v30 = vadd.f32 %v181_v16, %v180_v15  ;;  %v208_v31 = vmax.f32 %v205_v25, %v207_v28  ;;  %v183_v34 = vsel %vm162_vm0, %v173_v5, 0.0  ;;  %s1940_s4 = smov 4   ;;  %s3398_s5 = smov 126  }
  0x45   : > { %v210_v32 = vmax.f32 %v206_v26, %v209_v29  ;;  %v189_v35 = vadd.f32 %v188_v24, %v187_v23  ;;  %v190_v40 = vsel %vm162_vm0, %v174_v19, 0.0  ;;  %vm233_vm1 = vcmask 154648   ;;  %s1942_s6 = smov 6   ;;  %s2118_s7 = sld [smem:[#allocation6 + $0x31]] }
  0x46   : > { %v196_v22 = vld [vmem:[#allocation3] sm:$0xff]  ;;  %v197_v37 = vld [vmem:[#allocation3 + $0x8] sm:$0xff]  ;;  %v184_v38 = vadd.f32 %v183_v34, %v182_v30  ;;  %vm236_vm2 = vcmask 150555   ;;  %vm240_vm3 = vcmask 149530   ;;  %vm244_vm4 = vcmask 148505   ;;  %s2120_s8 = sld [smem:[#allocation6]] }
  0x47   : > { %v175_v33 = vld [vmem:[#allocation2] sm:$0xff]  ;;  %v212_v36 = vmax.f32 %v196_v22, %v204_v27  ;;  %v176_v39 = vld [vmem:[#allocation2 + $0x8] sm:$0xff]  ;;  %v211_v41 = vmax.f32 %v208_v31, %v210_v32  ;;  %v191_v42 = vadd.f32 %v190_v40, %v189_v35  ;;  %vm238_vm5 = vcmask 153630   ;;  %s1943_s9 = smov 127   ;;  %s3401_s10 = smov 125  }
  0x48   : > { %v192_v43 = vadd.f32 %v184_v38, %v175_v33  ;;  %vm242_vm6 = vcmask 152605   ;;  %vm246_vm7 = vcmask 151580   ;;  %vm263_vm8 = vcmask 7168   ;;  %s3406_s11 = smov 123   ;;  %s2156_s0 = sld [smem:[#allocation6 + $0x38]] }
  0x49   : > { %214 = vst.msk [vmem:[#allocation3] sm:$0xff] %vm162_vm0, %v212_v36  ;;  %v213_v44 = vmax.f32 %v197_v37, %v211_v41  ;;  %v193_v45 = vadd.f32 %v191_v42, %v176_v39  ;;  %vm266_vm9 = vcmask 5120   ;;  %vm283_vm10 = vcmask 162968   ;;  %s2159_s18 = sld [smem:[#allocation6 + $0x3f]]  ;;  %s3551_s1 = smov 122  }
  0x4a   : > { %194 = vst.msk [vmem:[#allocation2] sm:$0xff] %vm162_vm0, %v192_v43  ;;  %vm286_vm11 = vcmask 160920   ;;  %vm303_vm12 = vcmask 15368   ;;  %vm306_vm13 = vcmask 13320   ;;  %vm323_vm14 = vcmask 171168   ;;  %s2161_s20 = sld [smem:[#allocation6 + $0x46]] }
  0x4b   : > { %215 = vst.msk [vmem:[#allocation3 + $0x8] sm:$0xff] %vm162_vm0, %v213_v44  ;;  %195 = vst.msk [vmem:[#allocation2 + $0x8] sm:$0xff] %vm162_vm0, %v193_v45  ;;  %vm326_vm15 = vcmask 169120   ;;  %s2163_s22 = sld [smem:[#allocation6 + $0x4d]]  ;;  %s3561_s26 = smov 124  }
  0x4c   : > { %s2166_s27 = sld [smem:[#allocation6 + $0x54]]  ;;  %s3563_s2 = smov 125  }
  0x4d   : > { %s2169_s28 = sld [smem:[#allocation6 + $0x7]] }
  0x4e   : > { %s2200_s19 = sld [smem:[#allocation6 + $0x51]] }
  0x4f   : > { %s2202_s16 = sld [smem:[#allocation6 + $0x58]] }
  0x50   : > { %v223_v46 = vld [vmem:[#allocation3] sm:$0xff]  ;;  %s2204_s25 = sld [smem:[#allocation6 + $0x32]] }
  0x51   : > { %485 = vrot.lane.b32.xlu1 %v223_v46, %s1936_s23  ;;  %v219_v47 = vld [vmem:[#allocation2] sm:$0xff]  ;;  %s2207_s14 = sld [smem:[#allocation6 + $0x39]] }
  0x52   : > { %v224_v48 = vld [vmem:[#allocation3 + $0x8] sm:$0xff]  ;;  %v221_v49 = vmul.f32 0.25, %v219_v47  ;;  %v220_v50 = vld [vmem:[#allocation2 + $0x8] sm:$0xff]  ;;  %s2211_s13 = sld [smem:[#allocation6 + $0x40]] }
  0x53   : > { %v222_v51 = vmul.f32 0.25, %v220_v50  ;;  %s2213_s17 = sld [smem:[#allocation6 + $0x47]] }
  0x54   : > { %227 = vrot.lane.b32.xlu0 %v221_v49, %s1936_s23  ;;  %3553 = sst [smem:[#allocation29_spill]] %s2200_s19 }
  0x55   : > { %487 = vrot.lane.b32.xlu1 %v224_v48, %s1936_s23  ;;  %3554 = sst [smem:[#allocation30_spill]] %s2202_s16 }
  0x56   : > { %3555 = sst [smem:[#allocation31_spill]] %s2204_s25 }
  0x57   : > { %3557 = sst [smem:[#allocation32_spill]] %s2207_s14 }
  0x58   : > { %229 = vrot.lane.b32.xlu0 %v222_v51, %s1936_s23  ;;  %s2171_s23 = sld [smem:[#allocation6 + $0xe]] }
  0x59   : > { %3558 = sst [smem:[#allocation33_spill]] %s2211_s13 }
  0x5a   : > { %3559 = sst [smem:[#allocation34_spill]] %s2213_s17 }
  0x5b   : > { %s2218_s12 = sld [smem:[#allocation6 + $0x55]] }
  0x5c   : > { %s2223_s24 = sld [smem:[#allocation6 + $0x33]] }
  0x5d   : > { %s2225_s15 = sld [smem:[#allocation6 + $0x34]] }
  0x5e   : > { %s2228_s21 = sld [smem:[#allocation6 + $0x3a]] }
  0x5f   : > { %s2231_s17 = sld [smem:[#allocation6 + $0x41]] }
  0x60   : > { %s2256_s13 = sld [smem:[#allocation6 + $0x3d]] }
  0x61   : > { %3562 = sst [smem:[#allocation36_spill]] %s2218_s12 }
  0x62   : > { %3565 = sst [smem:[#allocation38_spill]] %s2223_s24 }
  0x63   : > { %3566 = sst [smem:[#allocation39_spill]] %s2225_s15 }
  0x64   : > { %3567 = sst [smem:[#allocation40_spill]] %s2228_s21 }
  0x65   : > { %3569 = sst [smem:[#allocation41_spill]] %s2231_s17 }
  0x66   : > { %s2235_s12 = sld [smem:[#allocation6 + $0x4f]] }
  0x67   : > { %s2240_s24 = sld [smem:[#allocation6 + $0x5d]] }
  0x68   : > { %s2242_s15 = sld [smem:[#allocation6 + $0x36]] }
  0x69   : > { %s2246_s21 = sld [smem:[#allocation6 + $0x42]] }
  0x6a   : > { %s2250_s17 = sld [smem:[#allocation6 + $0x50]] }
  0x6b   : > { %3581 = sst [smem:[#allocation53_spill]] %s2256_s13 }
  0x6c   : > { %3571 = sst [smem:[#allocation43_spill]] %s2235_s12 }
  0x6d   : > { %3573 = sst [smem:[#allocation45_spill]] %s2240_s24 }
  0x6e   : > { %3574 = sst [smem:[#allocation46_spill]] %s2242_s15 }
  0x6f   : > { %3576 = sst [smem:[#allocation48_spill]] %s2246_s21 }
  0x70   : > { %3578 = sst [smem:[#allocation50_spill]] %s2250_s17 }
  0x71   : > { %s2254_s12 = sld [smem:[#allocation6 + $0x37]] }
  0x72   : > { %s2262_s24 = sld [smem:[#allocation6 + $0x52]] }
  0x73   : > { %s2264_s15 = sld [smem:[#allocation6 + $0x59]] }
  0x74   : > { %s2268_s21 = sld [smem:[#allocation6 + $0x45]] }
  0x75   : > { %s2272_s17 = sld [smem:[#allocation6 + $0x53]] }
  0x76   : > { %s2278_s13 = sld [smem:[#allocation6 + $0x1]] }
  0x77   : > { %3580 = sst [smem:[#allocation52_spill]] %s2254_s12 }
  0x78   : > { %3584 = sst [smem:[#allocation56_spill]] %s2262_s24 }
  0x79   : > { %s2276_s12 = sld [smem:[#allocation6 + $0x4]] }
  0x7a   : > { %3586 = sst [smem:[#allocation58_spill]] %s2268_s21 }
  0x7b   : > { %3587 = sst [smem:[#allocation59_spill]] %s2272_s17 }
  0x7c   : > { %3590 = sst [smem:[#allocation62_spill]] %s2278_s13 }
  0x7d   : > { %s2284_s24 = sld [smem:[#allocation6 + $0x19]] }
  0x7e   : > { %s2288_s21 = sld [smem:[#allocation6 + $0x27]] }
  0x7f   : > { %3589 = sst [smem:[#allocation61_spill]] %s2276_s12 }
  0x80   : > { %s2290_s17 = sld [smem:[#allocation6 + $0x8]] }
  0x81   : > { %s2294_s12 = sld [smem:[#allocation6 + $0x16]] }
  0x82   : > { %s2306_s13 = sld [smem:[#allocation6 + $0x10]] }
  0x83   : > { %3593 = sst [smem:[#allocation65_spill]] %s2284_s24 }
  0x84   : > { %3595 = sst [smem:[#allocation67_spill]] %s2288_s21 }
  0x85   : > { %s2300_s24 = sld [smem:[#allocation6 + $0x2b]] }
  0x86   : > { %3596 = sst [smem:[#allocation68_spill]] %s2290_s17 }
  0x87   : > { %3598 = sst [smem:[#allocation70_spill]] %s2294_s12 }
  0x88   : > { %s2304_s21 = sld [smem:[#allocation6 + $0x9]] }
  0x89   : > { %3604 = sst [smem:[#allocation76_spill]] %s2306_s13 }
  0x8a   : > { %s2308_s17 = sld [smem:[#allocation6 + $0x17]] }
  0x8b   : > { %3601 = sst [smem:[#allocation73_spill]] %s2300_s24 }
  0x8c   : > { %s2312_s12 = sld [smem:[#allocation6 + $0x25]] }
  0x8d   : > { %s3713_s24 = sld [smem:[#allocation36_spill]] }
  0x8e   : > { %3603 = sst [smem:[#allocation75_spill]] %s2304_s21 }
  0x8f   : > { %s3743_s13 = sld [smem:[#allocation50_spill]] }
  0x90   : > { %3605 = sst [smem:[#allocation77_spill]] %s2308_s17 }
  0x92   : > { %3607 = sst [smem:[#allocation79_spill]] %s2312_s12 }
  0x93   : > { %s2325_s12 = sld [smem:[#allocation6 + $0xa]] }
  0x99   : > { %3610 = sst [smem:[#allocation82_spill]] %s2325_s12 }
  0xc3   : > { %v486_v52 = vpop.permute.xlu1 %485 }
  0xc4   : > { %492 = vst.msk [vmem:[#allocation4 + $0xab] sm:$0xff] %vm233_vm1, %v486_v52 }
  0xc5   : > { %494 = vst.msk [vmem:[#allocation4 + $0xa5] sm:$0x8] %vm236_vm2, %v486_v52 }
  0xc6   : > { %496 = vst.msk [vmem:[#allocation4 + $0xa7] sm:$0x4] %vm240_vm3, %v486_v52  ;;  %v228_v54 = vpop.permute.xlu0 %227 }
  0xc7   : > { %498 = vst.msk [vmem:[#allocation4 + $0xa9] sm:$0x2] %vm244_vm4, %v486_v52  ;;  %v488_v53 = vpop.permute.xlu1 %487  ;;  %245 = vst.msk [vmem:[#allocation4 + $0x1] sm:$0x2] %vm244_vm4, %v228_v54  ;;  %vm366_vm4 = vcmask 177320  }
  0xc8   : > { %493 = vst.msk [vmem:[#allocation4 + $0xb3] sm:$0xff] %vm233_vm1, %v488_v53  ;;  %234 = vst.msk [vmem:[#allocation4 + $0x3] sm:$0xff] %vm233_vm1, %v228_v54 }
  0xc9   : > { %495 = vst.msk [vmem:[#allocation4 + $0xb5] sm:$0x40] %vm238_vm5, %v488_v53 }
  0xca   : > { %497 = vst.msk [vmem:[#allocation4 + $0xb7] sm:$0x20] %vm242_vm6, %v488_v53  ;;  %v230_v55 = vpop.permute.xlu0 %229 }
  0xcb   : > { %499 = vst.msk [vmem:[#allocation4 + $0xb9] sm:$0x10] %vm246_vm7, %v488_v53  ;;  %247 = vst.msk [vmem:[#allocation4 + $0x11] sm:$0x10] %vm246_vm7, %v230_v55 }
  0xcc   : > { %237 = vst.msk [vmem:[#allocation4 - $0x3] sm:$0x8] %vm236_vm2, %v228_v54  ;;  %vm346_vm2 = vcmask 21520  }
  0xcd   : > { %241 = vst.msk [vmem:[#allocation4 - $0x1] sm:$0x4] %vm240_vm3, %v228_v54  ;;  %vm363_vm3 = vcmask 179368  }
  0xce   : > { %v500_v56 = vld [vmem:[#allocation4 + $0xa8] sm:$0xff]  ;;  %235 = vst.msk [vmem:[#allocation4 + $0xb] sm:$0xff] %vm233_vm1, %v230_v55  ;;  %vm343_vm1 = vcmask 23568  }
  0xcf   : > { %239 = vst.msk [vmem:[#allocation4 + $0xd] sm:$0x40] %vm238_vm5, %v230_v55  ;;  %506 = vrot.lane.b32.xlu0 %v500_v56, %s3396_s29  ;;  %v501_v57 = vld [vmem:[#allocation4 + $0xb0] sm:$0xff]  ;;  %vm386_vm5 = vcmask 128000  }
  0xd0   : > { %243 = vst.msk [vmem:[#allocation4 + $0xf] sm:$0x20] %vm242_vm6, %v230_v55  ;;  %508 = vrot.lane.b32.xlu1 %v501_v57, %s3396_s29 }
  0xd2   : > { %v502_v61 = vld [vmem:[#allocation4 + $0xb8] sm:$0x3f] }
  0xd4   : > { %v248_v58 = vld [vmem:[#allocation4] sm:$0xff] }
  0xd5   : > { %254 = vrot.lane.b32.xlu0 %v248_v58, %s3396_s29  ;;  %v249_v60 = vld [vmem:[#allocation4 + $0x8] sm:$0xff] }
  0xd6   : > { %256 = vrot.lane.b32.xlu1 %v249_v60, %s3396_s29 }
  0xd7   : > { %v250_v59 = vld [vmem:[#allocation4 + $0x10] sm:$0x3f] }
  0xd9   : > { %258 = vrot.lane.b32.xlu0 %v250_v59, %s3396_s29 }
  0xda   : > { %510 = vrot.lane.b32.xlu1 %v502_v61, %s3396_s29 }
 0x141   : > { %v507_v62 = vpop.permute.xlu0 %506 }
 0x142   : > { %515 = vst.msk [vmem:[#allocation4 + $0xa8] sm:$0xff] %vm263_vm8, %v507_v62  ;;  %v509_v63 = vpop.permute.xlu1 %508 }
 0x143   : > { %516 = vst.msk [vmem:[#allocation4 + $0xb0] sm:$0xff] %vm263_vm8, %v509_v63  ;;  %v731_v63 = vstv %s2118_s7  ;;  %s2182_s7 = sld [smem:[#allocation6 + $0x5b]] }
 0x147   : > { %v255_v0 = vpop.permute.xlu0 %254 }
 0x148   : > { %264 = vst.msk [vmem:[#allocation4] sm:$0xff] %vm263_vm8, %v255_v0  ;;  %v257_v1 = vpop.permute.xlu1 %256 }
 0x149   : > { %v518_v3 = vld [vmem:[#allocation4 + $0xa8] sm:$0xff]  ;;  %265 = vst.msk [vmem:[#allocation4 + $0x8] sm:$0xff] %vm263_vm8, %v257_v1  ;;  %v727_v1 = vstv %s2120_s8  ;;  %s2185_s8 = sld [smem:[#allocation6 + $0x2a]] }
 0x14a   : > { %524 = vrot.lane.b32.xlu0 %v518_v3, %s1938_s30  ;;  %v519_v5 = vld [vmem:[#allocation4 + $0xb0] sm:$0xff] }
 0x14b   : > { %v259_v2 = vpop.permute.xlu0 %258  ;;  %526 = vrot.lane.b32.xlu1 %v519_v5, %s1938_s30 }
 0x14c   : > { %267 = vst.msk [vmem:[#allocation4 + $0x10] sm:$0x3f] %vm266_vm9, %v259_v2  ;;  %v511_v4 = vpop.permute.xlu1 %510 }
 0x14d   : > { %517 = vst.msk [vmem:[#allocation4 + $0xb8] sm:$0x3f] %vm266_vm9, %v511_v4 }
 0x14f   : > { %v268_v6 = vld [vmem:[#allocation4] sm:$0xff] }
 0x150   : > { %274 = vrot.lane.b32.xlu0 %v268_v6, %s1938_s30  ;;  %v269_v7 = vld [vmem:[#allocation4 + $0x8] sm:$0xff] }
 0x151   : > { %276 = vrot.lane.b32.xlu1 %v269_v7, %s1938_s30 }
 0x153   : > { %v270_v8 = vld [vmem:[#allocation4 + $0x10] sm:$0x3f] }
 0x154   : > { %278 = vrot.lane.b32.xlu0 %v270_v8, %s1938_s30  ;;  %v520_v9 = vld [vmem:[#allocation4 + $0xb8] sm:$0x3f] }
 0x155   : > { %528 = vrot.lane.b32.xlu1 %v520_v9, %s1938_s30  ;;  %s2173_s30 = sld [smem:[#allocation6 + $0x15]] }
 0x1bc   : > { %v525_v10 = vpop.permute.xlu0 %524 }
 0x1bd   : > { %533 = vst.msk [vmem:[#allocation4 + $0xa8] sm:$0xff] %vm283_vm10, %v525_v10  ;;  %v527_v11 = vpop.permute.xlu1 %526 }
 0x1be   : > { %534 = vst.msk [vmem:[#allocation4 + $0xb0] sm:$0xff] %vm283_vm10, %v527_v11 }
 0x1c2   : > { %v275_v12 = vpop.permute.xlu0 %274 }
 0x1c3   : > { %284 = vst.msk [vmem:[#allocation4] sm:$0xff] %vm283_vm10, %v275_v12  ;;  %v277_v13 = vpop.permute.xlu1 %276 }
 0x1c4   : > { %v536_v15 = vld [vmem:[#allocation4 + $0xa8] sm:$0xff]  ;;  %285 = vst.msk [vmem:[#allocation4 + $0x8] sm:$0xff] %vm283_vm10, %v277_v13 }
 0x1c5   : > { %542 = vrot.lane.b32.xlu0 %v536_v15, %s3395_s3  ;;  %v537_v17 = vld [vmem:[#allocation4 + $0xb0] sm:$0xff] }
 0x1c6   : > { %v279_v14 = vpop.permute.xlu0 %278  ;;  %544 = vrot.lane.b32.xlu1 %v537_v17, %s3395_s3 }
 0x1c7   : > { %287 = vst.msk [vmem:[#allocation4 + $0x10] sm:$0x3f] %vm286_vm11, %v279_v14  ;;  %v529_v16 = vpop.permute.xlu1 %528 }
 0x1c8   : > { %535 = vst.msk [vmem:[#allocation4 + $0xb8] sm:$0x3f] %vm286_vm11, %v529_v16 }
 0x1ca   : > { %v288_v18 = vld [vmem:[#allocation4] sm:$0xff] }
 0x1cb   : > { %294 = vrot.lane.b32.xlu0 %v288_v18, %s3395_s3  ;;  %v289_v19 = vld [vmem:[#allocation4 + $0x8] sm:$0xff] }
 0x1cc   : > { %296 = vrot.lane.b32.xlu1 %v289_v19, %s3395_s3 }
 0x1ce   : > { %v290_v20 = vld [vmem:[#allocation4 + $0x10] sm:$0x3f] }
 0x1cf   : > { %298 = vrot.lane.b32.xlu0 %v290_v20, %s3395_s3  ;;  %v538_v21 = vld [vmem:[#allocation4 + $0xb8] sm:$0x3f] }
 0x1d0   : > { %546 = vrot.lane.b32.xlu1 %v538_v21, %s3395_s3 }
 0x237   : > { %v543_v22 = vpop.permute.xlu0 %542 }
 0x238   : > { %551 = vst.msk [vmem:[#allocation4 + $0xa8] sm:$0xff] %vm303_vm12, %v543_v22  ;;  %v545_v23 = vpop.permute.xlu1 %544 }
 0x239   : > { %552 = vst.msk [vmem:[#allocation4 + $0xb0] sm:$0xff] %vm303_vm12, %v545_v23 }
 0x23d   : > { %v295_v24 = vpop.permute.xlu0 %294 }
 0x23e   : > { %304 = vst.msk [vmem:[#allocation4] sm:$0xff] %vm303_vm12, %v295_v24  ;;  %v297_v25 = vpop.permute.xlu1 %296  ;;  %v843_v24 = vstv %s2156_s0  ;;  %s2402_s0 = sld [smem:[#allocation6 + $0x28]] }
 0x23f   : > { %v554_v27 = vld [vmem:[#allocation4 + $0xa8] sm:$0xff]  ;;  %305 = vst.msk [vmem:[#allocation4 + $0x8] sm:$0xff] %vm303_vm12, %v297_v25  ;;  %v955_v25 = vstv %s2159_s18  ;;  %s2330_s18 = sld [smem:[#allocation6 + $0x11]] }
 0x240   : > { %560 = vrot.lane.b32.xlu0 %v554_v27, %s1940_s4  ;;  %v555_v29 = vld [vmem:[#allocation4 + $0xb0] sm:$0xff]  ;;  %v1179_v27 = vstv %s2163_s22  ;;  %s3613_s22 = sld [smem:[#allocation33_spill]] }
 0x241   : > { %v299_v26 = vpop.permute.xlu0 %298  ;;  %562 = vrot.lane.b32.xlu1 %v555_v29, %s1940_s4 }
 0x242   : > { %307 = vst.msk [vmem:[#allocation4 + $0x10] sm:$0x3f] %vm306_vm13, %v299_v26  ;;  %v547_v28 = vpop.permute.xlu1 %546  ;;  %v1067_v26 = vstv %s2161_s20  ;;  %s2336_s20 = sld [smem:[#allocation6 + $0x18]] }
 0x243   : > { %553 = vst.msk [vmem:[#allocation4 + $0xb8] sm:$0x3f] %vm306_vm13, %v547_v28  ;;  %v1291_v28 = vstv %s2166_s27 }
 0x244   : > { %3628 = sst [smem:[#allocation92_spill]] %s2402_s0 }
 0x245   : > { %v308_v30 = vld [vmem:[#allocation4] sm:$0xff]  ;;  %3611 = sst [smem:[#allocation83_spill]] %s2330_s18 }
 0x246   : > { %314 = vrot.lane.b32.xlu0 %v308_v30, %s1940_s4  ;;  %v309_v31 = vld [vmem:[#allocation4 + $0x8] sm:$0xff]  ;;  %s2446_s0 = sld [smem:[#allocation6 + $0x1b]] }
 0x247   : > { %316 = vrot.lane.b32.xlu1 %v309_v31, %s1940_s4  ;;  %v839_v31 = vstv %s2169_s28  ;;  %s3715_s28 = sld [smem:[#allocation38_spill]] }
 0x248   : > { %3612 = sst [smem:[#allocation84_spill]] %s2336_s20 }
 0x249   : > { %v310_v32 = vld [vmem:[#allocation4 + $0x10] sm:$0x3f] }
 0x24a   : > { %318 = vrot.lane.b32.xlu0 %v310_v32, %s1940_s4  ;;  %v556_v33 = vld [vmem:[#allocation4 + $0xb8] sm:$0x3f]  ;;  %v951_v32 = vstv %s2171_s23  ;;  %s2348_s23 = sld [smem:[#allocation6 + $0x1f]] }
 0x24b   : > { %564 = vrot.lane.b32.xlu1 %v556_v33, %s1940_s4  ;;  %s2176_s4 = sld [smem:[#allocation6 + $0x1c]] }
 0x24c   : > { %3648 = sst [smem:[#allocation103_spill]] %s2446_s0 }
 0x24d   : > { %s2461_s0 = sld [smem:[#allocation6 + $0x29]] }
 0x250   : > { %3614 = sst [smem:[#allocation85_spill]] %s2348_s23 }
 0x251   : > { %s2478_s23 = sld [smem:[#allocation6 + $0x5f]] }
 0x253   : > { %3658 = sst [smem:[#allocation107_spill]] %s2461_s0 }
 0x254   : > { %s3667_s0 = sld [smem:[#allocation61_spill]] }
 0x257   : > { %3670 = sst [smem:[#allocation61_spill]] %s2478_s23 }
 0x258   : > { %s2492_s23 = sld [smem:[#allocation6 + $0x61]] }
 0x259   : > { %s3701_s27 = sld [smem:[#allocation61_spill]] }
 0x2b2   : > { %v561_v34 = vpop.permute.xlu0 %560 }
 0x2b3   : > { %569 = vst.msk [vmem:[#allocation4 + $0xa8] sm:$0xff] %vm323_vm14, %v561_v34  ;;  %v563_v35 = vpop.permute.xlu1 %562 }
 0x2b4   : > { %570 = vst.msk [vmem:[#allocation4 + $0xb0] sm:$0xff] %vm323_vm14, %v563_v35 }
 0x2b8   : > { %v315_v36 = vpop.permute.xlu0 %314 }
 0x2b9   : > { %324 = vst.msk [vmem:[#allocation4] sm:$0xff] %vm323_vm14, %v315_v36  ;;  %v317_v37 = vpop.permute.xlu1 %316  ;;  %v1063_v36 = vstv %s2173_s30  ;;  %s3719_s30 = sld [smem:[#allocation40_spill]] }
 0x2ba   : > { %v572_v39 = vld [vmem:[#allocation4 + $0xa8] sm:$0xff]  ;;  %325 = vst.msk [vmem:[#allocation4 + $0x8] sm:$0xff] %vm323_vm14, %v317_v37  ;;  %v1175_v37 = vstv %s2176_s4  ;;  %s2416_s4 = sld [smem:[#allocation6 + $0x6]] }
 0x2bb   : > { %578 = vrot.lane.b32.xlu0 %v572_v39, %s3398_s5  ;;  %v573_v41 = vld [vmem:[#allocation4 + $0xb0] sm:$0xff]  ;;  %v1403_v39 = vstv %s2182_s7  ;;  %s2423_s7 = sld [smem:[#allocation6 + $0xd]] }
 0x2bc   : > { %v319_v38 = vpop.permute.xlu0 %318  ;;  %580 = vrot.lane.b32.xlu1 %v573_v41, %s3398_s5 }
 0x2bd   : > { %327 = vst.msk [vmem:[#allocation4 + $0x10] sm:$0x3f] %vm326_vm15, %v319_v38  ;;  %v565_v40 = vpop.permute.xlu1 %564 }
 0x2be   : > { %571 = vst.msk [vmem:[#allocation4 + $0xb8] sm:$0x3f] %vm326_vm15, %v565_v40 }
 0x2c0   : > { %v328_v42 = vld [vmem:[#allocation4] sm:$0xff]  ;;  %3633 = sst [smem:[#allocation94_spill]] %s2416_s4 }
 0x2c1   : > { %334 = vrot.lane.b32.xlu0 %v328_v42, %s3398_s5  ;;  %v329_v43 = vld [vmem:[#allocation4 + $0x8] sm:$0xff]  ;;  %3636 = sst [smem:[#allocation97_spill]] %s2423_s7 }
 0x2c2   : > { %336 = vrot.lane.b32.xlu1 %v329_v43, %s3398_s5  ;;  %s2511_s7 = sld [smem:[#allocation6 + $0x2f]] }
 0x2c3   : > { %s3707_s4 = sld [smem:[#allocation30_spill]] }
 0x2c4   : > { %v330_v44 = vld [vmem:[#allocation4 + $0x10] sm:$0x3f] }
 0x2c5   : > { %338 = vrot.lane.b32.xlu0 %v330_v44, %s3398_s5  ;;  %v574_v45 = vld [vmem:[#allocation4 + $0xb8] sm:$0x3f] }
 0x2c6   : > { %582 = vrot.lane.b32.xlu1 %v574_v45, %s3398_s5  ;;  %v1399_v45 = vstv %s2185_s8 }
 0x2c8   : > { %3685 = sst [smem:[#allocation111_spill]] %s2511_s7 }
 0x2c9   : > { %s3735_s7 = sld [smem:[#allocation52_spill]] }
 0x32d   : > { %v579_v46 = vpop.permute.xlu0 %578 }
 0x32e   : > { %587 = vst.msk [vmem:[#allocation4 + $0xa8] sm:$0xff] %vm343_vm1, %v579_v46  ;;  %v581_v47 = vpop.permute.xlu1 %580 }
 0x32f   : > { %588 = vst.msk [vmem:[#allocation4 + $0xb0] sm:$0xff] %vm343_vm1, %v581_v47 }
 0x333   : > { %v335_v48 = vpop.permute.xlu0 %334 }
 0x334   : > { %344 = vst.msk [vmem:[#allocation4] sm:$0xff] %vm343_vm1, %v335_v48  ;;  %v337_v49 = vpop.permute.xlu1 %336 }
 0x335   : > { %v590_v51 = vld [vmem:[#allocation4 + $0xa8] sm:$0xff]  ;;  %345 = vst.msk [vmem:[#allocation4 + $0x8] sm:$0xff] %vm343_vm1, %v337_v49 }
 0x336   : > { %596 = vrot.lane.b32.xlu0 %v590_v51, %s1942_s6  ;;  %v591_v53 = vld [vmem:[#allocation4 + $0xb0] sm:$0xff]  ;;  %v3510_v51 = vstv %s2200_s19  ;;  %s3618_s19 = sld [smem:[#allocation36_spill]] }
 0x337   : > { %v339_v50 = vpop.permute.xlu0 %338  ;;  %598 = vrot.lane.b32.xlu1 %v591_v53, %s1942_s6 }
 0x338   : > { %347 = vst.msk [vmem:[#allocation4 + $0x10] sm:$0x3f] %vm346_vm2, %v339_v50  ;;  %v583_v52 = vpop.permute.xlu1 %582 }
 0x339   : > { %589 = vst.msk [vmem:[#allocation4 + $0xb8] sm:$0x3f] %vm346_vm2, %v583_v52 }
 0x33b   : > { %v348_v54 = vld [vmem:[#allocation4] sm:$0xff] }
 0x33c   : > { %354 = vrot.lane.b32.xlu0 %v348_v54, %s1942_s6  ;;  %v349_v57 = vld [vmem:[#allocation4 + $0x8] sm:$0xff] }
 0x33f   : > { %v350_v55 = vld [vmem:[#allocation4 + $0x10] sm:$0x3f] }
 0x340   : > { %358 = vrot.lane.b32.xlu0 %v350_v55, %s1942_s6  ;;  %v592_v56 = vld [vmem:[#allocation4 + $0xb8] sm:$0x3f] }
 0x341   : > { %600 = vrot.lane.b32.xlu1 %v592_v56, %s1942_s6 }
 0x345   : > { %356 = vrot.lane.b32.xlu1 %v349_v57, %s1942_s6  ;;  %s2180_s6 = sld [smem:[#allocation6 + $0x23]]  ;;  %v3511_v57 = vstv %s2202_s16 }
 0x34b   : > { %v1287_v38 = vstv %s2180_s6  ;;  %s2498_s6 = sld [smem:[#allocation6 + $0x2e]] }
 0x3a8   : > { %v597_v58 = vpop.permute.xlu0 %596 }
 0x3a9   : > { %605 = vst.msk [vmem:[#allocation4 + $0xa8] sm:$0xff] %vm363_vm3, %v597_v58  ;;  %v599_v59 = vpop.permute.xlu1 %598 }
 0x3aa   : > { %606 = vst.msk [vmem:[#allocation4 + $0xb0] sm:$0xff] %vm363_vm3, %v599_v59 }
 0x3ae   : > { %v355_v60 = vpop.permute.xlu0 %354 }
 0x3af   : > { %364 = vst.msk [vmem:[#allocation4] sm:$0xff] %vm363_vm3, %v355_v60 }
 0x3b0   : > { %v724_v61 = vld [vmem:[#allocation4 + $0xa8] sm:$0xff] }
 0x3b1   : > { %671 = vrot.lane.b32.xlu0 %v724_v61, %s3395_s3  ;;  %v725_v0 = vld [vmem:[#allocation4 + $0xb0] sm:$0xff]  ;;  %v732_v4 = vmul.f32 %v731_v63, %v724_v61 }
 0x3b2   : > { %v359_v62 = vpop.permute.xlu0 %358  ;;  %673 = vrot.lane.b32.xlu1 %v725_v0, %s3395_s3  ;;  %v733_v10 = vmul.f32 %v731_v63, %v725_v0  ;;  %v836_v29 = vld [vmem:[#allocation4 + $0xa9] sm:$0xff]  ;;  %v971_v63 = vstv %s3613_s22  ;;  %s2373_s22 = sld [smem:[#allocation6 + $0xc]] }
 0x3b3   : > { %367 = vst.msk [vmem:[#allocation4 + $0x10] sm:$0x3f] %vm366_vm4, %v359_v62  ;;  %v601_v2 = vpop.permute.xlu1 %600  ;;  %v948_v30 = vld [vmem:[#allocation4 + $0xaa] sm:$0xff]  ;;  %v2341_v46 = vmul.f32 %v843_v24, %v836_v29  ;;  %v859_v62 = vstv %s2207_s14  ;;  %s3621_s14 = sld [smem:[#allocation38_spill]] }
 0x3b4   : > { %607 = vst.msk [vmem:[#allocation4 + $0xb8] sm:$0x3f] %vm366_vm4, %v601_v2  ;;  %v1060_v33 = vld [vmem:[#allocation4 + $0xab] sm:$0xff]  ;;  %v2343_v47 = vmul.f32 %v955_v25, %v948_v30 }
 0x3b5   : > { %616 = vrot.lane.b32.xlu0 %v725_v0, %s1943_s9  ;;  %v1172_v34 = vld [vmem:[#allocation4 + $0xac] sm:$0xff]  ;;  %v2350_v52 = vmul.f32 %v1067_v26, %v1060_v33 }
 0x3b6   : > { %v2129_v3 = vld [vmem:[#allocation4] sm:$0xff]  ;;  %614 = vrot.lane.b32.xlu1 %v724_v61, %s1943_s9  ;;  %v1284_v35 = vld [vmem:[#allocation4 + $0xad] sm:$0xff]  ;;  %v2352_v53 = vmul.f32 %v1179_v27, %v1172_v34 }
 0x3b7   : > { %v728_v5 = vmul.f32 %v727_v1, %v2129_v3  ;;  %v357_v6 = vpop.permute.xlu1 %356  ;;  %v1396_v44 = vld [vmem:[#allocation4 + $0xae] sm:$0xff]  ;;  %v2356_v54 = vmul.f32 %v1291_v28, %v1284_v35 }
 0x3b8   : > { %365 = vst.msk [vmem:[#allocation4 + $0x8] sm:$0xff] %vm363_vm3, %v357_v6  ;;  %3622 = sst [smem:[#allocation88_spill]] %s2373_s22 }
 0x3b9   : > { %633 = vrot.lane.b32.xlu0 %v724_v61, %s3398_s5  ;;  %v2135_v7 = vadd.f32 %v732_v4, %v728_v5  ;;  %s2472_s22 = sld [smem:[#allocation6 + $0x5e]] }
 0x3ba   : > { %v370_v17 = vld [vmem:[#allocation4 + $0x10] sm:$0x3f] }
 0x3bb   : > { %v610_v8 = vld [vmem:[#allocation4 + $0xb8] sm:$0x3f]  ;;  %v390_v18 = vld [vmem:[#allocation4 + $0x10] sm:$0x3f] }
 0x3bc   : > { %618 = vrot.lane.b32.xlu1 %v610_v8, %s1943_s9  ;;  %v629_v13 = vld [vmem:[#allocation4 + $0xb8] sm:$0x3f]  ;;  %v428_v19 = vld [vmem:[#allocation4 + $0x10] sm:$0x3f] }
 0x3bd   : > { %652 = vrot.lane.b32.xlu0 %v724_v61, %s3401_s10  ;;  %v667_v14 = vld [vmem:[#allocation4 + $0xb8] sm:$0x3f]  ;;  %v409_v20 = vld [vmem:[#allocation4 + $0x10] sm:$0x3f] }
 0x3be   : > { %v648_v15 = vld [vmem:[#allocation4 + $0xb8] sm:$0x3f]  ;;  %v466_v21 = vld [vmem:[#allocation4 + $0x10] sm:$0x3f] }
 0x3bf   : > { %v723_v9 = vld [vmem:[#allocation4 + $0x8] sm:$0xff]  ;;  %v686_v16 = vld [vmem:[#allocation4 + $0xb8] sm:$0x3f]  ;;  %v447_v22 = vld [vmem:[#allocation4 + $0x10] sm:$0x3f] }
 0x3c0   : > { %v729_v11 = vmul.f32 %v727_v1, %v723_v9  ;;  %635 = vrot.lane.b32.xlu1 %v725_v0, %s3398_s5  ;;  %v705_v23 = vld [vmem:[#allocation4 + $0xb8] sm:$0x3f]  ;;  %v946_v56 = vld [vmem:[#allocation4 + $0x2] sm:$0xff]  ;;  %v947_v59 = vld [vmem:[#allocation4 + $0xa] sm:$0xff]  ;;  %v2368_v1 = vmul.f32 %v1403_v39, %v1396_v44 }
 0x3c1   : > { %690 = vrot.lane.b32.xlu0 %v724_v61, %s3406_s11  ;;  %v949_v48 = vld [vmem:[#allocation4 + $0xb2] sm:$0xff]  ;;  %v1058_v60 = vld [vmem:[#allocation4 + $0x3] sm:$0xff] }
 0x3c2   : > { %v2141_v12 = vadd.f32 %v733_v10, %v729_v11  ;;  %v1061_v49 = vld [vmem:[#allocation4 + $0xb3] sm:$0xff]  ;;  %v957_v2 = vmul.f32 %v955_v25, %v949_v48  ;;  %v1170_v4 = vld [vmem:[#allocation4 + $0x4] sm:$0xff]  ;;  %v3515_v11 = vstv %s3618_s19  ;;  %s3624_s19 = sld [smem:[#allocation39_spill]]  ;;  %v3524_v25 = vstv %s3621_s14 }
 0x3c3   : > { %v1173_v55 = vld [vmem:[#allocation4 + $0xb4] sm:$0xff]  ;;  %v1171_v5 = vld [vmem:[#allocation4 + $0xc] sm:$0xff]  ;;  %v1176_v29 = vmul.f32 %v1175_v37, %v1170_v4  ;;  %s2437_s14 = sld [smem:[#allocation6 + $0x14]] }
 0x3c4   : > { %654 = vrot.lane.b32.xlu1 %v725_v0, %s3401_s10  ;;  %v837_v58 = vld [vmem:[#allocation4 + $0xb1] sm:$0xff]  ;;  %v1177_v30 = vmul.f32 %v1175_v37, %v1171_v5  ;;  %v1394_v33 = vld [vmem:[#allocation4 + $0x6] sm:$0xff] }
 0x3c5   : > { %709 = vrot.lane.b32.xlu0 %v724_v61, %s3396_s29  ;;  %v747_v61 = vstv %s2204_s25  ;;  %v1395_v34 = vld [vmem:[#allocation4 + $0xe] sm:$0xff]  ;;  %s2504_s25 = sld [smem:[#allocation6 + $0x2d]] }
 0x3c8   : > { %692 = vrot.lane.b32.xlu1 %v725_v0, %s3406_s11  ;;  %v3521_v44 = vstv %s3624_s19  ;;  %s3659_s19 = sld [smem:[#allocation56_spill]] }
 0x3c9   : > { %637 = vrot.lane.b32.xlu0 %v629_v13, %s3398_s5  ;;  %v1069_v13 = vmul.f32 %v1067_v26, %v1061_v49  ;;  %v845_v26 = vmul.f32 %v843_v24, %v837_v58  ;;  %v2432_v58 = vadd.f32 %v2352_v53, %v1176_v29  ;;  %3643 = sst [smem:[#allocation101_spill]] %s2437_s14 }
 0x3ca   : > { %3664 = sst [smem:[#allocation56_spill]] %s2472_s22 }
 0x3cb   : > { %3640 = vst [vmem:[#allocation99_spill] sm:$0xff] %v2432_v58  ;;  %s2485_s22 = sld [smem:[#allocation6 + $0x60]] }
 0x3cc   : > { %711 = vrot.lane.b32.xlu1 %v725_v0, %s3396_s29  ;;  %s2193_s29 = sld [smem:[#allocation6 + $0x43]]  ;;  %v1285_v0 = vld [vmem:[#allocation4 + $0xb5] sm:$0xff] }
 0x3cd   : > { %675 = vrot.lane.b32.xlu0 %v667_v14, %s3395_s3  ;;  %v1181_v14 = vmul.f32 %v1179_v27, %v1173_v55  ;;  %3683 = sst [smem:[#allocation110_spill]] %s2504_s25 }
 0x3ce   : > { %s2518_s14 = sld [smem:[#allocation6 + $0x30]] }
 0x3cf   : > { %s3700_s18 = sld [smem:[#allocation56_spill]] }
 0x3d0   : > { %656 = vrot.lane.b32.xlu1 %v648_v15, %s3401_s10  ;;  %v834_v15 = vld [vmem:[#allocation4 + $0x1] sm:$0xff] }
 0x3d1   : > { %432 = vrot.lane.b32.xlu0 %v2129_v3, %s3395_s3  ;;  %v840_v35 = vmul.f32 %v839_v31, %v834_v15 }
 0x3d2   : > { %3550 = sst [smem:[#allocation27_spill]] %s2193_s29  ;;  %v3512_v43 = vstv %s2193_s29 }
 0x3d3   : > { %s2359_s29 = sld [smem:[#allocation6 + $0x26]] }
 0x3d4   : > { %694 = vrot.lane.b32.xlu1 %v686_v16, %s3406_s11  ;;  %v835_v16 = vld [vmem:[#allocation4 + $0x9] sm:$0xff]  ;;  %3687 = sst [smem:[#allocation112_spill]] %s2518_s14 }
 0x3d5   : > { %374 = vrot.lane.b32.xlu0 %v2129_v3, %s1943_s9  ;;  %v841_v24 = vmul.f32 %v839_v31, %v835_v16  ;;  %s3704_s20 = sld [smem:[#allocation27_spill]] }
 0x3d8   : > { %434 = vrot.lane.b32.xlu1 %v723_v9, %s3395_s3  ;;  %s2191_s3 = sld [smem:[#allocation6 + $0x3c]] }
 0x3d9   : > { %378 = vrot.lane.b32.xlu0 %v370_v17, %s1943_s9  ;;  %3615 = sst [smem:[#allocation86_spill]] %s2359_s29  ;;  %v952_v17 = vmul.f32 %v951_v32, %v946_v56 }
 0x3db   : > { %v2407_v48 = vadd.f32 %v2343_v47, %v952_v17  ;;  %v1400_v47 = vmul.f32 %v1399_v45, %v1394_v33 }
 0x3dc   : > { %376 = vrot.lane.b32.xlu1 %v723_v9, %s1943_s9  ;;  %s2189_s9 = sld [smem:[#allocation6 + $0x35]] }
 0x3dd   : > { %396 = vrot.lane.b32.xlu0 %v723_v9, %s3398_s5  ;;  %3630 = vst [vmem:[#allocation93_spill] sm:$0xff] %v2407_v48 }
 0x3de   : > { %3549 = sst [smem:[#allocation26_spill]] %s2191_s3  ;;  %v3513_v42 = vstv %s2191_s3 }
 0x3df   : > { %s3616_s3 = sld [smem:[#allocation34_spill]] }
 0x3e0   : > { %394 = vrot.lane.b32.xlu1 %v2129_v3, %s3398_s5  ;;  %s2196_s5 = sld [smem:[#allocation6 + $0x4a]] }
 0x3e1   : > { %415 = vrot.lane.b32.xlu0 %v723_v9, %s3401_s10  ;;  %s3703_s17 = sld [smem:[#allocation26_spill]] }
 0x3e2   : > { %3548 = sst [smem:[#allocation25_spill]] %s2189_s9  ;;  %v795_v40 = vstv %s2189_s9 }
 0x3e3   : > { %s2364_s9 = sld [smem:[#allocation6 + $0x5]] }
 0x3e4   : > { %413 = vrot.lane.b32.xlu1 %v2129_v3, %s3401_s10  ;;  %s3556_s10 = smov 126  }
 0x3e5   : > { %453 = vrot.lane.b32.xlu0 %v723_v9, %s3406_s11 }
 0x3e6   : > { %3552 = sst [smem:[#allocation28_spill]] %s2196_s5  ;;  %v3507_v50 = vstv %s2196_s5 }
 0x3e7   : > { %s3705_s12 = sld [smem:[#allocation28_spill]] }
 0x3e8   : > { %451 = vrot.lane.b32.xlu1 %v2129_v3, %s3406_s11  ;;  %s2215_s11 = sld [smem:[#allocation6 + $0x4e]] }
 0x3e9   : > { %472 = vrot.lane.b32.xlu0 %v723_v9, %s3551_s1  ;;  %3619 = sst [smem:[#allocation87_spill]] %s2364_s9  ;;  %v1083_v9 = vstv %s3616_s3 }
 0x3ea   : > { %s2385_s3 = sld [smem:[#allocation6 + $0x1a]] }
 0x3eb   : > { %s3668_s9 = sld [smem:[#allocation62_spill]] }
 0x3ec   : > { %470 = vrot.lane.b32.xlu1 %v2129_v3, %s3551_s1  ;;  %v1059_v3 = vld [vmem:[#allocation4 + $0xb] sm:$0xff]  ;;  %3679 = sst [smem:[#allocation62_spill]] %s2492_s23 }
 0x3ed   : > { %398 = vrot.lane.b32.xlu0 %v390_v18, %s3556_s10  ;;  %s2221_s10 = sld [smem:[#allocation6 + $0x5c]]  ;;  %v1065_v27 = vmul.f32 %v1063_v36, %v1059_v3  ;;  %v2441_v3 = vadd.f32 %v845_v26, %v841_v24 }
 0x3ee   : > { %3560 = sst [smem:[#allocation35_spill]] %s2215_s11  ;;  %s3568_s11 = smov 123  }
 0x3ef   : > { %s3617_s5 = sld [smem:[#allocation35_spill]]  ;;  %v2429_v56 = vadd.f32 %v1069_v13, %v1065_v27 }
 0x3f0   : > { %417 = vrot.lane.b32.xlu1 %v409_v20, %s3563_s2  ;;  %s2237_s2 = sld [smem:[#allocation6 + $0x56]]  ;;  %v953_v20 = vmul.f32 %v951_v32, %v947_v59  ;;  %v1293_v32 = vmul.f32 %v1291_v28, %v1285_v0  ;;  %v2434_v59 = vadd.f32 %v1181_v14, %v1177_v30  ;;  %v2464_v14 = vadd.f32 %v2368_v1, %v1400_v47 }
 0x3f1   : > { %436 = vrot.lane.b32.xlu0 %v428_v19, %s3561_s26  ;;  %s2233_s26 = sld [smem:[#allocation6 + $0x48]]  ;;  %v1397_v19 = vld [vmem:[#allocation4 + $0xb6] sm:$0xff]  ;;  %3639 = vst [vmem:[#allocation98_spill] sm:$0xff] %v2429_v56 }
 0x3f2   : > { %3625 = sst [smem:[#allocation90_spill]] %s2385_s3  ;;  %v1405_v37 = vmul.f32 %v1403_v39, %v1397_v19  ;;  %v2418_v55 = vadd.f32 %v957_v2, %v953_v20  ;;  %3641 = vst [vmem:[#allocation100_spill] sm:$0xff] %v2434_v59  ;;  %3660 = vst [vmem:[#allocation108_spill] sm:$0xff] %v2464_v14  ;;  %v3514_v19 = vstv %s3701_s27 }
 0x3f3   : > { %3564 = sst [smem:[#allocation37_spill]] %s2221_s10 }
 0x3f4   : > { %455 = vrot.lane.b32.xlu1 %v447_v22, %s3568_s11  ;;  %s2244_s10 = sld [smem:[#allocation6 + $0x3b]]  ;;  %v1282_v22 = vld [vmem:[#allocation4 + $0x5] sm:$0xff]  ;;  %3634 = vst [vmem:[#allocation95_spill] sm:$0xff] %v2418_v55 }
 0x3f5   : > { %474 = vrot.lane.b32.xlu0 %v466_v21, %s3551_s1  ;;  %s2248_s11 = sld [smem:[#allocation6 + $0x49]]  ;;  %v3516_v10 = vstv %s3617_s5  ;;  %v1064_v21 = vmul.f32 %v1063_v36, %v1058_v60  ;;  %v1288_v28 = vmul.f32 %v1287_v38, %v1282_v22 }
 0x3f6   : > { %3572 = sst [smem:[#allocation44_spill]] %s2237_s2 }
 0x3f7   : > { %3570 = sst [smem:[#allocation42_spill]] %s2233_s26  ;;  %v2421_v39 = vadd.f32 %v2350_v52, %v1064_v21 }
 0x3f8   : > { %713 = vrot.lane.b32.xlu1 %v705_v23, %s3551_s1  ;;  %s2252_s26 = sld [smem:[#allocation6 + $0x57]]  ;;  %v1283_v23 = vld [vmem:[#allocation4 + $0xd] sm:$0xff] }
 0x3f9   : > { %s2258_s2 = sld [smem:[#allocation6 + $0x44]]  ;;  %v1289_v49 = vmul.f32 %v1287_v38, %v1283_v23  ;;  %3635 = vst [vmem:[#allocation96_spill] sm:$0xff] %v2421_v39  ;;  %v1401_v38 = vmul.f32 %v1399_v45, %v1395_v34  ;;  %v2444_v45 = vadd.f32 %v2341_v46, %v840_v35 }
 0x3fa   : > { %3575 = sst [smem:[#allocation47_spill]] %s2244_s10 }
 0x3fb   : > { %3577 = sst [smem:[#allocation49_spill]] %s2248_s11  ;;  %3646 = vst [vmem:[#allocation102_spill] sm:$0xff] %v2444_v45  ;;  %v2456_v46 = vadd.f32 %v1293_v32, %v1289_v49  ;;  %v2466_v15 = vadd.f32 %v1405_v37, %v1401_v38 }
 0x3fc   : > { %s2260_s1 = sld [smem:[#allocation6 + $0x4b]] }
 0x3fd   : > { %s2266_s10 = sld [smem:[#allocation6 + $0x3e]]  ;;  %3656 = vst [vmem:[#allocation106_spill] sm:$0xff] %v2456_v46  ;;  %3661 = vst [vmem:[#allocation109_spill] sm:$0xff] %v2466_v15 }
 0x3fe   : > { %3579 = sst [smem:[#allocation51_spill]] %s2252_s26 }
 0x3ff   : > { %3582 = sst [smem:[#allocation54_spill]] %s2258_s2 }
 0x400   : > { %s2270_s11 = sld [smem:[#allocation6 + $0x4c]] }
 0x401   : > { %s2274_s26 = sld [smem:[#allocation6 + $0x5a]] }
 0x402   : > { %3583 = sst [smem:[#allocation55_spill]] %s2260_s1 }
 0x403   : > { %3585 = sst [smem:[#allocation57_spill]] %s2266_s10 }
 0x404   : > { %s2280_s2 = sld [smem:[#allocation6 + $0xb]] }
 0x405   : > { %s2282_s1 = sld [smem:[#allocation6 + $0x12]] }
 0x406   : > { %s2286_s10 = sld [smem:[#allocation6 + $0x20]] }
 0x407   : > { %3588 = sst [smem:[#allocation60_spill]] %s2274_s26 }
 0x408   : > { %s2292_s26 = sld [smem:[#allocation6 + $0xf]] }
 0x409   : > { %s3620_s16 = sld [smem:[#allocation37_spill]] }
 0x40a   : > { %3591 = sst [smem:[#allocation63_spill]] %s2280_s2 }
 0x40b   : > { %3592 = sst [smem:[#allocation64_spill]] %s2282_s1 }
 0x40c   : > { %3594 = sst [smem:[#allocation66_spill]] %s2286_s10 }
 0x40d   : > { %s2296_s2 = sld [smem:[#allocation6 + $0x1d]] }
 0x40e   : > { %3597 = sst [smem:[#allocation69_spill]] %s2292_s26 }
 0x40f   : > { %s2298_s1 = sld [smem:[#allocation6 + $0x24]]  ;;  %v3525_v18 = vstv %s3620_s16 }
 0x410   : > { %s2302_s10 = sld [smem:[#allocation6 + $0x2]] }
 0x411   : > { %s2310_s26 = sld [smem:[#allocation6 + $0x1e]] }
 0x412   : > { %s2378_s5 = sld [smem:[#allocation6 + $0x13]] }
 0x413   : > { %3599 = sst [smem:[#allocation71_spill]] %s2296_s2 }
 0x414   : > { %s2314_s2 = sld [smem:[#allocation6 + $0x2c]] }
 0x415   : > { %3600 = sst [smem:[#allocation72_spill]] %s2298_s1 }
 0x416   : > { %3602 = sst [smem:[#allocation74_spill]] %s2302_s10 }
 0x417   : > { %3606 = sst [smem:[#allocation78_spill]] %s2310_s26 }
 0x418   : > { %s2319_s10 = sld [smem:[#allocation6 + $0x3]] }
 0x419   : > { %3623 = sst [smem:[#allocation89_spill]] %s2378_s5 }
 0x41a   : > { %3608 = sst [smem:[#allocation80_spill]] %s2314_s2 }
 0x41b   : > { %s2393_s16 = sld [smem:[#allocation6 + $0x21]] }
 0x41c   : > { %s2451_s3 = sld [smem:[#allocation6 + $0x22]] }
 0x41d   : > { %s3669_s29 = sld [smem:[#allocation63_spill]] }
 0x41e   : > { %3609 = sst [smem:[#allocation81_spill]] %s2319_s10 }
 0x41f   : > { %3681 = sst [smem:[#allocation63_spill]] %s2498_s6 }
 0x420   : > { %s3706_s2 = sld [smem:[#allocation29_spill]] }
 0x421   : > { %3626 = sst [smem:[#allocation91_spill]] %s2393_s16 }
 0x422   : > { %3652 = sst [smem:[#allocation104_spill]] %s2451_s3 }
 0x423   : > { %v672_v41 = vpop.permute.xlu0 %671  ;;  %s3712_s25 = sld [smem:[#allocation35_spill]] }
 0x424   : > { %681 = vst.msk [vmem:[#allocation4 + $0x108] sm:$0xff] %vm162_vm0, %v672_v41  ;;  %v674_v6 = vpop.permute.xlu1 %673  ;;  %s3714_s14 = sld [smem:[#allocation37_spill]] }
 0x425   : > { %682 = vst.msk [vmem:[#allocation4 + $0x110] sm:$0xff] %vm162_vm0, %v674_v6  ;;  %v2454_v6 = vadd.f32 %v2356_v54, %v1288_v28  ;;  %s3716_s5 = sld [smem:[#allocation39_spill]] }
 0x426   : > { %s3720_s16 = sld [smem:[#allocation46_spill]] }
 0x427   : > { %v617_v8 = vpop.permute.xlu0 %616  ;;  %3654 = vst [vmem:[#allocation105_spill] sm:$0xff] %v2454_v6  ;;  %s3721_s1 = sld [smem:[#allocation41_spill]] }
 0x428   : > { %625 = vst.msk [vmem:[#allocation4 + $0xc8] sm:$0xff] %vm162_vm0, %v617_v8  ;;  %v615_v41 = vpop.permute.xlu1 %614  ;;  %s3723_s10 = sld [smem:[#allocation42_spill]] }
 0x429   : > { %624 = vst.msk [vmem:[#allocation4 + $0xc0] sm:$0xff] %vm162_vm0, %v615_v41  ;;  %s3725_s26 = sld [smem:[#allocation43_spill]] }
 0x42a   : > { %s3726_s21 = sld [smem:[#allocation44_spill]]  ;;  %v3727_v15 = vstv %s3714_s14 }
 0x42b   : > { %v634_v36 = vpop.permute.xlu0 %633  ;;  %s3740_s14 = sld [smem:[#allocation48_spill]] }
 0x42c   : > { %643 = vst.msk [vmem:[#allocation4 + $0xd8] sm:$0xff] %vm162_vm0, %v634_v36  ;;  %v789_v36 = vld [vmem:[#allocation4 + $0x110] sm:$0xff]  ;;  %s3744_s6 = sld [smem:[#allocation51_spill]] }
 0x42d   : > { %v900_v38 = vld [vmem:[#allocation4 + $0x109] sm:$0xff]  ;;  %v2557_v17 = vmul.f32 %v795_v40, %v789_v36  ;;  %v3736_v6 = vstv %s3721_s1  ;;  %s3756_s3 = sld [smem:[#allocation54_spill]] }
 0x42e   : > { %v619_v53 = vpop.permute.xlu1 %618  ;;  %v1012_v35 = vld [vmem:[#allocation4 + $0x10a] sm:$0xff]  ;;  %v2561_v5 = vmul.f32 %v3513_v42, %v900_v38  ;;  %s3765_s8 = sld [smem:[#allocation55_spill]] }
 0x42f   : > { %v653_v52 = vpop.permute.xlu0 %652  ;;  %626 = vst.msk [vmem:[#allocation4 + $0xd0] sm:$0x3f] %vm386_vm5, %v619_v53  ;;  %v1124_v34 = vld [vmem:[#allocation4 + $0x10b] sm:$0xff]  ;;  %v2567_v21 = vmul.f32 %v3512_v43, %v1012_v35 }
 0x430   : > { %662 = vst.msk [vmem:[#allocation4 + $0xf0] sm:$0xff] %vm162_vm0, %v653_v52  ;;  %v788_v52 = vld [vmem:[#allocation4 + $0x108] sm:$0xff] }
 0x431   : > { %v1348_v41 = vld [vmem:[#allocation4 + $0x10d] sm:$0xff]  ;;  %v964_v1 = vld [vmem:[#allocation4 + $0xc2] sm:$0xff]  ;;  %v2553_v22 = vmul.f32 %v795_v40, %v788_v52  ;;  %v2571_v40 = vmul.f32 %v3507_v50, %v1124_v34 }
 0x432   : > { %v636_v26 = vpop.permute.xlu1 %635  ;;  %v1460_v28 = vld [vmem:[#allocation4 + $0x10e] sm:$0xff]  ;;  %v1188_v32 = vld [vmem:[#allocation4 + $0xc4] sm:$0xff]  ;;  %v2579_v38 = vmul.f32 %v3511_v57, %v1348_v41 }
 0x433   : > { %v691_v20 = vpop.permute.xlu0 %690  ;;  %644 = vst.msk [vmem:[#allocation4 + $0xe0] sm:$0xff] %vm162_vm0, %v636_v26  ;;  %v741_v37 = vld [vmem:[#allocation4 + $0xc8] sm:$0xff]  ;;  %v756_v27 = vld [vmem:[#allocation4 + $0xd8] sm:$0xff]  ;;  %v2595_v42 = vmul.f32 %v3514_v19, %v1460_v28 }
 0x434   : > { %700 = vst.msk [vmem:[#allocation4 + $0x120] sm:$0xff] %vm162_vm0, %v691_v20  ;;  %v852_v26 = vld [vmem:[#allocation4 + $0xc1] sm:$0xff]  ;;  %v2583_v35 = vmul.f32 %v747_v61, %v741_v37  ;;  %v2599_v37 = vmul.f32 %v971_v63, %v964_v1 }
 0x435   : > { %v1300_v30 = vld [vmem:[#allocation4 + $0xc5] sm:$0xff]  ;;  %v2591_v50 = vmul.f32 %v859_v62, %v852_v26  ;;  %3717 = vst [vmem:[#allocation113_spill] sm:$0xff] %v2595_v42  ;;  %v2607_v26 = vmul.f32 %v3516_v10, %v1188_v32  ;;  %v2620_v32 = vmul.f32 %v3524_v25, %v756_v27 }
 0x436   : > { %v655_v20 = vpop.permute.xlu1 %654  ;;  %v1412_v29 = vld [vmem:[#allocation4 + $0xc6] sm:$0xff]  ;;  %v1413_v52 = vld [vmem:[#allocation4 + $0xce] sm:$0xff] }
 0x437   : > { %v710_v49 = vpop.permute.xlu0 %709  ;;  %663 = vst.msk [vmem:[#allocation4 + $0xf8] sm:$0xff] %vm162_vm0, %v655_v20  ;;  %v1236_v20 = vld [vmem:[#allocation4 + $0x10c] sm:$0xff]  ;;  %v2616_v1 = vmul.f32 %v3525_v18, %v1412_v29 }
 0x438   : > { %719 = vst.msk [vmem:[#allocation4 + $0x138] sm:$0xff] %vm162_vm0, %v710_v49  ;;  %v740_v49 = vld [vmem:[#allocation4 + $0xc0] sm:$0xff]  ;;  %v853_v23 = vld [vmem:[#allocation4 + $0xc9] sm:$0xff]  ;;  %v2575_v36 = vmul.f32 %v3510_v51, %v1236_v20 }
 0x439   : > { %v772_v24 = vld [vmem:[#allocation4 + $0xf0] sm:$0xff]  ;;  %v2587_v34 = vmul.f32 %v747_v61, %v740_v49  ;;  %v2611_v49 = vmul.f32 %v3515_v11, %v1300_v30  ;;  %3718 = vst [vmem:[#allocation114_spill] sm:$0xff] %v2616_v1  ;;  %v2624_v30 = vmul.f32 %v859_v62, %v853_v23  ;;  %v3722_v62 = vstv %s3712_s25  ;;  %s3731_s25 = sld [smem:[#allocation45_spill]] }
 0x43a   : > { %v693_v53 = vpop.permute.xlu1 %692  ;;  %v965_v4 = vld [vmem:[#allocation4 + $0xca] sm:$0xff]  ;;  %v868_v13 = vld [vmem:[#allocation4 + $0xd9] sm:$0xff] }
 0x43b   : > { %v638_v47 = vpop.permute.xlu0 %637  ;;  %701 = vst.msk [vmem:[#allocation4 + $0x128] sm:$0xff] %vm162_vm0, %v693_v53  ;;  %v1076_v53 = vld [vmem:[#allocation4 + $0xc3] sm:$0xff]  ;;  %v1189_v2 = vld [vmem:[#allocation4 + $0xcc] sm:$0xff]  ;;  %v980_v20 = vld [vmem:[#allocation4 + $0xda] sm:$0xff]  ;;  %v2633_v29 = vmul.f32 %v971_v63, %v965_v4  ;;  %v2649_v63 = vmul.f32 %v3727_v15, %v1413_v52  ;;  %v3729_v4 = vstv %s3715_s28  ;;  %v3737_v52 = vstv %s3723_s10  ;;  %s3742_s28 = sld [smem:[#allocation49_spill]] }
 0x43c   : > { %645 = vst.msk [vmem:[#allocation4 + $0xe8] sm:$0x3f] %vm386_vm5, %v638_v47  ;;  %v1301_v54 = vld [vmem:[#allocation4 + $0xcd] sm:$0xff]  ;;  %v804_v33 = vld [vmem:[#allocation4 + $0x120] sm:$0xff]  ;;  %v2603_v61 = vmul.f32 %v1083_v9, %v1076_v53  ;;  %v2628_v53 = vmul.f32 %v3521_v44, %v772_v24  ;;  %v2641_v23 = vmul.f32 %v3722_v62, %v1189_v2  ;;  %v3724_v24 = vstv %s3713_s24  ;;  %s3734_s24 = sld [smem:[#allocation47_spill]] }
 0x43d   : > { %v1092_v51 = vld [vmem:[#allocation4 + $0xdb] sm:$0xff]  ;;  %v2645_v44 = vmul.f32 %v3724_v24, %v1301_v54  ;;  %3728 = vst [vmem:[#allocation115_spill] sm:$0xff] %v2649_v63  ;;  %v3732_v2 = vstv %s3720_s16  ;;  %v2665_v15 = vmul.f32 %v3736_v6, %v980_v20 }
 0x43e   : > { %v712_v16 = vpop.permute.xlu1 %711  ;;  %v1204_v41 = vld [vmem:[#allocation4 + $0xdc] sm:$0xff]  ;;  %v884_v8 = vld [vmem:[#allocation4 + $0xf1] sm:$0xff]  ;;  %v2661_v62 = vmul.f32 %v3732_v2, %v804_v33 }
 0x43f   : > { %v676_v47 = vpop.permute.xlu0 %675  ;;  %720 = vst.msk [vmem:[#allocation4 + $0x140] sm:$0xff] %vm162_vm0, %v712_v16  ;;  %v757_v16 = vld [vmem:[#allocation4 + $0xe0] sm:$0xff]  ;;  %v773_v60 = vld [vmem:[#allocation4 + $0xf8] sm:$0xff]  ;;  %v3745_v6 = vstv %s3731_s25 }
 0x440   : > { %683 = vst.msk [vmem:[#allocation4 + $0x118] sm:$0x3f] %vm386_vm5, %v676_v47  ;;  %v1077_v47 = vld [vmem:[#allocation4 + $0xcb] sm:$0xff]  ;;  %v1316_v57 = vld [vmem:[#allocation4 + $0xdd] sm:$0xff]  ;;  %v1108_v11 = vld [vmem:[#allocation4 + $0xf3] sm:$0xff]  ;;  %v2653_v1 = vmul.f32 %v3729_v4, %v757_v16  ;;  %v2669_v16 = vmul.f32 %v3737_v52, %v1092_v51  ;;  %v3738_v4 = vstv %s3725_s26  ;;  %v3747_v51 = vstv %s3716_s5  ;;  %s3753_s5 = sld [smem:[#allocation53_spill]] }
 0x441   : > { %v1428_v0 = vld [vmem:[#allocation4 + $0xde] sm:$0xff]  ;;  %v996_v31 = vld [vmem:[#allocation4 + $0xf2] sm:$0xff]  ;;  %v2637_v27 = vmul.f32 %v1083_v9, %v1077_v47  ;;  %v3730_v9 = vstv %s3719_s30  ;;  %3733 = vst [vmem:[#allocation116_spill] sm:$0xff] %v2661_v62  ;;  %v2673_v63 = vmul.f32 %v3738_v4, %v1204_v41  ;;  %v2686_v41 = vmul.f32 %v3747_v51, %v773_v60 }
 0x442   : > { %v820_v28 = vld [vmem:[#allocation4 + $0x138] sm:$0xff]  ;;  %v657_v19 = vpop.permute.xlu1 %656  ;;  %v2657_v47 = vmul.f32 %v3730_v9, %v868_v13  ;;  %v805_v54 = vld [vmem:[#allocation4 + $0x128] sm:$0xff]  ;;  %v3739_v13 = vstv %s3726_s21  ;;  %v2682_v20 = vmul.f32 %v3745_v6, %v1428_v0  ;;  %v3748_v52 = vstv %s3734_s24 }
 0x443   : > { %v433_v43 = vpop.permute.xlu0 %432  ;;  %v1220_v10 = vld [vmem:[#allocation4 + $0xf4] sm:$0xff]  ;;  %664 = vst.msk [vmem:[#allocation4 + $0x100] sm:$0x3f] %vm386_vm5, %v657_v19  ;;  %v869_v18 = vld [vmem:[#allocation4 + $0xe1] sm:$0xff]  ;;  %v2677_v9 = vmul.f32 %v3739_v13, %v1316_v57  ;;  %v2690_v57 = vmul.f32 %v3748_v52, %v884_v8  ;;  %v3749_v4 = vstv %s3735_s7  ;;  %v3751_v0 = vstv %s3740_s14 }
 0x444   : > { %442 = vst.msk [vmem:[#allocation4 + $0x60] sm:$0xff] %vm162_vm0, %v433_v43  ;;  %v1332_v43 = vld [vmem:[#allocation4 + $0xf5] sm:$0xff]  ;;  %v981_v42 = vld [vmem:[#allocation4 + $0xe2] sm:$0xff]  ;;  %3746 = vst [vmem:[#allocation118_spill] sm:$0xff] %v2682_v20  ;;  %v2694_v13 = vmul.f32 %v3749_v4, %v820_v28  ;;  %v3752_v60 = vstv %s3742_s28  ;;  %v3755_v8 = vstv %s3743_s13  ;;  %v3758_v28 = vstv %s3744_s6 }
 0x445   : > { %v1444_v25 = vld [vmem:[#allocation4 + $0xf6] sm:$0xff]  ;;  %v1093_v19 = vld [vmem:[#allocation4 + $0xe3] sm:$0xff]  ;;  %3741 = vst [vmem:[#allocation117_spill] sm:$0xff] %v2677_v9  ;;  %v2703_v6 = vmul.f32 %v3752_v60, %v1108_v11  ;;  %v2707_v51 = vmul.f32 %v3755_v8, %v1220_v10  ;;  %v2711_v52 = vmul.f32 %v3758_v28, %v1332_v43  ;;  %v3764_v62 = vstv %s3723_s10  ;;  %s3779_s10 = sld [smem:[#allocation58_spill]] }
 0x446   : > { %v916_v24 = vld [vmem:[#allocation4 + $0x121] sm:$0xff]  ;;  %v695_v56 = vpop.permute.xlu1 %694  ;;  %3750 = vst [vmem:[#allocation119_spill] sm:$0xff] %v2694_v13  ;;  %v2723_v11 = vmul.f32 %v3764_v62, %v1093_v19  ;;  %v932_v10 = vld [vmem:[#allocation4 + $0x139] sm:$0xff]  ;;  %v3767_v28 = vstv %s3700_s18 }
 0x447   : > { %v1028_v14 = vld [vmem:[#allocation4 + $0x122] sm:$0xff]  ;;  %v375_v46 = vpop.permute.xlu0 %374  ;;  %702 = vst.msk [vmem:[#allocation4 + $0x130] sm:$0x3f] %vm386_vm5, %v695_v56  ;;  %3754 = vst [vmem:[#allocation120_spill] sm:$0xff] %v2703_v6  ;;  %v901_v20 = vld [vmem:[#allocation4 + $0x111] sm:$0xff]  ;;  %v3760_v56 = vstv %s3719_s30  ;;  %s3786_s30 = sld [smem:[#allocation59_spill]] }
 0x448   : > { %v1140_v33 = vld [vmem:[#allocation4 + $0x123] sm:$0xff]  ;;  %384 = vst.msk [vmem:[#allocation4 + $0x18] sm:$0xff] %vm162_vm0, %v375_v46  ;;  %v2699_v46 = vmul.f32 %v3751_v0, %v996_v31  ;;  %3757 = vst [vmem:[#allocation121_spill] sm:$0xff] %v2707_v51  ;;  %v1013_v48 = vld [vmem:[#allocation4 + $0x112] sm:$0xff]  ;;  %v2715_v13 = vmul.f32 %v3760_v56, %v869_v18  ;;  %v3762_v31 = vstv %s3721_s1  ;;  %v3769_v51 = vstv %s3720_s16  ;;  %s3776_s16 = sld [smem:[#allocation57_spill]] }
 0x449   : > { %v1252_v2 = vld [vmem:[#allocation4 + $0x124] sm:$0xff]  ;;  %3759 = vst [vmem:[#allocation122_spill] sm:$0xff] %v2711_v52  ;;  %v2719_v0 = vmul.f32 %v3762_v31, %v981_v42  ;;  %3766 = vst [vmem:[#allocation125_spill] sm:$0xff] %v2723_v11  ;;  %v1044_v60 = vld [vmem:[#allocation4 + $0x13a] sm:$0xff]  ;;  %v2727_v52 = vmul.f32 %v3767_v28, %v1444_v25  ;;  %v2731_v18 = vmul.f32 %v3769_v51, %v805_v54  ;;  %v3770_v56 = vstv %s3753_s5  ;;  %s3789_s1 = sld [smem:[#allocation60_spill]] }
 0x44a   : > { %v1364_v59 = vld [vmem:[#allocation4 + $0x125] sm:$0xff]  ;;  %3761 = vst [vmem:[#allocation123_spill] sm:$0xff] %v2715_v13  ;;  %v2735_v42 = vmul.f32 %v3770_v56, %v916_v24  ;;  %v3771_v31 = vstv %s3756_s3  ;;  %v1156_v62 = vld [vmem:[#allocation4 + $0x13b] sm:$0xff]  ;;  %v3772_v13 = vstv %s3667_s0  ;;  %v435_v45 = vpop.permute.xlu1 %434  ;;  %v3773_v25 = vstv %s3765_s8 }
 0x44b   : > { %v1476_v9 = vld [vmem:[#allocation4 + $0x126] sm:$0xff]  ;;  %3763 = vst [vmem:[#allocation124_spill] sm:$0xff] %v2719_v0  ;;  %v379_v8 = vpop.permute.xlu0 %378  ;;  %3768 = vst [vmem:[#allocation126_spill] sm:$0xff] %v2727_v52  ;;  %v2739_v19 = vmul.f32 %v3771_v31, %v1028_v14  ;;  %v1268_v11 = vld [vmem:[#allocation4 + $0x13c] sm:$0xff]  ;;  %v2746_v54 = vmul.f32 %v3773_v25, %v1140_v33  ;;  %v3775_v24 = vstv %s3659_s19  ;;  %v3778_v14 = vstv %s2264_s15 }
 0x44c   : > { %v1205_v58 = vld [vmem:[#allocation4 + $0xe4] sm:$0xff]  ;;  %387 = vst.msk [vmem:[#allocation4 + $0x28] sm:$0x3f] %vm386_vm5, %v379_v8  ;;  %v2750_v51 = vmul.f32 %v3775_v24, %v1252_v2  ;;  %v2754_v28 = vmul.f32 %v3778_v14, %v1364_v59  ;;  %v3781_v56 = vstv %s3725_s26  ;;  %v1237_v52 = vld [vmem:[#allocation4 + $0x114] sm:$0xff]  ;;  %v3783_v8 = vstv %s3726_s21  ;;  %s3831_s21 = sld [smem:[#allocation66_spill]] }
 0x44d   : > { %v1317_v39 = vld [vmem:[#allocation4 + $0xe5] sm:$0xff]  ;;  %v1380_v0 = vld [vmem:[#allocation4 + $0x13d] sm:$0xff]  ;;  %3774 = vst [vmem:[#allocation127_spill] sm:$0xff] %v2746_v54  ;;  %v2758_v31 = vmul.f32 %v3781_v56, %v1205_v58  ;;  %443 = vst.msk [vmem:[#allocation4 + $0x68] sm:$0xff] %vm162_vm0, %v435_v45  ;;  %v3785_v25 = vstv %s3731_s25  ;;  %v3788_v24 = vstv %s3703_s17  ;;  %s3829_s17 = sld [smem:[#allocation65_spill]] }
 0x44e   : > { %v1429_v55 = vld [vmem:[#allocation4 + $0xe6] sm:$0xff]  ;;  %3777 = vst [vmem:[#allocation128_spill] sm:$0xff] %v2750_v51  ;;  %3780 = vst [vmem:[#allocation129_spill] sm:$0xff] %v2754_v28  ;;  %v2763_v33 = vmul.f32 %v3783_v8, %v1317_v39  ;;  %v2771_v59 = vmul.f32 %v3788_v24, %v901_v20  ;;  %v1349_v14 = vld [vmem:[#allocation4 + $0x115] sm:$0xff]  ;;  %v3791_v28 = vstv %s2485_s22  ;;  %v3793_v51 = vstv %s3735_s7  ;;  %s3832_s26 = sld [smem:[#allocation67_spill]] }
 0x44f   : > { %v821_v4 = vld [vmem:[#allocation4 + $0x140] sm:$0xff]  ;;  %3782 = vst [vmem:[#allocation130_spill] sm:$0xff] %v2758_v31  ;;  %v2767_v2 = vmul.f32 %v3785_v25, %v1429_v55  ;;  %v1461_v58 = vld [vmem:[#allocation4 + $0x116] sm:$0xff]  ;;  %v2775_v31 = vmul.f32 %v3791_v28, %v1476_v9  ;;  %v3794_v54 = vstv %s3776_s16  ;;  %v3795_v8 = vstv %s3779_s10  ;;  %v397_v9 = vpop.permute.xlu0 %396  ;;  %s3881_s25 = sld [smem:[#allocation81_spill]] }
 0x450   : > { %v786_v43 = vld [vmem:[#allocation4 + $0x60] sm:$0xff]  ;;  %3784 = vst [vmem:[#allocation131_spill] sm:$0xff] %v2763_v33  ;;  %3790 = vst [vmem:[#allocation133_spill] sm:$0xff] %v2771_v59  ;;  %v2779_v45 = vmul.f32 %v3793_v51, %v821_v4  ;;  %v2783_v39 = vmul.f32 %v3794_v54, %v932_v10  ;;  %v2787_v55 = vmul.f32 %v3795_v8, %v1044_v60  ;;  %v3796_v25 = vstv %s3704_s20  ;;  %s3858_s20 = sld [smem:[#allocation71_spill]] }
 0x451   : > { %v792_v6 = vmul.f32 %v3772_v13, %v786_v43  ;;  %v1492_v13 = vld [vmem:[#allocation4 + $0x13e] sm:$0xff]  ;;  %v1125_v43 = vld [vmem:[#allocation4 + $0x113] sm:$0xff]  ;;  %3787 = vst [vmem:[#allocation132_spill] sm:$0xff] %v2767_v2  ;;  %3792 = vst [vmem:[#allocation134_spill] sm:$0xff] %v2775_v31  ;;  %v2791_v20 = vmul.f32 %v3796_v25, %v1013_v48  ;;  %v3798_v28 = vstv %s2270_s11  ;;  %v3800_v4 = vstv %s3786_s30  ;;  %s3884_s7 = sld [smem:[#allocation83_spill]] }
 0x452   : > { %v885_v56 = vld [vmem:[#allocation4 + $0xf9] sm:$0xff]  ;;  %v2795_v31 = vmul.f32 %v3798_v28, %v1156_v62  ;;  %v2799_v10 = vmul.f32 %v3800_v4, %v1268_v11  ;;  %v3802_v54 = vstv %s3789_s1  ;;  %405 = vst.msk [vmem:[#allocation4 + $0x38] sm:$0xff] %vm162_vm0, %v397_v9  ;;  %v3804_v62 = vstv %s3705_s12  ;;  %s3821_s12 = sld [smem:[#allocation64_spill]] }
 0x453   : > { %3797 = vst [vmem:[#allocation135_spill] sm:$0xff] %v2791_v20  ;;  %v997_v24 = vld [vmem:[#allocation4 + $0xfa] sm:$0xff]  ;;  %v2803_v60 = vmul.f32 %v3802_v54, %v1380_v0  ;;  %v798_v8 = vadd.f32 %v2553_v22, %v792_v6  ;;  %v377_v20 = vpop.permute.xlu1 %376  ;;  %v2809_v11 = vmul.f32 %v3804_v62, %v1125_v43  ;;  %v3806_v28 = vstv %s3706_s2  ;;  %v1029_v22 = vld [vmem:[#allocation4 + $0x12a] sm:$0xff]  ;;  %s3845_s2 = sld [smem:[#allocation68_spill]] }
 0x454   : > { %v1109_v2 = vld [vmem:[#allocation4 + $0xfb] sm:$0xff]  ;;  %3799 = vst [vmem:[#allocation136_spill] sm:$0xff] %v2795_v31  ;;  %3801 = vst [vmem:[#allocation137_spill] sm:$0xff] %v2799_v10  ;;  %v2813_v4 = vmul.f32 %v3806_v28, %v1237_v52  ;;  %v3808_v0 = vstv %s3707_s4  ;;  %v1141_v6 = vld [vmem:[#allocation4 + $0x12b] sm:$0xff]  ;;  %v3810_v59 = vstv %s2492_s23  ;;  %v3812_v43 = vstv %s3734_s24  ;;  %s3868_s4 = sld [smem:[#allocation77_spill]] }
 0x455   : > { %v1221_v33 = vld [vmem:[#allocation4 + $0xfc] sm:$0xff]  ;;  %3803 = vst [vmem:[#allocation138_spill] sm:$0xff] %v2803_v60  ;;  %3805 = vst [vmem:[#allocation139_spill] sm:$0xff] %v2809_v11  ;;  %v2817_v54 = vmul.f32 %v3808_v0, %v1349_v14  ;;  %v917_v60 = vld [vmem:[#allocation4 + $0x129] sm:$0xff]  ;;  %v2822_v9 = vmul.f32 %v3810_v59, %v1492_v13  ;;  %v2826_v62 = vmul.f32 %v3812_v43, %v885_v56  ;;  %v3813_v52 = vstv %s3740_s14  ;;  %s3882_s24 = sld [smem:[#allocation82_spill]] }
 0x456   : > { %v1333_v51 = vld [vmem:[#allocation4 + $0xfd] sm:$0xff]  ;;  %3807 = vst [vmem:[#allocation140_spill] sm:$0xff] %v2813_v4  ;;  %385 = vst.msk [vmem:[#allocation4 + $0x20] sm:$0xff] %vm162_vm0, %v377_v20  ;;  %v2830_v28 = vmul.f32 %v3813_v52, %v997_v24  ;;  %v3814_v14 = vstv %s3742_s28  ;;  %v3815_v4 = vstv %s3701_s27  ;;  %v3817_v10 = vstv %s3743_s13  ;;  %v1365_v59 = vld [vmem:[#allocation4 + $0x12d] sm:$0xff]  ;;  %s3867_s27 = sld [smem:[#allocation76_spill]] }
 0x457   : > { %v1445_v48 = vld [vmem:[#allocation4 + $0xfe] sm:$0xff]  ;;  %3809 = vst [vmem:[#allocation141_spill] sm:$0xff] %v2817_v54  ;;  %3811 = vst [vmem:[#allocation142_spill] sm:$0xff] %v2822_v9  ;;  %v2834_v0 = vmul.f32 %v3814_v14, %v1109_v2  ;;  %v1253_v54 = vld [vmem:[#allocation4 + $0x12c] sm:$0xff]  ;;  %v2838_v11 = vmul.f32 %v3815_v4, %v1461_v58  ;;  %v2842_v20 = vmul.f32 %v3817_v10, %v1221_v33  ;;  %v3818_v31 = vstv %s3744_s6  ;;  %v416_v2 = vpop.permute.xlu0 %415  ;;  %s3875_s6 = sld [smem:[#allocation78_spill]] }
 0x458   : > { %v738_v25 = vld [vmem:[#allocation4 + $0x18] sm:$0xff]  ;;  %v2846_v13 = vmul.f32 %v3818_v31, %v1333_v51  ;;  %v1477_v56 = vld [vmem:[#allocation4 + $0x12e] sm:$0xff]  ;;  %v3820_v24 = vstv %s3668_s9  ;;  %v3822_v52 = vstv %s3700_s18  ;;  %v2855_v58 = vadd.f32 %v798_v8, %v2135_v7  ;;  %424 = vst.msk [vmem:[#allocation4 + $0x50] sm:$0xff] %vm162_vm0, %v416_v2  ;;  %s3850_s18 = sld [smem:[#allocation70_spill]] }
 0x459   : > { %3816 = vst [vmem:[#allocation143_spill] sm:$0xff] %v2838_v11  ;;  %v744_v43 = vmul.f32 %v3820_v24, %v738_v25  ;;  %v2852_v14 = vmul.f32 %v3822_v52, %v1445_v48  ;;  %v3824_v33 = vstv %s3753_s5  ;;  %v3826_v4 = vstv %s3756_s3  ;;  %v787_v25 = vld [vmem:[#allocation4 + $0x68] sm:$0xff]  ;;  %v395_v52 = vpop.permute.xlu1 %394  ;;  %s3841_s3 = sld [smem:[#allocation74_spill]] }
 0x45a   : > { %3819 = vst [vmem:[#allocation144_spill] sm:$0xff] %v2846_v13  ;;  %v2859_v10 = vmul.f32 %v3824_v33, %v917_v60  ;;  %v2863_v31 = vmul.f32 %v3826_v4, %v1029_v22  ;;  %v3828_v51 = vstv %s3765_s8  ;;  %v898_v24 = vld [vmem:[#allocation4 + $0x61] sm:$0xff]  ;;  %v3833_v7 = vstv %s3659_s19  ;;  %404 = vst.msk [vmem:[#allocation4 + $0x30] sm:$0xff] %vm162_vm0, %v395_v52  ;;  %s3844_s19 = sld [smem:[#allocation63_spill]] }
 0x45b   : > { %3823 = vst [vmem:[#allocation145_spill] sm:$0xff] %v2852_v14  ;;  %v2867_v9 = vmul.f32 %v3828_v51, %v1141_v6  ;;  %v1010_v48 = vld [vmem:[#allocation4 + $0x62] sm:$0xff]  ;;  %v2872_v8 = vmul.f32 %v3833_v7, %v1253_v54  ;;  %v3835_v60 = vstv %s3667_s0  ;;  %v3836_v11 = vstv %s3669_s29  ;;  %s3865_s0 = sld [smem:[#allocation75_spill]] }
 0x45c   : > { %3825 = vst [vmem:[#allocation146_spill] sm:$0xff] %v2859_v10  ;;  %3827 = vst [vmem:[#allocation147_spill] sm:$0xff] %v2863_v31  ;;  %v793_v33 = vmul.f32 %v3835_v60, %v787_v25  ;;  %v904_v22 = vmul.f32 %v3836_v11, %v898_v24  ;;  %v3837_v4 = vstv %s3821_s12  ;;  %v1122_v6 = vld [vmem:[#allocation4 + $0x63] sm:$0xff]  ;;  %v3840_v10 = vstv %s3829_s17  ;;  %s3880_s8 = sld [smem:[#allocation79_spill]] }
 0x45d   : > { %3830 = vst [vmem:[#allocation148_spill] sm:$0xff] %v2867_v9  ;;  %3834 = vst [vmem:[#allocation149_spill] sm:$0xff] %v2872_v8  ;;  %v1016_v14 = vmul.f32 %v3837_v4, %v1010_v48  ;;  %v1234_v51 = vld [vmem:[#allocation4 + $0x64] sm:$0xff]  ;;  %v3838_v9 = vstv %s2264_s15  ;;  %v1128_v2 = vmul.f32 %v3840_v10, %v1122_v6  ;;  %v3842_v54 = vstv %s3831_s21  ;;  %s3848_s15 = sld [smem:[#allocation69_spill]] }
 0x45e   : > { %v1346_v13 = vld [vmem:[#allocation4 + $0x65] sm:$0xff]  ;;  %v2883_v31 = vmul.f32 %v3838_v9, %v1365_v59  ;;  %v1240_v7 = vmul.f32 %v3842_v54, %v1234_v51  ;;  %v3843_v8 = vstv %s3832_s26  ;;  %v2892_v24 = vadd.f32 %v2587_v34, %v744_v43  ;;  %v755_v9 = vld [vmem:[#allocation4 + $0x38] sm:$0xff]  ;;  %v454_v59 = vpop.permute.xlu0 %453  ;;  %s3886_s14 = sld [smem:[#allocation80_spill]] }
 0x45f   : > { %v1352_v25 = vmul.f32 %v3843_v8, %v1346_v13  ;;  %v1458_v11 = vld [vmem:[#allocation4 + $0x66] sm:$0xff]  ;;  %v799_v48 = vadd.f32 %v2557_v17, %v793_v33  ;;  %v2896_v52 = vadd.f32 %v2561_v5, %v904_v22  ;;  %v3846_v10 = vstv %s2485_s22  ;;  %v850_v17 = vld [vmem:[#allocation4 + $0x19] sm:$0xff]  ;;  %v414_v22 = vpop.permute.xlu1 %413  ;;  %462 = vst.msk [vmem:[#allocation4 + $0x80] sm:$0xff] %vm162_vm0, %v454_v59  ;;  %s3864_s22 = sld [smem:[#allocation73_spill]] }
 0x460   : > { %3839 = vst [vmem:[#allocation150_spill] sm:$0xff] %v2883_v31  ;;  %v2900_v60 = vmul.f32 %v3846_v10, %v1477_v56  ;;  %v2903_v13 = vadd.f32 %v2567_v21, %v1016_v14  ;;  %v2906_v8 = vadd.f32 %v2571_v40, %v1128_v2  ;;  %v739_v34 = vld [vmem:[#allocation4 + $0x20] sm:$0xff]  ;;  %v3849_v33 = vstv %s3841_s3  ;;  %423 = vst.msk [vmem:[#allocation4 + $0x48] sm:$0xff] %vm162_vm0, %v414_v22  ;;  %s3887_s28 = sld [smem:[#allocation84_spill]] }
 0x461   : > { %v851_v43 = vld [vmem:[#allocation4 + $0x21] sm:$0xff]  ;;  %v761_v5 = vmul.f32 %v3849_v33, %v755_v9  ;;  %v3851_v4 = vstv %s3844_s19  ;;  %v2916_v21 = vadd.f32 %v2575_v36, %v1240_v7  ;;  %v3853_v14 = vstv %s3668_s9  ;;  %s3863_s9 = sld [smem:[#allocation72_spill]] }
 0x462   : > { %3847 = vst [vmem:[#allocation151_spill] sm:$0xff] %v2900_v60  ;;  %v2913_v56 = vmul.f32 %v3851_v4, %v1458_v11  ;;  %v745_v40 = vmul.f32 %v3853_v14, %v739_v34  ;;  %v3854_v6 = vstv %s3845_s2  ;;  %v962_v10 = vld [vmem:[#allocation4 + $0x1a] sm:$0xff]  ;;  %v963_v60 = vld [vmem:[#allocation4 + $0x22] sm:$0xff]  ;;  %v3859_v36 = vstv %s3850_s18  ;;  %s3888_s13 = sld [smem:[#allocation85_spill]] }
 0x463   : > { %v856_v51 = vmul.f32 %v3854_v6, %v850_v17  ;;  %v3855_v2 = vmov %v3854_v6  ;;  %v1074_v31 = vld [vmem:[#allocation4 + $0x1b] sm:$0xff]  ;;  %v3856_v9 = vstv %s3848_s15  ;;  %v1075_v4 = vld [vmem:[#allocation4 + $0x23] sm:$0xff]  ;;  %v2932_v17 = vadd.f32 %v2579_v38, %v1352_v25  ;;  %s3892_s5 = sld [smem:[#allocation86_spill]] }
 0x464   : > { %3852 = vst [vmem:[#allocation152_spill] sm:$0xff] %v2913_v56  ;;  %v857_v54 = vmul.f32 %v3855_v2, %v851_v43  ;;  %v968_v59 = vmul.f32 %v3856_v9, %v962_v10  ;;  %v3857_v33 = vmov %v3856_v9  ;;  %v1080_v7 = vmul.f32 %v3859_v36, %v1074_v31  ;;  %v1186_v56 = vld [vmem:[#allocation4 + $0x1c] sm:$0xff]  ;;  %v1187_v34 = vld [vmem:[#allocation4 + $0x24] sm:$0xff]  ;;  %s3900_s2 = sld [smem:[#allocation88_spill]] }
 0x465   : > { %v969_v11 = vmul.f32 %v3857_v33, %v963_v60  ;;  %3860 = vst [vmem:[#allocation153_spill] sm:$0xff] %v2932_v17  ;;  %v801_v43 = vadd.f32 %v799_v48, %v2141_v12  ;;  %v862_v14 = vadd.f32 %v2591_v50, %v856_v51  ;;  %v3861_v22 = vmov %v3859_v36  ;;  %v1298_v10 = vld [vmem:[#allocation4 + $0x1d] sm:$0xff]  ;;  %v1299_v9 = vld [vmem:[#allocation4 + $0x25] sm:$0xff]  ;;  %v473_v60 = vpop.permute.xlu0 %472  ;;  %v754_v50 = vld [vmem:[#allocation4 + $0x30] sm:$0xff]  ;;  %v452_v48 = vpop.permute.xlu1 %451  ;;  %s3901_s15 = sld [smem:[#allocation89_spill]] }
 0x466   : > { %v863_v6 = vadd.f32 %v2624_v30, %v857_v54  ;;  %v1081_v2 = vmul.f32 %v3861_v22, %v1075_v4  ;;  %v2940_v33 = vadd.f32 %v2583_v35, %v745_v40  ;;  %v2943_v31 = vadd.f32 %v2599_v37, %v968_v59  ;;  %v1410_v36 = vld [vmem:[#allocation4 + $0x1e] sm:$0xff]  ;;  %v866_v30 = vld [vmem:[#allocation4 + $0x31] sm:$0xff]  ;;  %481 = vst.msk [vmem:[#allocation4 + $0x98] sm:$0xff] %vm162_vm0, %v473_v60  ;;  %v1411_v40 = vld [vmem:[#allocation4 + $0x26] sm:$0xff]  ;;  %s3904_s18 = sld [smem:[#allocation90_spill]] }
 0x467   : > { %v3862_v38 = vstv %s3858_s20  ;;  %v2948_v12 = vadd.f32 %v2653_v1, %v761_v5  ;;  %v2952_v35 = vadd.f32 %v862_v14, %v2855_v58  ;;  %v2955_v37 = vadd.f32 %v2633_v29, %v969_v11  ;;  %v978_v51 = vld [vmem:[#allocation4 + $0x32] sm:$0xff]  ;;  %461 = vst.msk [vmem:[#allocation4 + $0x78] sm:$0xff] %vm162_vm0, %v452_v48  ;;  %s3907_s20 = sld [smem:[#allocation91_spill]] }
 0x468   : > { %v1192_v25 = vmul.f32 %v3862_v38, %v1186_v56  ;;  %v2958_v56 = vadd.f32 %v2603_v61, %v1080_v7  ;;  %v3866_v1 = vmov %v3862_v38  ;;  %v1090_v54 = vld [vmem:[#allocation4 + $0x33] sm:$0xff]  ;;  %v2963_v59 = vadd.f32 %v863_v6, %v801_v43  ;;  %s3920_s23 = sld [smem:[#allocation103_spill]] }
 0x469   : > { %v1193_v5 = vmul.f32 %v3866_v1, %v1187_v34  ;;  %v2966_v58 = vadd.f32 %v2637_v27, %v1081_v2  ;;  %v3869_v29 = vstv %s3863_s9  ;;  %v1202_v7 = vld [vmem:[#allocation4 + $0x34] sm:$0xff]  ;;  %v3871_v14 = vstv %s3864_s22  ;;  %v399_v27 = vpop.permute.xlu0 %398  ;;  %s3909_s9 = sld [smem:[#allocation92_spill]] }
 0x46a   : > { %v1304_v11 = vmul.f32 %v3869_v29, %v1298_v10  ;;  %v3870_v4 = vmov %v3869_v29  ;;  %v2973_v34 = vadd.f32 %v2607_v26, %v1192_v25  ;;  %v2977_v22 = vmul.f32 %v3871_v14, %v1410_v36  ;;  %v1314_v43 = vld [vmem:[#allocation4 + $0x35] sm:$0xff]  ;;  %v770_v36 = vld [vmem:[#allocation4 + $0x48] sm:$0xff]  ;;  %406 = vst.msk [vmem:[#allocation4 + $0x40] sm:$0x3f] %vm386_vm5, %v399_v27  ;;  %v803_v27 = vld [vmem:[#allocation4 + $0x80] sm:$0xff]  ;;  %s3915_s22 = sld [smem:[#allocation94_spill]] }
 0x46b   : > { %v1305_v61 = vmul.f32 %v3870_v4, %v1299_v9  ;;  %v3873_v60 = vstv %s3841_s3  ;;  %v3874_v48 = vstv %s3865_s0  ;;  %v771_v6 = vld [vmem:[#allocation4 + $0x50] sm:$0xff]  ;;  %v2984_v2 = vadd.f32 %v2641_v23, %v1193_v5  ;;  %s3894_s3 = sld [smem:[#allocation87_spill]] }
 0x46c   : > { %3872 = vst [vmem:[#allocation154_spill] sm:$0xff] %v2977_v22  ;;  %v760_v38 = vmul.f32 %v3873_v60, %v754_v50  ;;  %v872_v1 = vmul.f32 %v3874_v48, %v866_v30  ;;  %v3876_v10 = vmov %v3871_v14  ;;  %v3878_v29 = vstv %s3867_s27  ;;  %v882_v50 = vld [vmem:[#allocation4 + $0x49] sm:$0xff]  ;;  %v471_v30 = vpop.permute.xlu1 %470  ;;  %s3924_s19 = sld [smem:[#allocation104_spill]] }
 0x46d   : > { %v2988_v9 = vmul.f32 %v3876_v10, %v1411_v40  ;;  %v984_v26 = vmul.f32 %v3878_v29, %v978_v51  ;;  %v3879_v25 = vstv %s3868_s4  ;;  %v994_v14 = vld [vmem:[#allocation4 + $0x4a] sm:$0xff]  ;;  %v2996_v60 = vadd.f32 %v2611_v49, %v1304_v11  ;;  %480 = vst.msk [vmem:[#allocation4 + $0x90] sm:$0xff] %vm162_vm0, %v471_v30 }
 0x46e   : > { %v1096_v4 = vmul.f32 %v3879_v25, %v1090_v54  ;;  %v2999_v23 = vadd.f32 %v2645_v44, %v1305_v61  ;;  %v3002_v5 = vadd.f32 %v2620_v32, %v760_v38  ;;  %v3885_v40 = vstv %s3875_s6  ;;  %v1426_v54 = vld [vmem:[#allocation4 + $0x36] sm:$0xff]  ;;  %v1106_v48 = vld [vmem:[#allocation4 + $0x4b] sm:$0xff] }
 0x46f   : > { %3877 = vst [vmem:[#allocation155_spill] sm:$0xff] %v2988_v9  ;;  %v1208_v51 = vmul.f32 %v3885_v40, %v1202_v7  ;;  %v1218_v10 = vld [vmem:[#allocation4 + $0x4c] sm:$0xff]  ;;  %v3008_v49 = vadd.f32 %v2657_v47, %v872_v1  ;;  %v3011_v44 = vadd.f32 %v2665_v15, %v984_v26  ;;  %v3889_v11 = vstv %s3880_s8  ;;  %v437_v15 = vpop.permute.xlu0 %436  ;;  %v914_v17 = vld [vmem:[#allocation4 + $0x79] sm:$0xff] }
 0x470   : > { %3883 = vst [vmem:[#allocation156_spill] sm:$0xff] %v2999_v23  ;;  %v3015_v61 = vmul.f32 %v3889_v11, %v1314_v43  ;;  %v3890_v32 = vstv %s3881_s25  ;;  %v1330_v7 = vld [vmem:[#allocation4 + $0x4d] sm:$0xff]  ;;  %v3020_v29 = vadd.f32 %v2669_v16, %v1096_v4  ;;  %v3893_v30 = vstv %s3882_s24  ;;  %v802_v4 = vld [vmem:[#allocation4 + $0x78] sm:$0xff]  ;;  %444 = vst.msk [vmem:[#allocation4 + $0x70] sm:$0x3f] %vm386_vm5, %v437_v15  ;;  %s3916_s25 = sld [smem:[#allocation97_spill]] }
 0x471   : > { %v777_v38 = vmul.f32 %v3890_v32, %v771_v6  ;;  %v3891_v25 = vmov %v3890_v32  ;;  %v888_v47 = vmul.f32 %v3893_v30, %v882_v50  ;;  %v3895_v1 = vstv %s3884_s7  ;;  %v1026_v23 = vld [vmem:[#allocation4 + $0x7a] sm:$0xff] }
 0x472   : > { %v776_v40 = vmul.f32 %v3891_v25, %v770_v36  ;;  %v1000_v9 = vmul.f32 %v3895_v1, %v994_v14  ;;  %v3896_v26 = vstv %s3886_s14  ;;  %v3898_v6 = vstv %s3887_s28  ;;  %v418_v36 = vpop.permute.xlu1 %417  ;;  %v1138_v25 = vld [vmem:[#allocation4 + $0x7b] sm:$0xff] }
 0x473   : > { %v3030_v22 = vmul.f32 %v3896_v26, %v1426_v54  ;;  %v783_v43 = vadd.f32 %v2686_v41, %v777_v38  ;;  %v1112_v11 = vmul.f32 %v3898_v6, %v1106_v48  ;;  %v3899_v32 = vstv %s3888_s13  ;;  %425 = vst.msk [vmem:[#allocation4 + $0x58] sm:$0x3f] %vm386_vm5, %v418_v36  ;;  %v3906_v1 = vld [vmem:[#allocation102_spill] sm:$0xff] }
 0x474   : > { %v1224_v16 = vmul.f32 %v3899_v32, %v1218_v10  ;;  %v3039_v50 = vadd.f32 %v2673_v63, %v1208_v51  ;;  %v782_v14 = vadd.f32 %v2628_v53, %v776_v40  ;;  %v3902_v54 = vstv %s3892_s5  ;;  %v1250_v40 = vld [vmem:[#allocation4 + $0x7c] sm:$0xff] }
 0x475   : > { %3897 = vst [vmem:[#allocation157_spill] sm:$0xff] %v3030_v22  ;;  %v3044_v41 = vmul.f32 %v3902_v54, %v1330_v7  ;;  %v3903_v48 = vstv %s3894_s3  ;;  %v3050_v10 = vadd.f32 %v2441_v3, %v783_v43  ;;  %v3053_v30 = vadd.f32 %v2690_v57, %v888_v47  ;;  %v1362_v7 = vld [vmem:[#allocation4 + $0x7d] sm:$0xff]  ;;  %v475_v57 = vpop.permute.xlu0 %474  ;;  %s3919_s3 = sld [smem:[#allocation101_spill]] }
 0x476   : > { %v809_v38 = vmul.f32 %v3903_v48, %v803_v27  ;;  %v3056_v63 = vadd.f32 %v2699_v46, %v1000_v9  ;;  %v3905_v51 = vmov %v3903_v48  ;;  %v848_v15 = vadd.f32 %v3906_v1, %v782_v14  ;;  %v819_v32 = vld [vmem:[#allocation4 + $0x98] sm:$0xff]  ;;  %v3911_v47 = vld [vmem:[#allocation120_spill] sm:$0xff]  ;;  %v3912_v46 = vld [vmem:[#allocation121_spill] sm:$0xff]  ;;  %482 = vst.msk [vmem:[#allocation4 + $0xa0] sm:$0x3f] %vm386_vm5, %v475_v57 }
 0x477   : > { %v808_v53 = vmul.f32 %v3905_v51, %v802_v4  ;;  %v3908_v26 = vstv %s3900_s2  ;;  %v3910_v3 = vstv %s3901_s15  ;;  %v3067_v36 = vadd.f32 %v3911_v47, %v1112_v11  ;;  %v3913_v4 = vld [vmem:[#allocation116_spill] sm:$0xff]  ;;  %v818_v51 = vld [vmem:[#allocation4 + $0x90] sm:$0xff] }
 0x478   : > { %v815_v27 = vadd.f32 %v2731_v18, %v809_v38  ;;  %v920_v6 = vmul.f32 %v3908_v26, %v914_v17  ;;  %v1032_v43 = vmul.f32 %v3910_v3, %v1026_v23  ;;  %v3070_v9 = vadd.f32 %v3912_v46, %v1224_v16  ;;  %v930_v18 = vld [vmem:[#allocation4 + $0x91] sm:$0xff]  ;;  %v456_v38 = vpop.permute.xlu1 %455 }
 0x479   : > { %v814_v54 = vadd.f32 %v3913_v4, %v808_v53  ;;  %v3914_v48 = vstv %s3904_s18  ;;  %v912_v17 = vadd.f32 %v2896_v52, %v848_v15  ;;  %v3917_v11 = vstv %s3907_s20  ;;  %v1042_v53 = vld [vmem:[#allocation4 + $0x92] sm:$0xff]  ;;  %463 = vst.msk [vmem:[#allocation4 + $0x88] sm:$0x3f] %vm386_vm5, %v456_v38 }
 0x47a   : > { %v1144_v14 = vmul.f32 %v3914_v48, %v1138_v25  ;;  %v926_v23 = vadd.f32 %v2735_v42, %v920_v6  ;;  %v1256_v1 = vmul.f32 %v3917_v11, %v1250_v40  ;;  %v3918_v16 = vstv %s3909_s9  ;;  %v1154_v25 = vld [vmem:[#allocation4 + $0x93] sm:$0xff] }
 0x47b   : > { %v3082_v26 = vmul.f32 %v3918_v16, %v1362_v7  ;;  %v3086_v3 = vadd.f32 %v815_v27, %v2940_v33  ;;  %v816_v57 = vadd.f32 %v814_v54, %v2892_v24  ;;  %v1038_v52 = vadd.f32 %v2739_v19, %v1032_v43  ;;  %v1266_v48 = vld [vmem:[#allocation4 + $0x94] sm:$0xff] }
 0x47c   : > { %v3921_v15 = vstv %s3915_s22  ;;  %v928_v40 = vadd.f32 %v926_v23, %v2952_v35  ;;  %v976_v6 = vadd.f32 %v2943_v31, %v912_v17  ;;  %v3923_v46 = vstv %s3916_s25  ;;  %v714_v43 = vpop.permute.xlu1 %713  ;;  %v3927_v11 = vld [vmem:[#allocation119_spill] sm:$0xff]  ;;  %v3929_v23 = vld [vmem:[#allocation128_spill] sm:$0xff]  ;;  %s3931_s22 = sld [smem:[#allocation107_spill]] }
 0x47d   : > { %v825_v42 = vmul.f32 %v3921_v15, %v819_v32  ;;  %v3922_v7 = vmov %v3921_v15  ;;  %v936_v4 = vmul.f32 %v3923_v46, %v930_v18  ;;  %v880_v33 = vadd.f32 %v3008_v49, %v816_v57  ;;  %v867_v17 = vld [vmem:[#allocation4 + $0x39] sm:$0xff]  ;;  %721 = vst.msk [vmem:[#allocation4 + $0x148] sm:$0x3f] %vm386_vm5, %v714_v43  ;;  %v883_v43 = vld [vmem:[#allocation4 + $0x51] sm:$0xff] }
 0x47e   : > { %v824_v47 = vmul.f32 %v3922_v7, %v818_v51  ;;  %v3925_v27 = vstv %s3919_s3  ;;  %v3926_v54 = vstv %s3920_s23  ;;  %v1040_v32 = vadd.f32 %v1038_v52, %v976_v6  ;;  %v979_v18 = vld [vmem:[#allocation4 + $0x3a] sm:$0xff] }
 0x47f   : > { %v831_v38 = vadd.f32 %v2779_v45, %v825_v42  ;;  %v1048_v24 = vmul.f32 %v3925_v27, %v1042_v53  ;;  %v1160_v19 = vmul.f32 %v3926_v54, %v1154_v25  ;;  %v942_v31 = vadd.f32 %v2783_v39, %v936_v4  ;;  %v3928_v45 = vld [vmem:[#allocation127_spill] sm:$0xff] }
 0x480   : > { %v830_v35 = vadd.f32 %v3927_v11, %v824_v47  ;;  %v992_v51 = vadd.f32 %v3011_v44, %v928_v40  ;;  %v3109_v49 = vadd.f32 %v3928_v45, %v1144_v14  ;;  %v3112_v16 = vadd.f32 %v3929_v23, %v1256_v1  ;;  %v1378_v39 = vld [vmem:[#allocation4 + $0x95] sm:$0xff]  ;;  %v3932_v1 = vld [vmem:[#allocation136_spill] sm:$0xff]  ;;  %v899_v45 = vld [vmem:[#allocation4 + $0x69] sm:$0xff] }
 0x481   : > { %v1054_v53 = vadd.f32 %v2787_v55, %v1048_v24  ;;  %v3930_v25 = vstv %s3924_s19  ;;  %v1091_v44 = vld [vmem:[#allocation4 + $0x3b] sm:$0xff]  ;;  %v833_v52 = vadd.f32 %v831_v38, %v2948_v12  ;;  %v944_v42 = vadd.f32 %v942_v31, %v880_v33  ;;  %v3935_v24 = vld [vmem:[#allocation137_spill] sm:$0xff]  ;;  %v3940_v23 = vld [vmem:[#allocation93_spill] sm:$0xff] }
 0x482   : > { %v1272_v57 = vmul.f32 %v3930_v25, %v1266_v48  ;;  %v832_v15 = vadd.f32 %v830_v35, %v3002_v5  ;;  %v1104_v40 = vadd.f32 %v3020_v29, %v1040_v32  ;;  %v1203_v14 = vld [vmem:[#allocation4 + $0x3c] sm:$0xff]  ;;  %v1166_v7 = vadd.f32 %v3932_v1, %v1160_v19  ;;  %v995_v19 = vld [vmem:[#allocation4 + $0x52] sm:$0xff] }
 0x483   : > { %v1056_v6 = vadd.f32 %v1054_v53, %v992_v51  ;;  %v3933_v47 = vstv %s3865_s0  ;;  %v3934_v46 = vstv %s3867_s27  ;;  %v1315_v48 = vld [vmem:[#allocation4 + $0x3d] sm:$0xff]  ;;  %v3936_v12 = vstv %s3931_s22 }
 0x484   : > { %v873_v55 = vmul.f32 %v3933_v47, %v867_v17  ;;  %v985_v4 = vmul.f32 %v3934_v46, %v979_v18  ;;  %v896_v27 = vadd.f32 %v3053_v30, %v832_v15  ;;  %v3127_v54 = vadd.f32 %v3935_v24, %v1272_v57  ;;  %v1427_v33 = vld [vmem:[#allocation4 + $0x3e] sm:$0xff]  ;;  %v1107_v17 = vld [vmem:[#allocation4 + $0x53] sm:$0xff]  ;;  %v1011_v15 = vld [vmem:[#allocation4 + $0x6a] sm:$0xff] }
 0x485   : > { %v3131_v5 = vmul.f32 %v3936_v12, %v1378_v39  ;;  %v3937_v38 = vstv %s3868_s4  ;;  %v3136_v32 = vadd.f32 %v3056_v63, %v944_v42  ;;  %v3138_v11 = vadd.f32 %v1166_v7, %v1104_v40  ;;  %v3938_v30 = vld [vmem:[#allocation123_spill] sm:$0xff]  ;;  %v3941_v63 = vld [vmem:[#allocation124_spill] sm:$0xff]  ;;  %v3942_v39 = vld [vmem:[#allocation125_spill] sm:$0xff] }
 0x486   : > { %v1097_v29 = vmul.f32 %v3937_v38, %v1091_v44  ;;  %v879_v35 = vadd.f32 %v3938_v30, %v873_v55  ;;  %v3939_v31 = vstv %s3875_s6  ;;  %v1219_v18 = vld [vmem:[#allocation4 + $0x54] sm:$0xff]  ;;  %v3144_v53 = vadd.f32 %v3940_v23, %v896_v27  ;;  %v1123_v42 = vld [vmem:[#allocation4 + $0x6b] sm:$0xff]  ;;  %s4033_s6 = sld [smem:[#allocation159_spill]] }
 0x487   : > { %v1209_v51 = vmul.f32 %v3939_v31, %v1203_v14  ;;  %v3147_v25 = vadd.f32 %v3067_v36, %v1056_v6  ;;  %v3150_v57 = vadd.f32 %v3941_v63, %v985_v4  ;;  %v3943_v40 = vstv %s3880_s8  ;;  %v1331_v46 = vld [vmem:[#allocation4 + $0x55] sm:$0xff]  ;;  %v1235_v4 = vld [vmem:[#allocation4 + $0x6c] sm:$0xff] }
 0x488   : > { %v3153_v44 = vadd.f32 %v3942_v39, %v1097_v29  ;;  %v3157_v14 = vmul.f32 %v3943_v40, %v1315_v48  ;;  %v3944_v1 = vstv %s3886_s14  ;;  %v3946_v47 = vstv %s3882_s24  ;;  %v3951_v31 = vld [vmem:[#allocation130_spill] sm:$0xff]  ;;  %v915_v40 = vld [vmem:[#allocation4 + $0x81] sm:$0xff]  ;;  %s1946_s14 = smov [#allocation10]  }
 0x489   : > { %v3161_v7 = vmul.f32 %v3944_v1, %v1427_v33  ;;  %v889_v36 = vmul.f32 %v3946_v47, %v883_v43  ;;  %v3947_v6 = vstv %s3884_s7  ;;  %v3168_v27 = vadd.f32 %v879_v35, %v3086_v3  ;;  %v1027_v3 = vld [vmem:[#allocation4 + $0x82] sm:$0xff] }
 0x48a   : > { %v1001_v55 = vmul.f32 %v3947_v6, %v995_v19  ;;  %v3948_v24 = vstv %s3887_s28  ;;  %v3949_v38 = vstv %s3888_s13  ;;  %v3950_v48 = vstv %s3669_s29  ;;  %s3999_s29 = sld [smem:[#allocation110_spill]]  ;;  %s1850_s28 = sshll.u32 %s1946_s14, 4  ;;  %s1851_s28 = int_to_ptr.vmem [resolvable:$false] %s1850_s28 }
 0x48b   : > { %3945 = vst [vmem:[#allocation102_spill] sm:$0xff] %v3161_v7  ;;  %v1113_v12 = vmul.f32 %v3948_v24, %v1107_v17  ;;  %v1225_v29 = vmul.f32 %v3949_v38, %v1219_v18  ;;  %v905_v30 = vmul.f32 %v3950_v48, %v899_v45  ;;  %v3177_v33 = vadd.f32 %v3951_v31, %v1209_v51  ;;  %v3955_v45 = vld [vmem:[#allocation133_spill] sm:$0xff]  ;;  %v3958_v38 = vld [vmem:[#allocation139_spill] sm:$0xff]  ;;  %s1852_s13 = scalar_lea.vmem %s1851_s28, 512 }
 0x48c   : > { %v895_v23 = vadd.f32 %v2826_v62, %v889_v36  ;;  %v3952_v43 = vstv %s3821_s12  ;;  %v3953_v19 = vstv %s3829_s17  ;;  %v3185_v35 = vadd.f32 %v2830_v28, %v1001_v55  ;;  %v1347_v62 = vld [vmem:[#allocation4 + $0x6d] sm:$0xff]  ;;  %v3957_v28 = vld [vmem:[#allocation135_spill] sm:$0xff]  ;;  %s4031_s12 = sld [smem:[#allocation17_spill]] }
 0x48d   : > { %v1017_v63 = vmul.f32 %v3952_v43, %v1011_v15  ;;  %v1129_v39 = vmul.f32 %v3953_v19, %v1123_v42  ;;  %v3954_v17 = vstv %s3892_s5  ;;  %v911_v1 = vadd.f32 %v3955_v45, %v905_v30  ;;  %v1139_v15 = vld [vmem:[#allocation4 + $0x83] sm:$0xff]  ;;  %v1043_v45 = vld [vmem:[#allocation4 + $0x9a] sm:$0xff] }
 0x48e   : > { %v3189_v18 = vmul.f32 %v3954_v17, %v1331_v46  ;;  %v3956_v51 = vstv %s3831_s21  ;;  %v1251_v42 = vld [vmem:[#allocation4 + $0x84] sm:$0xff]  ;;  %v897_v36 = vadd.f32 %v895_v23, %v833_v52  ;;  %v1119_v6 = vadd.f32 %v2834_v0, %v1113_v12  ;;  %v931_v17 = vld [vmem:[#allocation4 + $0x99] sm:$0xff] }
 0x48f   : > { %v1241_v47 = vmul.f32 %v3956_v51, %v1235_v4  ;;  %v3196_v24 = vadd.f32 %v2842_v20, %v1225_v29  ;;  %v1023_v55 = vadd.f32 %v3957_v28, %v1017_v63  ;;  %v913_v46 = vadd.f32 %v911_v1, %v3050_v10  ;;  %v1363_v19 = vld [vmem:[#allocation4 + $0x85] sm:$0xff]  ;;  %v3961_v52 = vld [vmem:[#allocation95_spill] sm:$0xff]  ;;  %v3966_v51 = vld [vmem:[#allocation146_spill] sm:$0xff] }
 0x490   : > { %v3201_v48 = vadd.f32 %v3958_v38, %v1129_v39  ;;  %v3959_v30 = vstv %s3900_s2  ;;  %v3960_v31 = vstv %s3901_s15  ;;  %v961_v0 = vadd.f32 %v3961_v52, %v897_v36  ;;  %v3965_v39 = vld [vmem:[#allocation140_spill] sm:$0xff]  ;;  %v3967_v28 = vld [vmem:[#allocation147_spill] sm:$0xff] }
 0x491   : > { %v921_v4 = vmul.f32 %v3959_v30, %v915_v40  ;;  %v1033_v43 = vmul.f32 %v3960_v31, %v1027_v3  ;;  %v3962_v12 = vstv %s3832_s26  ;;  %v3963_v29 = vstv %s3904_s18  ;;  %v1155_v30 = vld [vmem:[#allocation4 + $0x9b] sm:$0xff] }
 0x492   : > { %v3210_v20 = vmul.f32 %v3962_v12, %v1347_v62  ;;  %v1145_v23 = vmul.f32 %v3963_v29, %v1139_v15  ;;  %v3964_v63 = vstv %s3907_s20  ;;  %v1247_v1 = vadd.f32 %v3965_v39, %v1241_v47  ;;  %v933_v36 = vld [vmem:[#allocation4 + $0x141] sm:$0xff]  ;;  %s1730_s26 = sshll.u32 %s4031_s12, 8 }
 0x493   : > { %v1257_v10 = vmul.f32 %v3964_v63, %v1251_v42  ;;  %v927_v40 = vadd.f32 %v3966_v51, %v921_v4  ;;  %v977_v3 = vadd.f32 %v2955_v37, %v913_v46  ;;  %v1039_v38 = vadd.f32 %v3967_v28, %v1033_v43  ;;  %v1045_v62 = vld [vmem:[#allocation4 + $0x142] sm:$0xff]  ;;  %s3340_s8 = scalar_lea.hbm %s4033_s6, %s1730_s26 }
 0x494   : > { %v1025_v31 = vadd.f32 %v1023_v55, %v961_v0  ;;  %v3968_v15 = vld [vmem:[#allocation148_spill] sm:$0xff]  ;;  %v3969_v52 = vstv %s3909_s9  ;;  %v3970_v47 = vstv %s3916_s25  ;;  %v3971_v63 = vld [vmem:[#allocation149_spill] sm:$0xff]  ;;  %v3973_v51 = vstv %s3919_s3 }
 0x495   : > { %v1151_v42 = vadd.f32 %v3968_v15, %v1145_v23  ;;  %v3223_v12 = vmul.f32 %v3969_v52, %v1363_v19  ;;  %v937_v29 = vmul.f32 %v3970_v47, %v931_v17  ;;  %v1267_v4 = vld [vmem:[#allocation4 + $0x9c] sm:$0xff]  ;;  %v929_v46 = vadd.f32 %v927_v40, %v2963_v59  ;;  %v1269_v0 = vld [vmem:[#allocation4 + $0x144] sm:$0xff] }
 0x496   : > { %v1157_v37 = vld [vmem:[#allocation4 + $0x143] sm:$0xff]  ;;  %v1041_v43 = vadd.f32 %v1039_v38, %v977_v3  ;;  %v3229_v39 = vadd.f32 %v3971_v63, %v1257_v10  ;;  %v1049_v55 = vmul.f32 %v3973_v51, %v1043_v45  ;;  %v1089_v23 = vadd.f32 %v2966_v58, %v1025_v31 }
 0x497   : > { %v3974_v19 = vstv %s3920_s23  ;;  %v1379_v15 = vld [vmem:[#allocation4 + $0x9d] sm:$0xff]  ;;  %v3975_v17 = vstv %s3776_s16  ;;  %v3976_v47 = vstv %s3779_s10  ;;  %v3977_v22 = vstv %s3924_s19  ;;  %s4011_s23 = sld [smem:[#allocation111_spill]] }
 0x498   : > { %3972 = vst [vmem:[#allocation120_spill] sm:$0xff] %v3229_v39  ;;  %v1161_v28 = vmul.f32 %v3974_v19, %v1155_v30  ;;  %v941_v52 = vmul.f32 %v3975_v17, %v933_v36  ;;  %v1053_v7 = vmul.f32 %v3976_v47, %v1045_v62  ;;  %v1273_v59 = vmul.f32 %v3977_v22, %v1267_v4  ;;  %v3981_v22 = vld [vmem:[#allocation96_spill] sm:$0xff]  ;;  %s4014_s16 = sld [smem:[#allocation112_spill]] }
 0x499   : > { %v993_v40 = vadd.f32 %v3150_v57, %v929_v46  ;;  %v1105_v10 = vadd.f32 %v3153_v44, %v1041_v43  ;;  %v3978_v3 = vstv %s2270_s11  ;;  %v1153_v63 = vadd.f32 %v1151_v42, %v1089_v23  ;;  %v1381_v4 = vld [vmem:[#allocation4 + $0x145] sm:$0xff]  ;;  %v3982_v42 = vld [vmem:[#allocation99_spill] sm:$0xff]  ;;  %s4000_s11 = sld [smem:[#allocation63_spill]] }
 0x49a   : > { %v1165_v38 = vmul.f32 %v3978_v3, %v1157_v37  ;;  %v943_v45 = vadd.f32 %v941_v52, %v937_v29  ;;  %v1055_v51 = vadd.f32 %v1053_v7, %v1049_v55  ;;  %v3979_v39 = vstv %s3786_s30  ;;  %v3987_v52 = vld [vmem:[#allocation117_spill] sm:$0xff]  ;;  %s4016_s10 = sld [smem:[#allocation62_spill]] }
 0x49b   : > { %v1277_v58 = vmul.f32 %v3979_v39, %v1269_v0  ;;  %v3980_v31 = vstv %s3931_s22  ;;  %v1024_v36 = vadd.f32 %v2903_v13, %v3144_v53  ;;  %v1072_v62 = vadd.f32 %v3981_v22, %v3136_v32  ;;  %s4020_s30 = sld [smem:[#allocation24_spill]] }
 0x49c   : > { %v1385_v30 = vmul.f32 %v3980_v31, %v1379_v15  ;;  %v1167_v19 = vadd.f32 %v1165_v38, %v1161_v28  ;;  %v945_v57 = vadd.f32 %v943_v45, %v3168_v27  ;;  %v1057_v44 = vadd.f32 %v1055_v51, %v993_v40  ;;  %v3989_v40 = vld [vmem:[#allocation131_spill] sm:$0xff] }
 0x49d   : > { %v1184_v29 = vadd.f32 %v3982_v42, %v3147_v25  ;;  %v1217_v7 = vadd.f32 %v3177_v33, %v1153_v63  ;;  %v1088_v46 = vadd.f32 %v2958_v56, %v1024_v36  ;;  %v1136_v43 = vadd.f32 %v2906_v8, %v1072_v62  ;;  %v3984_v56 = vld [vmem:[#allocation98_spill] sm:$0xff]  ;;  %v3985_v8 = vld [vmem:[#allocation100_spill] sm:$0xff]  ;;  %v3996_v36 = vld [vmem:[#allocation150_spill] sm:$0xff] }
 0x49e   : > { %v1169_v37 = vadd.f32 %v1167_v19, %v1105_v10  ;;  %v1232_v13 = vadd.f32 %v3070_v9, %v3138_v11  ;;  %v1009_v53 = vadd.f32 %v3185_v35, %v945_v57  ;;  %v1121_v32 = vadd.f32 %v1119_v6, %v1057_v44  ;;  %v3986_v9 = vld [vmem:[#allocation105_spill] sm:$0xff]  ;;  %v1443_v57 = vld [vmem:[#allocation4 + $0x56] sm:$0xff] }
 0x49f   : > { %v1279_v39 = vadd.f32 %v1277_v58, %v1273_v59  ;;  %v1248_v27 = vadd.f32 %v2916_v21, %v1184_v29  ;;  %v3983_v55 = vstv %s3789_s1  ;;  %v1152_v25 = vadd.f32 %v3109_v49, %v1088_v46  ;;  %v3994_v58 = vld [vmem:[#allocation129_spill] sm:$0xff]  ;;  %v3998_v44 = vld [vmem:[#allocation120_spill] sm:$0xff]  ;;  %v4001_v46 = vld [vmem:[#allocation108_spill] sm:$0xff]  ;;  %s3317_s1 = sld [smem:[#allocation6 + $0x62]] }
 0x4a0   : > { %v1389_v0 = vmul.f32 %v3983_v55, %v1381_v4  ;;  %v1200_v33 = vadd.f32 %v2973_v34, %v1136_v43  ;;  %v1233_v23 = vadd.f32 %v3196_v24, %v1169_v37  ;;  %v1073_v28 = vadd.f32 %v3984_v56, %v1009_v53  ;;  %v3988_v24 = vld [vmem:[#allocation106_spill] sm:$0xff]  ;;  %v3995_v19 = vld [vmem:[#allocation153_spill] sm:$0xff] }
 0x4a1   : > { %v1185_v15 = vadd.f32 %v3985_v8, %v1121_v32  ;;  %v1281_v17 = vadd.f32 %v1279_v39, %v1217_v7  ;;  %v1296_v11 = vadd.f32 %v3986_v9, %v1232_v13  ;;  %v1216_v35 = vadd.f32 %v3039_v50, %v1152_v25  ;;  %v3990_v50 = vld [vmem:[#allocation122_spill] sm:$0xff]  ;;  %v4004_v32 = vld [vmem:[#allocation155_spill] sm:$0xff]  ;;  %v4006_v55 = vld [vmem:[#allocation157_spill] sm:$0xff]  ;;  %s1625_s17 = sshll.u32 %s4020_s30, 4  ;;  %s1519_s24 = scalar_lea.sflag [#allocation9], %s4020_s30 }
 0x4a2   : > { %v1264_v6 = vadd.f32 %v3112_v16, %v1200_v33  ;;  %v1312_v21 = vadd.f32 %v2996_v60, %v1248_v27  ;;  %v1326_v49 = vadd.f32 %v3987_v52, %v3015_v61  ;;  %v1137_v34 = vadd.f32 %v3201_v48, %v1073_v28  ;;  %v3991_v16 = vld [vmem:[#allocation144_spill] sm:$0xff]  ;;  %v3993_v48 = vld [vmem:[#allocation141_spill] sm:$0xff]  ;;  %v4002_v13 = vld [vmem:[#allocation154_spill] sm:$0xff]  ;;  %s156_s19 = scalar_lea.vmem [#allocation10], %s1625_s17 }
 0x4a3   : > { %v1249_v47 = vadd.f32 %v1247_v1, %v1185_v15  ;;  %v1297_v59 = vadd.f32 %v3988_v24, %v1233_v23  ;;  %v1327_v10 = vadd.f32 %v3989_v40, %v3157_v14  ;;  %v1280_v3 = vadd.f32 %v3127_v54, %v1216_v35  ;;  %v3992_v61 = vld [vmem:[#allocation156_spill] sm:$0xff]  ;;  %v4003_v53 = vld [vmem:[#allocation114_spill] sm:$0xff]  ;;  %v4005_v39 = vld [vmem:[#allocation115_spill] sm:$0xff]  ;;  %s1532_s0 = sshll.u32 %s156_s19, 4  ;;  %s3342_s0 = int_to_ptr.vmem [resolvable:$true] %s1532_s0 }
 0x4a4   : > { %v1328_v38 = vadd.f32 %v1326_v49, %v1264_v6  ;;  %v1342_v63 = vadd.f32 %v3990_v50, %v3044_v41  ;;  %v1343_v60 = vadd.f32 %v3991_v16, %v3189_v18  ;;  %v1201_v45 = vadd.f32 %v2984_v2, %v1137_v34  ;;  %v3997_v41 = vld [vmem:[#allocation138_spill] sm:$0xff]  ;;  %v1474_v23 = vld [vmem:[#allocation4 + $0x7e] sm:$0xff]  ;;  %v1475_v28 = vld [vmem:[#allocation4 + $0x86] sm:$0xff]  ;;  %s1846_s7 = scalar_lea.vmem %s3342_s0, 256  ;;  %p1853_p1 = scmp.lt.s32.totalorder %s3342_s0, %s1851_s28 }
 0x4a5   : > { %v1313_v51 = vadd.f32 %v3992_v61, %v1249_v47  ;;  %v1359_v1 = vadd.f32 %v3993_v48, %v3210_v20  ;;  %v1374_v31 = vadd.f32 %v3994_v58, %v3082_v26  ;;  %v1360_v54 = vadd.f32 %v3995_v19, %v1296_v11  ;;  %v1442_v18 = vld [vmem:[#allocation4 + $0x4e] sm:$0xff]  ;;  %v1490_v56 = vld [vmem:[#allocation4 + $0x96] sm:$0xff]  ;;  %v4008_v8 = vld [vmem:[#allocation102_spill] sm:$0xff]  ;;  %p1847_p8 = scmp.ne.s32.totalorder %s3342_s0, %s1846_s7  ;;  %p1854_p3 = scmp.lt.s32.totalorder %s1852_s13, %s1846_s7 }
 0x4a6   : > { %v1344_v14 = vadd.f32 %v1342_v63, %v1280_v3  ;;  %v1375_v22 = vadd.f32 %v3996_v36, %v3223_v12  ;;  %v1390_v62 = vadd.f32 %v3997_v41, %v3131_v5  ;;  %v1459_v2 = vld [vmem:[#allocation4 + $0x6e] sm:$0xff]  ;;  %v1265_v4 = vadd.f32 %v3998_v44, %v1201_v45  ;;  %v4009_v15 = vld [vmem:[#allocation132_spill] sm:$0xff]  ;;  %v4025_v19 = vld [vmem:[#allocation143_spill] sm:$0xff] }
 0x4a7   : > { %v1345_v42 = vadd.f32 %v1343_v60, %v1281_v17  ;;  %v1361_v20 = vadd.f32 %v1359_v1, %v1297_v59  ;;  %v1376_v26 = vadd.f32 %v1374_v31, %v1312_v21  ;;  %v1391_v7 = vadd.f32 %v1389_v0, %v1385_v30  ;;  %v4007_v25 = vld [vmem:[#allocation118_spill] sm:$0xff]  ;;  %v1491_v21 = vld [vmem:[#allocation4 + $0x9e] sm:$0xff]  ;;  %v1493_v59 = vld [vmem:[#allocation4 + $0x146] sm:$0xff]  ;;  %p1848_p12 = pnand %p1847_p8, %p2018_p9  ;;  %p1855_p5 = por %p1854_p3, %p1853_p1 }
 0x4a8   : > { %v1377_v29 = vadd.f32 %v1375_v22, %v1313_v51  ;;  %v1392_v37 = vadd.f32 %v1390_v62, %v1328_v38  ;;  %v1408_v43 = vadd.f32 %v4001_v46, %v1344_v14  ;;  %v1329_v12 = vadd.f32 %v1327_v10, %v1265_v4  ;;  %v4015_v49 = vld [vmem:[#allocation109_spill] sm:$0xff]  ;;  %v4017_v3 = vld [vmem:[#allocation126_spill] sm:$0xff]  ;;  %v4019_v63 = vld [vmem:[#allocation113_spill] sm:$0xff] }
 0x4a9   : > { %v1422_v5 = vadd.f32 %v4003_v53, %v4002_v13  ;;  %v1423_v27 = vadd.f32 %v4005_v39, %v4004_v32  ;;  %v1438_v33 = vadd.f32 %v4007_v25, %v4006_v55  ;;  %v1439_v17 = vadd.f32 %v4009_v15, %v4008_v8  ;;  %v4018_v50 = vld [vmem:[#allocation152_spill] sm:$0xff]  ;;  %v4021_v60 = vld [vmem:[#allocation145_spill] sm:$0xff]  ;;  %v4027_v62 = vld [vmem:[#allocation134_spill] sm:$0xff]  ;;  %p1849_p0 = pneg %p1848_p12 }
 0x4aa   : > { %v4010_v30 = vstv %s3999_s29  ;;  %v4013_v35 = vstv %s4000_s11  ;;  %v1393_v52 = vadd.f32 %v1391_v7, %v1329_v12  ;;  %v1409_v34 = vadd.f32 %v4015_v49, %v1345_v42  ;;  %v4030_v42 = vld [vmem:[#allocation142_spill] sm:$0xff] }
 0x4ab   : > { %v1448_v0 = vmul.f32 %v4010_v30, %v1442_v18  ;;  %v4012_v9 = vmov %v4010_v30  ;;  %v1465_v6 = vmul.f32 %v4013_v35, %v1459_v2  ;;  %v1424_v47 = vadd.f32 %v1422_v5, %v1360_v54  ;;  %p1856_p6 = pnand %p1855_p5, %p1849_p0 }
 0x4ac   : > { %v1449_v11 = vmul.f32 %v4012_v9, %v1443_v57  ;;  %v1425_v24 = vadd.f32 %v1423_v27, %v1361_v20  ;;  %v1440_v40 = vadd.f32 %v1438_v33, %v1376_v26  ;;  %v1441_v10 = vadd.f32 %v1439_v17, %v1377_v29  ;;  %v4028_v57 = vld [vmem:[#allocation151_spill] sm:$0xff] }
 0x4ad   : > { %v1454_v38 = vadd.f32 %v4017_v3, %v1448_v0  ;;  %v1470_v16 = vadd.f32 %v4019_v63, %v4018_v50  ;;  %v4022_v61 = vstv %s4011_s23  ;;  %v4024_v58 = vstv %s4014_s16 }
 0x4ae   : > { %v1455_v45 = vadd.f32 %v4021_v60, %v1449_v11  ;;  %v1480_v51 = vmul.f32 %v4022_v61, %v1474_v23  ;;  %v4023_v48 = vmov %v4022_v61  ;;  %v1496_v31 = vmul.f32 %v4024_v58, %v1490_v56 }
 0x4af   : > { %v1481_v1 = vmul.f32 %v4023_v48, %v1475_v28  ;;  %v1456_v14 = vadd.f32 %v1454_v38, %v1392_v37  ;;  %v1471_v54 = vadd.f32 %v4025_v19, %v1465_v6  ;;  %v1472_v36 = vadd.f32 %v1470_v16, %v1408_v43 }
 0x4b0   : > { %v4026_v22 = vmov %v4024_v58  ;;  %v1486_v18 = vadd.f32 %v4027_v62, %v1480_v51  ;;  %v4029_v44 = vstv %s4016_s10  ;;  %v1502_v20 = vadd.f32 %v4030_v42, %v1496_v31 }
 0x4b1   : > { %v1497_v41 = vmul.f32 %v4026_v22, %v1491_v21  ;;  %v1487_v2 = vadd.f32 %v4028_v57, %v1481_v1  ;;  %v1501_v4 = vmul.f32 %v4029_v44, %v1493_v59  ;;  %v1457_v26 = vadd.f32 %v1455_v45, %v1393_v52 }
 0x4b2   : > { %v1473_v29 = vadd.f32 %v1471_v54, %v1409_v34  ;;  %v1488_v7 = vadd.f32 %v1486_v18, %v1424_v47  ;;  %v1504_v12 = vadd.f32 %v1502_v20, %v1440_v40  ;;  %v1513_v5 = vstv %s3317_s1 }
 0x4b3   : > { %v1489_v37 = vadd.f32 %v1487_v2, %v1425_v24  ;;  %v1503_v46 = vadd.f32 %v1501_v4, %v1497_v41 }
 0x4b4   : > { %v1506_v13 = vadd.f32 %v1504_v12, %v1456_v14  ;;  %v1508_v53 = vadd.f32 %v1488_v7, %v1472_v36 }
 0x4b5   : > { %v1505_v43 = vadd.f32 %v1503_v46, %v1441_v10  ;;  %v1509_v39 = vadd.f32 %v1489_v37, %v1473_v29 }
 0x4b6   : > { %v1510_v27 = vadd.f32 %v1508_v53, %v1506_v13 }
 0x4b7   : > { %v1507_v32 = vadd.f32 %v1505_v43, %v1457_v26 }
 0x4b8   : > { %v1514_v25 = vadd.f32 %v1513_v5, %v1510_v27 }
 0x4b9   : > { %v1511_v55 = vadd.f32 %v1509_v39, %v1507_v32 }
 0x4ba   : > { %1516 = vst.msk [vmem:[%s156_s19] sm:$0xff] %vm162_vm0, %v1514_v25 }
 0x4bb   : > { %v1515_v33 = vadd.f32 %v1513_v5, %v1511_v55 }
 0x4bd   : > { %1517 = vst.msk [vmem:[%s156_s19 + $0x8] sm:$0xff] %vm162_vm0, %v1515_v33 }
 0x4be   : > { %1859 = shalt.err (!%p1856_p6)
}
 0x4bf   : > { %s1860_s5 = scalar_lea.hbm %s3340_s8, 256  ;;  %s1864_s18 = scalar_lea.hbm %s4033_s6, 512 }
 0x4c0   : > { %p1861_p7 = scmp.ne.s32.totalorder %s3340_s8, %s1860_s5  ;;  %p1865_p13 = scmp.lt.s32.totalorder %s3340_s8, %s4033_s6 }
 0x4c1   : > { %p1866_p2 = scmp.lt.s32.totalorder %s1864_s18, %s1860_s5 }
 0x4c2   : > { %p1862_p10 = pnand %p1861_p7, %p2018_p9 }
 0x4c3   : > { %p1867_p8 = por %p1866_p2, %p1865_p13 }
 0x4c4   : > { %p1863_p4 = pneg %p1862_p10 }
 0x4c6   : > { %p1868_p12 = pnand %p1867_p8, %p1863_p4 }
 0x4c8   : > { %1871 = shalt.err (!%p1868_p12)
}
 0x4c9   : > { %s1947_s25 = smov 128   ;;  %s1948_s3 = smov 8  }
 0x4ca   : > { %1733 = dma.vmem_to_hbm [thread:$0]  (%p2018_p9), %s3342_s0, 256, %s3340_s8, %s1519_s24, %s1947_s25, %s1947_s25, %s1948_s3  }
 0x4cb PF: > { %s4034_s22 = sld [smem:[#allocation14_spill]] }
 0x4cc   : > { %s4036_s11 = sld [smem:[#allocation19_spill]] }
 0x4d1   : > { %s1547_s23 = sand.u32 1, %s4034_s22  }
 0x4d2   : > { %p4037_p0 = scmp.ge.s32.totalorder %s4036_s11, 2  ;;  %s1548_s16 = scalar_lea.sflag [#allocation9], %s1547_s23 }
 0x4d4   : > { %p1740_p1 = pnand %p4037_p0, %p2025_p11 }
 0x4d6   : > { %p1741_p3 = pneg %p1740_p1 }
 0x4d8   : > { %1903 = dma.done.wait (%p1741_p3), %s1548_s16, 256  }
 0x4d9   : > { %1905 = vsyncadd (%p1741_p3), %s1548_s16, 4294967040  ;;  %s22_s17 = sadd.s32 1, %s4036_s11   ;;  %s4038_s12 = sld [smem:[#allocation15_spill]] }
 0x4da   : > { %p19_p5 = scmp.ge.s32.totalorder %s22_s17, 4   ;;  %s4039_s13 = sld [smem:[#allocation16_spill]] }
 0x4db   : > { %s4040_s14 = sld [smem:[#allocation22_spill]] }
 0x4dc   : > { %s4041_s15 = sld [smem:[#allocation18_spill]]  ;;  %21 = sbr.rel (!%p19_p5) target bundleno = 13 (0xd), region = 90 }
 0x4dd   : > { %s4042_s16 = sld [smem:[#allocation20_spill]] }
 0x4e1   :  { %1553 = vsyncpa [#allocation8], 1 }
 0x4e2   :  { %1555 = vsyncpa [#allocation8 + $0x1], 1 }
 0x4e3   :  { %1556 = vsyncpa [#allocation9], 1 }
 0x4e4   :  { %1558 = vsyncpa [#allocation9 + $0x1], 1 }

</bundles_post_ra>
